<compile_context>
chip_gen: v6e
topology: v6e:2x2x1
jax: 0.10.0
libtpu: 0.0.40
codegen_flags: <defaults>
</compile_context>

<pallas_src>
import numpy as np
import jax
import jax.numpy as jnp
from jax import lax
from jax.experimental import pallas as pl
from jax.experimental.pallas import tpu as pltpu

LATTICE = 30
C1_OUT, C2_OUT = 8, 16
H1 = LATTICE - 2          # 28  (after conv1)
P1 = H1 // 2              # 14  (after pool1)
H2 = P1 - 2               # 12  (after conv2)
P2 = H2 // 2              # 6   (after pool2)
FLAT = C2_OUT * P2 * P2   # 576
HID = 32

SB, LB = 8, 128           # batch sublanes x batch lanes
BT = SB * LB              # 1024 samples per grid step
HALF = H1 // 2            # 14 conv1 columns per half-width chunk
PHALF = P1 // 2           # 7 pooled columns per half-width chunk


# ---------------------------------------------------------------------------
# Fused kernel: conv1+ReLU+pool1 -> conv2+ReLU+pool2 -> folded dense head.
# One batch tile (BT samples, batch on sublanes x lanes) per grid step.
# ---------------------------------------------------------------------------
def _xy_kernel(x_ref, w1_ref, b1_ref, w2_ref, b2_ref, wh_ref, bh_ref,
               o_ref, p1_ref):
    # x_ref block: (1, 30, 30, SB, LB); spatial dims are leading, batch is the vreg.

    # ---- Stage 1: conv1 (3x3 valid) + bias + ReLU + 2x2 maxpool ----------------
    # Per (channel, pooled row, column half): accumulate the two conv rows in
    # vregs (14 + 14), pool, and store 7 pooled columns to the p1 scratch.
    def c1_channel(c, carry):
        def c1_row(pr, inner):
            r0c = 2 * pr                                     # top conv row of this pooled row
            for half in range(2):                            # conv cols [0,14) / [14,28)
                xc0 = half * HALF
                r0 = jnp.zeros((HALF, SB, LB), jnp.float32)  # conv row 2*pr
                r1 = jnp.zeros((HALF, SB, LB), jnp.float32)  # conv row 2*pr + 1
                for iy in range(4):                          # input rows r0c + iy
                    xrow = x_ref[0, r0c + iy, xc0:xc0 + HALF + 2]      # (16, SB, LB)
                    if iy <= 2:                              # tap dy = iy for conv row 2*pr
                        for dx in range(3):
                            r0 = r0 + w1_ref[c, iy * 3 + dx] * xrow[dx:dx + HALF]
                    if iy >= 1:                              # tap dy = iy-1 for conv row 2*pr+1
                        for dx in range(3):
                            r1 = r1 + w1_ref[c, (iy - 1) * 3 + dx] * xrow[dx:dx + HALF]
                # relu(max_rows(conv) + b) == max_rows(relu(conv + b))  (bias const, relu monotone)
                h = jnp.maximum(jnp.maximum(r0, r1) + b1_ref[c], 0.0)  # (14, SB, LB)
                for j in range(PHALF):                       # column pool: free leading-dim picks
                    p1_ref[c, pr, half * PHALF + j] = jnp.maximum(h[2 * j], h[2 * j + 1])
            return inner
        lax.fori_loop(0, P1, c1_row, 0)
        return carry

    lax.fori_loop(0, C1_OUT, c1_channel, 0)

    # ---- Stage 2: conv2 + bias + ReLU + 2x2 maxpool + folded dense head --------
    # Per (output channel, pooled row): carry the two conv2 rows (12 + 12 vregs)
    # across the input-channel loop, then pool 2x2, ReLU and fold the head.
    def co_body(co, hacc):
        def pr2_body(pr2, hacc2):
            base = 2 * pr2

            def ci_body(i, acc):
                a0, a1 = acc
                for u_ in range(2):                          # manual unroll x2 over ci
                    ci = 2 * i + u_
                    for iy in range(4):                      # p1 rows base + iy
                        xrow = p1_ref[ci, base + iy]         # (14, SB, LB)
                        if iy <= 2:
                            for dx in range(3):
                                a0 = a0 + w2_ref[co, ci * 9 + iy * 3 + dx] * xrow[dx:dx + H2]
                        if iy >= 1:
                            for dx in range(3):
                                a1 = a1 + w2_ref[co, ci * 9 + (iy - 1) * 3 + dx] * xrow[dx:dx + H2]
                return (a0, a1)

            a0, a1 = lax.fori_loop(
                0, C1_OUT // 2, ci_body,
                (jnp.zeros((H2, SB, LB), jnp.float32),
                 jnp.zeros((H2, SB, LB), jnp.float32)))

            contrib = jnp.zeros((SB, LB), jnp.float32)
            for j in range(P2):                              # 6 pooled columns
                m4 = jnp.maximum(jnp.maximum(a0[2 * j], a0[2 * j + 1]),
                                 jnp.maximum(a1[2 * j], a1[2 * j + 1]))
                u = jnp.maximum(m4 + b2_ref[co], 0.0)        # relu(max + bias) == max(relu(. + bias))
                contrib = contrib + wh_ref[co, pr2 * P2 + j] * u
            return hacc2 + contrib

        return lax.fori_loop(0, P2, pr2_body, hacc)

    hacc = lax.fori_loop(0, C2_OUT, co_body, jnp.zeros((SB, LB), jnp.float32))
    logit = hacc + bh_ref[0]
    o_ref[0] = 1.0 / (1.0 + jnp.exp(-logit))                 # full-vreg (8, 128) store


# ---------------------------------------------------------------------------
# Parameters (deterministic synthetic init; shapes match the nn.Module).
# ---------------------------------------------------------------------------
def init_params(key):
    ks = jax.random.split(key, 8)
    return dict(
        w1=jax.random.normal(ks[0], (C1_OUT, 1, 3, 3), jnp.float32) * 0.3,
        b1=jax.random.normal(ks[1], (C1_OUT,), jnp.float32) * 0.1,
        w2=jax.random.normal(ks[2], (C2_OUT, C1_OUT, 3, 3), jnp.float32) * 0.1,
        b2=jax.random.normal(ks[3], (C2_OUT,), jnp.float32) * 0.1,
        wl1=jax.random.normal(ks[4], (HID, FLAT), jnp.float32) * 0.05,
        bl1=jax.random.normal(ks[5], (HID,), jnp.float32) * 0.1,
        wl2=jax.random.normal(ks[6], (1, HID), jnp.float32) * 0.3,
        bl2=jax.random.normal(ks[7], (1,), jnp.float32) * 0.1,
    )


def _fold_head(params):
    # l1 -> l2 has no nonlinearity in the module, so the head is one affine map.
    hp = lax.Precision.HIGHEST
    w_eff = jnp.dot(params["wl2"], params["wl1"], precision=hp)           # (1, 576)
    b_eff = (jnp.dot(params["wl2"], params["bl1"], precision=hp)
             + params["bl2"]).reshape(1)                                   # (1,)
    # Flatten order matches torch .view on (B, 16, 6, 6): f = co*36 + y*6 + x.
    return w_eff.reshape(C2_OUT, P2 * P2), b_eff


@jax.jit
def xy_forward(spin_data, params):
    B = spin_data.shape[0]
    x = spin_data[:, 0, :, :]                                # (B, 30, 30)

    # Pad batch to a multiple of BT and move it onto the (sublane, lane) vreg dims.
    Bp = ((B + BT - 1) // BT) * BT
    nG = Bp // BT
    xp = jnp.pad(x, ((0, Bp - B), (0, 0), (0, 0)))
    xg = jnp.transpose(xp.reshape(nG, BT, LATTICE, LATTICE), (0, 2, 3, 1))
    xg = xg.reshape(nG, LATTICE, LATTICE, SB, LB)            # (nG, 30, 30, 8, 128)

    w1_s = params["w1"].reshape(C1_OUT, 9)                   # (8, 9)   [c, dy*3+dx]
    w2_s = params["w2"].reshape(C2_OUT, C1_OUT * 9)          # (16, 72) [co, ci*9+dy*3+dx]
    w_eff, b_eff = _fold_head(params)                        # (16, 36), (1,)

    out = pl.pallas_call(
        _xy_kernel,
        out_shape=jax.ShapeDtypeStruct((nG, SB, LB), jnp.float32),
        grid=(nG,),
        in_specs=[
            pl.BlockSpec((1, LATTICE, LATTICE, SB, LB), lambda g: (g, 0, 0, 0, 0)),
            pl.BlockSpec(memory_space=pltpu.MemorySpace.SMEM),   # w1 scalars
            pl.BlockSpec(memory_space=pltpu.MemorySpace.SMEM),   # b1 scalars
            pl.BlockSpec(memory_space=pltpu.MemorySpace.SMEM),   # w2 scalars
            pl.BlockSpec(memory_space=pltpu.MemorySpace.SMEM),   # b2 scalars
            pl.BlockSpec(memory_space=pltpu.MemorySpace.SMEM),   # folded-head weights
            pl.BlockSpec(memory_space=pltpu.MemorySpace.SMEM),   # folded-head bias
        ],
        out_specs=pl.BlockSpec((1, SB, LB), lambda g: (g, 0, 0)),
        scratch_shapes=[
            pltpu.VMEM((C1_OUT, P1, P1, SB, LB), jnp.float32),   # pool1 output (~6.4 MB)
        ],
        compiler_params=pltpu.CompilerParams(
            dimension_semantics=("parallel",),           # batch tiles shard over v7x's 2 TCs
            vmem_limit_bytes=32 * 1024 * 1024,           # ~14 MiB used; needed on v5e (16 MiB default)
        ),
    )(xg, w1_s, params["b1"], w2_s, params["b2"], w_eff, b_eff)

    return out.reshape(Bp)[:B].reshape(B, 1)


# ---------------------------------------------------------------------------
# Pure-JAX reference (semantics of the PyTorch module) for a correctness check.
# ---------------------------------------------------------------------------
def xy_reference(spin_data, params):
    dn = ("NCHW", "OIHW", "NCHW")
    hp = lax.Precision.HIGHEST

    def maxpool2x2(t):
        b, c, h, w = t.shape
        return t.reshape(b, c, h // 2, 2, w // 2, 2).max(axis=(3, 5))

    h = lax.conv_general_dilated(spin_data, params["w1"], (1, 1), "VALID",
                                 dimension_numbers=dn, precision=hp)
    h = jnp.maximum(h + params["b1"][None, :, None, None], 0.0)
    h = maxpool2x2(h)
    h = lax.conv_general_dilated(h, params["w2"], (1, 1), "VALID",
                                 dimension_numbers=dn, precision=hp)
    h = jnp.maximum(h + params["b2"][None, :, None, None], 0.0)
    h = maxpool2x2(h)
    f = h.reshape(h.shape[0], -1)
    f = jnp.dot(f, params["wl1"].T, precision=hp) + params["bl1"]
    f = jnp.dot(f, params["wl2"].T, precision=hp) + params["bl2"]
    return jax.nn.sigmoid(f)


if __name__ == "__main__":
    key = jax.random.PRNGKey(0)
    pkey, xkey = jax.random.split(key)
    params = init_params(pkey)

    # XY-model spin angles in [0, 2*pi), batch of 2 lattices (NCHW like PyTorch).
    spin = jax.random.uniform(xkey, (2, 1, LATTICE, LATTICE), jnp.float32,
                              minval=0.0, maxval=2.0 * jnp.pi)

    out = jax.block_until_ready(xy_forward(spin, params))

    ref = np.asarray(xy_reference(spin, params))
    got = np.asarray(out)
    assert got.shape == (2, 1), got.shape
    if not np.allclose(got, ref, atol=2e-3, rtol=2e-3):
        raise AssertionError(f"Pallas/reference mismatch:\npallas={got}\nref={ref}")

    print("KERNEL_OK")
</pallas_src>

<mosaic_0001>
module attributes {stable_mosaic.version = 11 : i64} {
  func.func @_xy_kernel(%arg0: i32, %arg1: memref<1x30x30x8x128xf32, #tpu.memory_space<vmem>>, %arg2: memref<8x9xf32, #tpu.memory_space<smem>>, %arg3: memref<8xf32, #tpu.memory_space<smem>>, %arg4: memref<16x72xf32, #tpu.memory_space<smem>>, %arg5: memref<16xf32, #tpu.memory_space<smem>>, %arg6: memref<16x36xf32, #tpu.memory_space<smem>>, %arg7: memref<1xf32, #tpu.memory_space<smem>>, %arg8: memref<1x8x128xf32, #tpu.memory_space<vmem>>, %arg9: memref<8x14x14x8x128xf32, #tpu.memory_space<vmem>>) attributes {dimension_semantics = [#tpu.dimension_semantics<parallel>], iteration_bounds = array<i64: 1>, scalar_prefetch = 0 : i64, scratch_operands = 1 : i64, tpu.core_type = #tpu.core_type<tc>, window_params = [{transform_indices = @transform_0, window_bounds = array<i64: 1, 30, 30, 8, 128>}, {transform_indices = @transform_1, window_bounds = array<i64: 8, 9>}, {transform_indices = @transform_2, window_bounds = array<i64: 8>}, {transform_indices = @transform_3, window_bounds = array<i64: 16, 72>}, {transform_indices = @transform_4, window_bounds = array<i64: 16>}, {transform_indices = @transform_5, window_bounds = array<i64: 16, 36>}, {transform_indices = @transform_6, window_bounds = array<i64: 1>}, {transform_indices = @transform_7, window_bounds = array<i64: 1, 8, 128>}]} {
    %c0_i32 = arith.constant 0 : i32
    %c8_i32 = arith.constant 8 : i32
    %0 = arith.addi %c0_i32, %c8_i32 : i32
    %c1_i32 = arith.constant 1 : i32
    scf.for %arg10 = %c0_i32 to %0 step %c1_i32  : i32 {
      %c0_i32_10 = arith.constant 0 : i32
      %c14_i32 = arith.constant 14 : i32
      %17 = arith.addi %c0_i32_10, %c14_i32 : i32
      %c1_i32_11 = arith.constant 1 : i32
      scf.for %arg11 = %c0_i32_10 to %17 step %c1_i32_11  : i32 {
        %c2_i32 = arith.constant 2 : i32
        %18 = arith.muli %c2_i32, %arg11 : i32
        %cst_13 = arith.constant 0.000000e+00 : f32
        %19 = vector.broadcast %cst_13 : f32 to vector<14x8x128xf32>
        %cst_14 = arith.constant 0.000000e+00 : f32
        %20 = vector.broadcast %cst_14 : f32 to vector<14x8x128xf32>
        %c0_i32_15 = arith.constant 0 : i32
        %21 = arith.addi %18, %c0_i32_15 : i32
        %c0_16 = arith.constant 0 : index
        %22 = arith.index_cast %21 : i32 to index
        %c0_17 = arith.constant 0 : index
        %c0_18 = arith.constant 0 : index
        %c0_19 = arith.constant 0 : index
        %23 = vector.load %arg1[%c0_16, %22, %c0_17, %c0_18, %c0_19] : memref<1x30x30x8x128xf32, #tpu.memory_space<vmem>>, vector<1x1x16x8x128xf32>
        %24 = vector.shape_cast %23 : vector<1x1x16x8x128xf32> to vector<16x8x128xf32>
        %25 = arith.index_cast %arg10 : i32 to index
        %c0_20 = arith.constant 0 : index
        %26 = memref.load %arg2[%25, %c0_20] : memref<8x9xf32, #tpu.memory_space<smem>>
        %27 = vector.extract_strided_slice %24 {offsets = [0, 0, 0], sizes = [14, 8, 128], strides = [1, 1, 1]} : vector<16x8x128xf32> to vector<14x8x128xf32>
        %28 = vector.broadcast %26 : f32 to vector<14x8x128xf32>
        %29 = arith.mulf %28, %27 : vector<14x8x128xf32>
        %30 = arith.addf %19, %29 : vector<14x8x128xf32>
        %31 = arith.index_cast %arg10 : i32 to index
        %c1 = arith.constant 1 : index
        %32 = memref.load %arg2[%31, %c1] : memref<8x9xf32, #tpu.memory_space<smem>>
        %33 = vector.extract_strided_slice %24 {offsets = [1, 0, 0], sizes = [14, 8, 128], strides = [1, 1, 1]} : vector<16x8x128xf32> to vector<14x8x128xf32>
        %34 = vector.broadcast %32 : f32 to vector<14x8x128xf32>
        %35 = arith.mulf %34, %33 : vector<14x8x128xf32>
        %36 = arith.addf %30, %35 : vector<14x8x128xf32>
        %37 = arith.index_cast %arg10 : i32 to index
        %c2 = arith.constant 2 : index
        %38 = memref.load %arg2[%37, %c2] : memref<8x9xf32, #tpu.memory_space<smem>>
        %39 = vector.extract_strided_slice %24 {offsets = [2, 0, 0], sizes = [14, 8, 128], strides = [1, 1, 1]} : vector<16x8x128xf32> to vector<14x8x128xf32>
        %40 = vector.broadcast %38 : f32 to vector<14x8x128xf32>
        %41 = arith.mulf %40, %39 : vector<14x8x128xf32>
        %42 = arith.addf %36, %41 : vector<14x8x128xf32>
        %c1_i32_21 = arith.constant 1 : i32
        %43 = arith.addi %18, %c1_i32_21 : i32
        %c0_22 = arith.constant 0 : index
        %44 = arith.index_cast %43 : i32 to index
        %c0_23 = arith.constant 0 : index
        %c0_24 = arith.constant 0 : index
        %c0_25 = arith.constant 0 : index
        %45 = vector.load %arg1[%c0_22, %44, %c0_23, %c0_24, %c0_25] : memref<1x30x30x8x128xf32, #tpu.memory_space<vmem>>, vector<1x1x16x8x128xf32>
        %46 = vector.shape_cast %45 : vector<1x1x16x8x128xf32> to vector<16x8x128xf32>
        %47 = arith.index_cast %arg10 : i32 to index
        %c3 = arith.constant 3 : index
        %48 = memref.load %arg2[%47, %c3] : memref<8x9xf32, #tpu.memory_space<smem>>
        %49 = vector.extract_strided_slice %46 {offsets = [0, 0, 0], sizes = [14, 8, 128], strides = [1, 1, 1]} : vector<16x8x128xf32> to vector<14x8x128xf32>
        %50 = vector.broadcast %48 : f32 to vector<14x8x128xf32>
        %51 = arith.mulf %50, %49 : vector<14x8x128xf32>
        %52 = arith.addf %42, %51 : vector<14x8x128xf32>
        %53 = arith.index_cast %arg10 : i32 to index
        %c4 = arith.constant 4 : index
        %54 = memref.load %arg2[%53, %c4] : memref<8x9xf32, #tpu.memory_space<smem>>
        %55 = vector.extract_strided_slice %46 {offsets = [1, 0, 0], sizes = [14, 8, 128], strides = [1, 1, 1]} : vector<16x8x128xf32> to vector<14x8x128xf32>
        %56 = vector.broadcast %54 : f32 to vector<14x8x128xf32>
        %57 = arith.mulf %56, %55 : vector<14x8x128xf32>
        %58 = arith.addf %52, %57 : vector<14x8x128xf32>
        %59 = arith.index_cast %arg10 : i32 to index
        %c5 = arith.constant 5 : index
        %60 = memref.load %arg2[%59, %c5] : memref<8x9xf32, #tpu.memory_space<smem>>
        %61 = vector.extract_strided_slice %46 {offsets = [2, 0, 0], sizes = [14, 8, 128], strides = [1, 1, 1]} : vector<16x8x128xf32> to vector<14x8x128xf32>
        %62 = vector.broadcast %60 : f32 to vector<14x8x128xf32>
        %63 = arith.mulf %62, %61 : vector<14x8x128xf32>
        %64 = arith.addf %58, %63 : vector<14x8x128xf32>
        %65 = arith.index_cast %arg10 : i32 to index
        %c0_26 = arith.constant 0 : index
        %66 = memref.load %arg2[%65, %c0_26] : memref<8x9xf32, #tpu.memory_space<smem>>
        %67 = vector.extract_strided_slice %46 {offsets = [0, 0, 0], sizes = [14, 8, 128], strides = [1, 1, 1]} : vector<16x8x128xf32> to vector<14x8x128xf32>
        %68 = vector.broadcast %66 : f32 to vector<14x8x128xf32>
        %69 = arith.mulf %68, %67 : vector<14x8x128xf32>
        %70 = arith.addf %20, %69 : vector<14x8x128xf32>
        %71 = arith.index_cast %arg10 : i32 to index
        %c1_27 = arith.constant 1 : index
        %72 = memref.load %arg2[%71, %c1_27] : memref<8x9xf32, #tpu.memory_space<smem>>
        %73 = vector.extract_strided_slice %46 {offsets = [1, 0, 0], sizes = [14, 8, 128], strides = [1, 1, 1]} : vector<16x8x128xf32> to vector<14x8x128xf32>
        %74 = vector.broadcast %72 : f32 to vector<14x8x128xf32>
        %75 = arith.mulf %74, %73 : vector<14x8x128xf32>
        %76 = arith.addf %70, %75 : vector<14x8x128xf32>
        %77 = arith.index_cast %arg10 : i32 to index
        %c2_28 = arith.constant 2 : index
        %78 = memref.load %arg2[%77, %c2_28] : memref<8x9xf32, #tpu.memory_space<smem>>
        %79 = vector.extract_strided_slice %46 {offsets = [2, 0, 0], sizes = [14, 8, 128], strides = [1, 1, 1]} : vector<16x8x128xf32> to vector<14x8x128xf32>
        %80 = vector.broadcast %78 : f32 to vector<14x8x128xf32>
        %81 = arith.mulf %80, %79 : vector<14x8x128xf32>
        %82 = arith.addf %76, %81 : vector<14x8x128xf32>
        %c2_i32_29 = arith.constant 2 : i32
        %83 = arith.addi %18, %c2_i32_29 : i32
        %c0_30 = arith.constant 0 : index
        %84 = arith.index_cast %83 : i32 to index
        %c0_31 = arith.constant 0 : index
        %c0_32 = arith.constant 0 : index
        %c0_33 = arith.constant 0 : index
        %85 = vector.load %arg1[%c0_30, %84, %c0_31, %c0_32, %c0_33] : memref<1x30x30x8x128xf32, #tpu.memory_space<vmem>>, vector<1x1x16x8x128xf32>
        %86 = vector.shape_cast %85 : vector<1x1x16x8x128xf32> to vector<16x8x128xf32>
        %87 = arith.index_cast %arg10 : i32 to index
        %c6 = arith.constant 6 : index
        %88 = memref.load %arg2[%87, %c6] : memref<8x9xf32, #tpu.memory_space<smem>>
        %89 = vector.extract_strided_slice %86 {offsets = [0, 0, 0], sizes = [14, 8, 128], strides = [1, 1, 1]} : vector<16x8x128xf32> to vector<14x8x128xf32>
        %90 = vector.broadcast %88 : f32 to vector<14x8x128xf32>
        %91 = arith.mulf %90, %89 : vector<14x8x128xf32>
        %92 = arith.addf %64, %91 : vector<14x8x128xf32>
        %93 = arith.index_cast %arg10 : i32 to index
        %c7 = arith.constant 7 : index
        %94 = memref.load %arg2[%93, %c7] : memref<8x9xf32, #tpu.memory_space<smem>>
        %95 = vector.extract_strided_slice %86 {offsets = [1, 0, 0], sizes = [14, 8, 128], strides = [1, 1, 1]} : vector<16x8x128xf32> to vector<14x8x128xf32>
        %96 = vector.broadcast %94 : f32 to vector<14x8x128xf32>
        %97 = arith.mulf %96, %95 : vector<14x8x128xf32>
        %98 = arith.addf %92, %97 : vector<14x8x128xf32>
        %99 = arith.index_cast %arg10 : i32 to index
        %c8 = arith.constant 8 : index
        %100 = memref.load %arg2[%99, %c8] : memref<8x9xf32, #tpu.memory_space<smem>>
        %101 = vector.extract_strided_slice %86 {offsets = [2, 0, 0], sizes = [14, 8, 128], strides = [1, 1, 1]} : vector<16x8x128xf32> to vector<14x8x128xf32>
        %102 = vector.broadcast %100 : f32 to vector<14x8x128xf32>
        %103 = arith.mulf %102, %101 : vector<14x8x128xf32>
        %104 = arith.addf %98, %103 : vector<14x8x128xf32>
        %105 = arith.index_cast %arg10 : i32 to index
        %c3_34 = arith.constant 3 : index
        %106 = memref.load %arg2[%105, %c3_34] : memref<8x9xf32, #tpu.memory_space<smem>>
        %107 = vector.extract_strided_slice %86 {offsets = [0, 0, 0], sizes = [14, 8, 128], strides = [1, 1, 1]} : vector<16x8x128xf32> to vector<14x8x128xf32>
        %108 = vector.broadcast %106 : f32 to vector<14x8x128xf32>
        %109 = arith.mulf %108, %107 : vector<14x8x128xf32>
        %110 = arith.addf %82, %109 : vector<14x8x128xf32>
        %111 = arith.index_cast %arg10 : i32 to index
        %c4_35 = arith.constant 4 : index
        %112 = memref.load %arg2[%111, %c4_35] : memref<8x9xf32, #tpu.memory_space<smem>>
        %113 = vector.extract_strided_slice %86 {offsets = [1, 0, 0], sizes = [14, 8, 128], strides = [1, 1, 1]} : vector<16x8x128xf32> to vector<14x8x128xf32>
        %114 = vector.broadcast %112 : f32 to vector<14x8x128xf32>
        %115 = arith.mulf %114, %113 : vector<14x8x128xf32>
        %116 = arith.addf %110, %115 : vector<14x8x128xf32>
        %117 = arith.index_cast %arg10 : i32 to index
        %c5_36 = arith.constant 5 : index
        %118 = memref.load %arg2[%117, %c5_36] : memref<8x9xf32, #tpu.memory_space<smem>>
        %119 = vector.extract_strided_slice %86 {offsets = [2, 0, 0], sizes = [14, 8, 128], strides = [1, 1, 1]} : vector<16x8x128xf32> to vector<14x8x128xf32>
        %120 = vector.broadcast %118 : f32 to vector<14x8x128xf32>
        %121 = arith.mulf %120, %119 : vector<14x8x128xf32>
        %122 = arith.addf %116, %121 : vector<14x8x128xf32>
        %c3_i32 = arith.constant 3 : i32
        %123 = arith.addi %18, %c3_i32 : i32
        %c0_37 = arith.constant 0 : index
        %124 = arith.index_cast %123 : i32 to index
        %c0_38 = arith.constant 0 : index
        %c0_39 = arith.constant 0 : index
        %c0_40 = arith.constant 0 : index
        %125 = vector.load %arg1[%c0_37, %124, %c0_38, %c0_39, %c0_40] : memref<1x30x30x8x128xf32, #tpu.memory_space<vmem>>, vector<1x1x16x8x128xf32>
        %126 = vector.shape_cast %125 : vector<1x1x16x8x128xf32> to vector<16x8x128xf32>
        %127 = arith.index_cast %arg10 : i32 to index
        %c6_41 = arith.constant 6 : index
        %128 = memref.load %arg2[%127, %c6_41] : memref<8x9xf32, #tpu.memory_space<smem>>
        %129 = vector.extract_strided_slice %126 {offsets = [0, 0, 0], sizes = [14, 8, 128], strides = [1, 1, 1]} : vector<16x8x128xf32> to vector<14x8x128xf32>
        %130 = vector.broadcast %128 : f32 to vector<14x8x128xf32>
        %131 = arith.mulf %130, %129 : vector<14x8x128xf32>
        %132 = arith.addf %122, %131 : vector<14x8x128xf32>
        %133 = arith.index_cast %arg10 : i32 to index
        %c7_42 = arith.constant 7 : index
        %134 = memref.load %arg2[%133, %c7_42] : memref<8x9xf32, #tpu.memory_space<smem>>
        %135 = vector.extract_strided_slice %126 {offsets = [1, 0, 0], sizes = [14, 8, 128], strides = [1, 1, 1]} : vector<16x8x128xf32> to vector<14x8x128xf32>
        %136 = vector.broadcast %134 : f32 to vector<14x8x128xf32>
        %137 = arith.mulf %136, %135 : vector<14x8x128xf32>
        %138 = arith.addf %132, %137 : vector<14x8x128xf32>
        %139 = arith.index_cast %arg10 : i32 to index
        %c8_43 = arith.constant 8 : index
        %140 = memref.load %arg2[%139, %c8_43] : memref<8x9xf32, #tpu.memory_space<smem>>
        %141 = vector.extract_strided_slice %126 {offsets = [2, 0, 0], sizes = [14, 8, 128], strides = [1, 1, 1]} : vector<16x8x128xf32> to vector<14x8x128xf32>
        %142 = vector.broadcast %140 : f32 to vector<14x8x128xf32>
        %143 = arith.mulf %142, %141 : vector<14x8x128xf32>
        %144 = arith.addf %138, %143 : vector<14x8x128xf32>
        %145 = arith.maximumf %104, %144 : vector<14x8x128xf32>
        %146 = arith.index_cast %arg10 : i32 to index
        %147 = memref.load %arg3[%146] : memref<8xf32, #tpu.memory_space<smem>>
        %148 = vector.broadcast %147 : f32 to vector<14x8x128xf32>
        %149 = arith.addf %145, %148 : vector<14x8x128xf32>
        %cst_44 = arith.constant 0.000000e+00 : f32
        %150 = vector.broadcast %cst_44 : f32 to vector<14x8x128xf32>
        %151 = arith.maximumf %149, %150 : vector<14x8x128xf32>
        %152 = vector.extract_strided_slice %151 {offsets = [0, 0, 0], sizes = [1, 8, 128], strides = [1, 1, 1]} : vector<14x8x128xf32> to vector<1x8x128xf32>
        %153 = vector.shape_cast %152 : vector<1x8x128xf32> to vector<8x128xf32>
        %154 = vector.extract_strided_slice %151 {offsets = [1, 0, 0], sizes = [1, 8, 128], strides = [1, 1, 1]} : vector<14x8x128xf32> to vector<1x8x128xf32>
        %155 = vector.shape_cast %154 : vector<1x8x128xf32> to vector<8x128xf32>
        %156 = arith.maximumf %153, %155 : vector<8x128xf32>
        %157 = arith.index_cast %arg10 : i32 to index
        %158 = arith.index_cast %arg11 : i32 to index
        %c0_45 = arith.constant 0 : index
        %c0_46 = arith.constant 0 : index
        %c0_47 = arith.constant 0 : index
        %159 = vector.load %arg9[%157, %158, %c0_45, %c0_46, %c0_47] : memref<8x14x14x8x128xf32, #tpu.memory_space<vmem>>, vector<1x1x1x8x128xf32>
        %160 = vector.shape_cast %159 : vector<1x1x1x8x128xf32> to vector<8x128xf32>
        %161 = vector.shape_cast %156 : vector<8x128xf32> to vector<1x1x1x8x128xf32>
        tpu.vector_store %arg9[%157, %158, %c0_45, %c0_46, %c0_47], %161 {strides = array<i32>} : memref<8x14x14x8x128xf32, #tpu.memory_space<vmem>>, vector<1x1x1x8x128xf32>,
        %162 = vector.extract_strided_slice %151 {offsets = [2, 0, 0], sizes = [1, 8, 128], strides = [1, 1, 1]} : vector<14x8x128xf32> to vector<1x8x128xf32>
        %163 = vector.shape_cast %162 : vector<1x8x128xf32> to vector<8x128xf32>
        %164 = vector.extract_strided_slice %151 {offsets = [3, 0, 0], sizes = [1, 8, 128], strides = [1, 1, 1]} : vector<14x8x128xf32> to vector<1x8x128xf32>
        %165 = vector.shape_cast %164 : vector<1x8x128xf32> to vector<8x128xf32>
        %166 = arith.maximumf %163, %165 : vector<8x128xf32>
        %167 = arith.index_cast %arg10 : i32 to index
        %168 = arith.index_cast %arg11 : i32 to index
        %c1_48 = arith.constant 1 : index
        %c0_49 = arith.constant 0 : index
        %c0_50 = arith.constant 0 : index
        %169 = vector.load %arg9[%167, %168, %c1_48, %c0_49, %c0_50] : memref<8x14x14x8x128xf32, #tpu.memory_space<vmem>>, vector<1x1x1x8x128xf32>
        %170 = vector.shape_cast %169 : vector<1x1x1x8x128xf32> to vector<8x128xf32>
        %171 = vector.shape_cast %166 : vector<8x128xf32> to vector<1x1x1x8x128xf32>
        tpu.vector_store %arg9[%167, %168, %c1_48, %c0_49, %c0_50], %171 {strides = array<i32>} : memref<8x14x14x8x128xf32, #tpu.memory_space<vmem>>, vector<1x1x1x8x128xf32>,
        %172 = vector.extract_strided_slice %151 {offsets = [4, 0, 0], sizes = [1, 8, 128], strides = [1, 1, 1]} : vector<14x8x128xf32> to vector<1x8x128xf32>
        %173 = vector.shape_cast %172 : vector<1x8x128xf32> to vector<8x128xf32>
        %174 = vector.extract_strided_slice %151 {offsets = [5, 0, 0], sizes = [1, 8, 128], strides = [1, 1, 1]} : vector<14x8x128xf32> to vector<1x8x128xf32>
        %175 = vector.shape_cast %174 : vector<1x8x128xf32> to vector<8x128xf32>
        %176 = arith.maximumf %173, %175 : vector<8x128xf32>
        %177 = arith.index_cast %arg10 : i32 to index
        %178 = arith.index_cast %arg11 : i32 to index
        %c2_51 = arith.constant 2 : index
        %c0_52 = arith.constant 0 : index
        %c0_53 = arith.constant 0 : index
        %179 = vector.load %arg9[%177, %178, %c2_51, %c0_52, %c0_53] : memref<8x14x14x8x128xf32, #tpu.memory_space<vmem>>, vector<1x1x1x8x128xf32>
        %180 = vector.shape_cast %179 : vector<1x1x1x8x128xf32> to vector<8x128xf32>
        %181 = vector.shape_cast %176 : vector<8x128xf32> to vector<1x1x1x8x128xf32>
        tpu.vector_store %arg9[%177, %178, %c2_51, %c0_52, %c0_53], %181 {strides = array<i32>} : memref<8x14x14x8x128xf32, #tpu.memory_space<vmem>>, vector<1x1x1x8x128xf32>,
        %182 = vector.extract_strided_slice %151 {offsets = [6, 0, 0], sizes = [1, 8, 128], strides = [1, 1, 1]} : vector<14x8x128xf32> to vector<1x8x128xf32>
        %183 = vector.shape_cast %182 : vector<1x8x128xf32> to vector<8x128xf32>
        %184 = vector.extract_strided_slice %151 {offsets = [7, 0, 0], sizes = [1, 8, 128], strides = [1, 1, 1]} : vector<14x8x128xf32> to vector<1x8x128xf32>
        %185 = vector.shape_cast %184 : vector<1x8x128xf32> to vector<8x128xf32>
        %186 = arith.maximumf %183, %185 : vector<8x128xf32>
        %187 = arith.index_cast %arg10 : i32 to index
        %188 = arith.index_cast %arg11 : i32 to index
        %c3_54 = arith.constant 3 : index
        %c0_55 = arith.constant 0 : index
        %c0_56 = arith.constant 0 : index
        %189 = vector.load %arg9[%187, %188, %c3_54, %c0_55, %c0_56] : memref<8x14x14x8x128xf32, #tpu.memory_space<vmem>>, vector<1x1x1x8x128xf32>
        %190 = vector.shape_cast %189 : vector<1x1x1x8x128xf32> to vector<8x128xf32>
        %191 = vector.shape_cast %186 : vector<8x128xf32> to vector<1x1x1x8x128xf32>
        tpu.vector_store %arg9[%187, %188, %c3_54, %c0_55, %c0_56], %191 {strides = array<i32>} : memref<8x14x14x8x128xf32, #tpu.memory_space<vmem>>, vector<1x1x1x8x128xf32>,
        %192 = vector.extract_strided_slice %151 {offsets = [8, 0, 0], sizes = [1, 8, 128], strides = [1, 1, 1]} : vector<14x8x128xf32> to vector<1x8x128xf32>
        %193 = vector.shape_cast %192 : vector<1x8x128xf32> to vector<8x128xf32>
        %194 = vector.extract_strided_slice %151 {offsets = [9, 0, 0], sizes = [1, 8, 128], strides = [1, 1, 1]} : vector<14x8x128xf32> to vector<1x8x128xf32>
        %195 = vector.shape_cast %194 : vector<1x8x128xf32> to vector<8x128xf32>
        %196 = arith.maximumf %193, %195 : vector<8x128xf32>
        %197 = arith.index_cast %arg10 : i32 to index
        %198 = arith.index_cast %arg11 : i32 to index
        %c4_57 = arith.constant 4 : index
        %c0_58 = arith.constant 0 : index
        %c0_59 = arith.constant 0 : index
        %199 = vector.load %arg9[%197, %198, %c4_57, %c0_58, %c0_59] : memref<8x14x14x8x128xf32, #tpu.memory_space<vmem>>, vector<1x1x1x8x128xf32>
        %200 = vector.shape_cast %199 : vector<1x1x1x8x128xf32> to vector<8x128xf32>
        %201 = vector.shape_cast %196 : vector<8x128xf32> to vector<1x1x1x8x128xf32>
        tpu.vector_store %arg9[%197, %198, %c4_57, %c0_58, %c0_59], %201 {strides = array<i32>} : memref<8x14x14x8x128xf32, #tpu.memory_space<vmem>>, vector<1x1x1x8x128xf32>,
        %202 = vector.extract_strided_slice %151 {offsets = [10, 0, 0], sizes = [1, 8, 128], strides = [1, 1, 1]} : vector<14x8x128xf32> to vector<1x8x128xf32>
        %203 = vector.shape_cast %202 : vector<1x8x128xf32> to vector<8x128xf32>
        %204 = vector.extract_strided_slice %151 {offsets = [11, 0, 0], sizes = [1, 8, 128], strides = [1, 1, 1]} : vector<14x8x128xf32> to vector<1x8x128xf32>
        %205 = vector.shape_cast %204 : vector<1x8x128xf32> to vector<8x128xf32>
        %206 = arith.maximumf %203, %205 : vector<8x128xf32>
        %207 = arith.index_cast %arg10 : i32 to index
        %208 = arith.index_cast %arg11 : i32 to index
        %c5_60 = arith.constant 5 : index
        %c0_61 = arith.constant 0 : index
        %c0_62 = arith.constant 0 : index
        %209 = vector.load %arg9[%207, %208, %c5_60, %c0_61, %c0_62] : memref<8x14x14x8x128xf32, #tpu.memory_space<vmem>>, vector<1x1x1x8x128xf32>
        %210 = vector.shape_cast %209 : vector<1x1x1x8x128xf32> to vector<8x128xf32>
        %211 = vector.shape_cast %206 : vector<8x128xf32> to vector<1x1x1x8x128xf32>
        tpu.vector_store %arg9[%207, %208, %c5_60, %c0_61, %c0_62], %211 {strides = array<i32>} : memref<8x14x14x8x128xf32, #tpu.memory_space<vmem>>, vector<1x1x1x8x128xf32>,
        %212 = vector.extract_strided_slice %151 {offsets = [12, 0, 0], sizes = [1, 8, 128], strides = [1, 1, 1]} : vector<14x8x128xf32> to vector<1x8x128xf32>
        %213 = vector.shape_cast %212 : vector<1x8x128xf32> to vector<8x128xf32>
        %214 = vector.extract_strided_slice %151 {offsets = [13, 0, 0], sizes = [1, 8, 128], strides = [1, 1, 1]} : vector<14x8x128xf32> to vector<1x8x128xf32>
        %215 = vector.shape_cast %214 : vector<1x8x128xf32> to vector<8x128xf32>
        %216 = arith.maximumf %213, %215 : vector<8x128xf32>
        %217 = arith.index_cast %arg10 : i32 to index
        %218 = arith.index_cast %arg11 : i32 to index
        %c6_63 = arith.constant 6 : index
        %c0_64 = arith.constant 0 : index
        %c0_65 = arith.constant 0 : index
        %219 = vector.load %arg9[%217, %218, %c6_63, %c0_64, %c0_65] : memref<8x14x14x8x128xf32, #tpu.memory_space<vmem>>, vector<1x1x1x8x128xf32>
        %220 = vector.shape_cast %219 : vector<1x1x1x8x128xf32> to vector<8x128xf32>
        %221 = vector.shape_cast %216 : vector<8x128xf32> to vector<1x1x1x8x128xf32>
        tpu.vector_store %arg9[%217, %218, %c6_63, %c0_64, %c0_65], %221 {strides = array<i32>} : memref<8x14x14x8x128xf32, #tpu.memory_space<vmem>>, vector<1x1x1x8x128xf32>,
        %cst_66 = arith.constant 0.000000e+00 : f32
        %222 = vector.broadcast %cst_66 : f32 to vector<14x8x128xf32>
        %cst_67 = arith.constant 0.000000e+00 : f32
        %223 = vector.broadcast %cst_67 : f32 to vector<14x8x128xf32>
        %c0_i32_68 = arith.constant 0 : i32
        %224 = arith.addi %18, %c0_i32_68 : i32
        %c0_69 = arith.constant 0 : index
        %225 = arith.index_cast %224 : i32 to index
        %c14 = arith.constant 14 : index
        %c0_70 = arith.constant 0 : index
        %c0_71 = arith.constant 0 : index
        %226 = vector.load %arg1[%c0_69, %225, %c14, %c0_70, %c0_71] : memref<1x30x30x8x128xf32, #tpu.memory_space<vmem>>, vector<1x1x16x8x128xf32>
        %227 = vector.shape_cast %226 : vector<1x1x16x8x128xf32> to vector<16x8x128xf32>
        %228 = arith.index_cast %arg10 : i32 to index
        %c0_72 = arith.constant 0 : index
        %229 = memref.load %arg2[%228, %c0_72] : memref<8x9xf32, #tpu.memory_space<smem>>
        %230 = vector.extract_strided_slice %227 {offsets = [0, 0, 0], sizes = [14, 8, 128], strides = [1, 1, 1]} : vector<16x8x128xf32> to vector<14x8x128xf32>
        %231 = vector.broadcast %229 : f32 to vector<14x8x128xf32>
        %232 = arith.mulf %231, %230 : vector<14x8x128xf32>
        %233 = arith.addf %222, %232 : vector<14x8x128xf32>
        %234 = arith.index_cast %arg10 : i32 to index
        %c1_73 = arith.constant 1 : index
        %235 = memref.load %arg2[%234, %c1_73] : memref<8x9xf32, #tpu.memory_space<smem>>
        %236 = vector.extract_strided_slice %227 {offsets = [1, 0, 0], sizes = [14, 8, 128], strides = [1, 1, 1]} : vector<16x8x128xf32> to vector<14x8x128xf32>
        %237 = vector.broadcast %235 : f32 to vector<14x8x128xf32>
        %238 = arith.mulf %237, %236 : vector<14x8x128xf32>
        %239 = arith.addf %233, %238 : vector<14x8x128xf32>
        %240 = arith.index_cast %arg10 : i32 to index
        %c2_74 = arith.constant 2 : index
        %241 = memref.load %arg2[%240, %c2_74] : memref<8x9xf32, #tpu.memory_space<smem>>
        %242 = vector.extract_strided_slice %227 {offsets = [2, 0, 0], sizes = [14, 8, 128], strides = [1, 1, 1]} : vector<16x8x128xf32> to vector<14x8x128xf32>
        %243 = vector.broadcast %241 : f32 to vector<14x8x128xf32>
        %244 = arith.mulf %243, %242 : vector<14x8x128xf32>
        %245 = arith.addf %239, %244 : vector<14x8x128xf32>
        %c1_i32_75 = arith.constant 1 : i32
        %246 = arith.addi %18, %c1_i32_75 : i32
        %c0_76 = arith.constant 0 : index
        %247 = arith.index_cast %246 : i32 to index
        %c14_77 = arith.constant 14 : index
        %c0_78 = arith.constant 0 : index
        %c0_79 = arith.constant 0 : index
        %248 = vector.load %arg1[%c0_76, %247, %c14_77, %c0_78, %c0_79] : memref<1x30x30x8x128xf32, #tpu.memory_space<vmem>>, vector<1x1x16x8x128xf32>
        %249 = vector.shape_cast %248 : vector<1x1x16x8x128xf32> to vector<16x8x128xf32>
        %250 = arith.index_cast %arg10 : i32 to index
        %c3_80 = arith.constant 3 : index
        %251 = memref.load %arg2[%250, %c3_80] : memref<8x9xf32, #tpu.memory_space<smem>>
        %252 = vector.extract_strided_slice %249 {offsets = [0, 0, 0], sizes = [14, 8, 128], strides = [1, 1, 1]} : vector<16x8x128xf32> to vector<14x8x128xf32>
        %253 = vector.broadcast %251 : f32 to vector<14x8x128xf32>
        %254 = arith.mulf %253, %252 : vector<14x8x128xf32>
        %255 = arith.addf %245, %254 : vector<14x8x128xf32>
        %256 = arith.index_cast %arg10 : i32 to index
        %c4_81 = arith.constant 4 : index
        %257 = memref.load %arg2[%256, %c4_81] : memref<8x9xf32, #tpu.memory_space<smem>>
        %258 = vector.extract_strided_slice %249 {offsets = [1, 0, 0], sizes = [14, 8, 128], strides = [1, 1, 1]} : vector<16x8x128xf32> to vector<14x8x128xf32>
        %259 = vector.broadcast %257 : f32 to vector<14x8x128xf32>
        %260 = arith.mulf %259, %258 : vector<14x8x128xf32>
        %261 = arith.addf %255, %260 : vector<14x8x128xf32>
        %262 = arith.index_cast %arg10 : i32 to index
        %c5_82 = arith.constant 5 : index
        %263 = memref.load %arg2[%262, %c5_82] : memref<8x9xf32, #tpu.memory_space<smem>>
        %264 = vector.extract_strided_slice %249 {offsets = [2, 0, 0], sizes = [14, 8, 128], strides = [1, 1, 1]} : vector<16x8x128xf32> to vector<14x8x128xf32>
        %265 = vector.broadcast %263 : f32 to vector<14x8x128xf32>
        %266 = arith.mulf %265, %264 : vector<14x8x128xf32>
        %267 = arith.addf %261, %266 : vector<14x8x128xf32>
        %268 = arith.index_cast %arg10 : i32 to index
        %c0_83 = arith.constant 0 : index
        %269 = memref.load %arg2[%268, %c0_83] : memref<8x9xf32, #tpu.memory_space<smem>>
        %270 = vector.extract_strided_slice %249 {offsets = [0, 0, 0], sizes = [14, 8, 128], strides = [1, 1, 1]} : vector<16x8x128xf32> to vector<14x8x128xf32>
        %271 = vector.broadcast %269 : f32 to vector<14x8x128xf32>
        %272 = arith.mulf %271, %270 : vector<14x8x128xf32>
        %273 = arith.addf %223, %272 : vector<14x8x128xf32>
        %274 = arith.index_cast %arg10 : i32 to index
        %c1_84 = arith.constant 1 : index
        %275 = memref.load %arg2[%274, %c1_84] : memref<8x9xf32, #tpu.memory_space<smem>>
        %276 = vector.extract_strided_slice %249 {offsets = [1, 0, 0], sizes = [14, 8, 128], strides = [1, 1, 1]} : vector<16x8x128xf32> to vector<14x8x128xf32>
        %277 = vector.broadcast %275 : f32 to vector<14x8x128xf32>
        %278 = arith.mulf %277, %276 : vector<14x8x128xf32>
        %279 = arith.addf %273, %278 : vector<14x8x128xf32>
        %280 = arith.index_cast %arg10 : i32 to index
        %c2_85 = arith.constant 2 : index
        %281 = memref.load %arg2[%280, %c2_85] : memref<8x9xf32, #tpu.memory_space<smem>>
        %282 = vector.extract_strided_slice %249 {offsets = [2, 0, 0], sizes = [14, 8, 128], strides = [1, 1, 1]} : vector<16x8x128xf32> to vector<14x8x128xf32>
        %283 = vector.broadcast %281 : f32 to vector<14x8x128xf32>
        %284 = arith.mulf %283, %282 : vector<14x8x128xf32>
        %285 = arith.addf %279, %284 : vector<14x8x128xf32>
        %c2_i32_86 = arith.constant 2 : i32
        %286 = arith.addi %18, %c2_i32_86 : i32
        %c0_87 = arith.constant 0 : index
        %287 = arith.index_cast %286 : i32 to index
        %c14_88 = arith.constant 14 : index
        %c0_89 = arith.constant 0 : index
        %c0_90 = arith.constant 0 : index
        %288 = vector.load %arg1[%c0_87, %287, %c14_88, %c0_89, %c0_90] : memref<1x30x30x8x128xf32, #tpu.memory_space<vmem>>, vector<1x1x16x8x128xf32>
        %289 = vector.shape_cast %288 : vector<1x1x16x8x128xf32> to vector<16x8x128xf32>
        %290 = arith.index_cast %arg10 : i32 to index
        %c6_91 = arith.constant 6 : index
        %291 = memref.load %arg2[%290, %c6_91] : memref<8x9xf32, #tpu.memory_space<smem>>
        %292 = vector.extract_strided_slice %289 {offsets = [0, 0, 0], sizes = [14, 8, 128], strides = [1, 1, 1]} : vector<16x8x128xf32> to vector<14x8x128xf32>
        %293 = vector.broadcast %291 : f32 to vector<14x8x128xf32>
        %294 = arith.mulf %293, %292 : vector<14x8x128xf32>
        %295 = arith.addf %267, %294 : vector<14x8x128xf32>
        %296 = arith.index_cast %arg10 : i32 to index
        %c7_92 = arith.constant 7 : index
        %297 = memref.load %arg2[%296, %c7_92] : memref<8x9xf32, #tpu.memory_space<smem>>
        %298 = vector.extract_strided_slice %289 {offsets = [1, 0, 0], sizes = [14, 8, 128], strides = [1, 1, 1]} : vector<16x8x128xf32> to vector<14x8x128xf32>
        %299 = vector.broadcast %297 : f32 to vector<14x8x128xf32>
        %300 = arith.mulf %299, %298 : vector<14x8x128xf32>
        %301 = arith.addf %295, %300 : vector<14x8x128xf32>
        %302 = arith.index_cast %arg10 : i32 to index
        %c8_93 = arith.constant 8 : index
        %303 = memref.load %arg2[%302, %c8_93] : memref<8x9xf32, #tpu.memory_space<smem>>
        %304 = vector.extract_strided_slice %289 {offsets = [2, 0, 0], sizes = [14, 8, 128], strides = [1, 1, 1]} : vector<16x8x128xf32> to vector<14x8x128xf32>
        %305 = vector.broadcast %303 : f32 to vector<14x8x128xf32>
        %306 = arith.mulf %305, %304 : vector<14x8x128xf32>
        %307 = arith.addf %301, %306 : vector<14x8x128xf32>
        %308 = arith.index_cast %arg10 : i32 to index
        %c3_94 = arith.constant 3 : index
        %309 = memref.load %arg2[%308, %c3_94] : memref<8x9xf32, #tpu.memory_space<smem>>
        %310 = vector.extract_strided_slice %289 {offsets = [0, 0, 0], sizes = [14, 8, 128], strides = [1, 1, 1]} : vector<16x8x128xf32> to vector<14x8x128xf32>
        %311 = vector.broadcast %309 : f32 to vector<14x8x128xf32>
        %312 = arith.mulf %311, %310 : vector<14x8x128xf32>
        %313 = arith.addf %285, %312 : vector<14x8x128xf32>
        %314 = arith.index_cast %arg10 : i32 to index
        %c4_95 = arith.constant 4 : index
        %315 = memref.load %arg2[%314, %c4_95] : memref<8x9xf32, #tpu.memory_space<smem>>
        %316 = vector.extract_strided_slice %289 {offsets = [1, 0, 0], sizes = [14, 8, 128], strides = [1, 1, 1]} : vector<16x8x128xf32> to vector<14x8x128xf32>
        %317 = vector.broadcast %315 : f32 to vector<14x8x128xf32>
        %318 = arith.mulf %317, %316 : vector<14x8x128xf32>
        %319 = arith.addf %313, %318 : vector<14x8x128xf32>
        %320 = arith.index_cast %arg10 : i32 to index
        %c5_96 = arith.constant 5 : index
        %321 = memref.load %arg2[%320, %c5_96] : memref<8x9xf32, #tpu.memory_space<smem>>
        %322 = vector.extract_strided_slice %289 {offsets = [2, 0, 0], sizes = [14, 8, 128], strides = [1, 1, 1]} : vector<16x8x128xf32> to vector<14x8x128xf32>
        %323 = vector.broadcast %321 : f32 to vector<14x8x128xf32>
        %324 = arith.mulf %323, %322 : vector<14x8x128xf32>
        %325 = arith.addf %319, %324 : vector<14x8x128xf32>
        %c3_i32_97 = arith.constant 3 : i32
        %326 = arith.addi %18, %c3_i32_97 : i32
        %c0_98 = arith.constant 0 : index
        %327 = arith.index_cast %326 : i32 to index
        %c14_99 = arith.constant 14 : index
        %c0_100 = arith.constant 0 : index
        %c0_101 = arith.constant 0 : index
        %328 = vector.load %arg1[%c0_98, %327, %c14_99, %c0_100, %c0_101] : memref<1x30x30x8x128xf32, #tpu.memory_space<vmem>>, vector<1x1x16x8x128xf32>
        %329 = vector.shape_cast %328 : vector<1x1x16x8x128xf32> to vector<16x8x128xf32>
        %330 = arith.index_cast %arg10 : i32 to index
        %c6_102 = arith.constant 6 : index
        %331 = memref.load %arg2[%330, %c6_102] : memref<8x9xf32, #tpu.memory_space<smem>>
        %332 = vector.extract_strided_slice %329 {offsets = [0, 0, 0], sizes = [14, 8, 128], strides = [1, 1, 1]} : vector<16x8x128xf32> to vector<14x8x128xf32>
        %333 = vector.broadcast %331 : f32 to vector<14x8x128xf32>
        %334 = arith.mulf %333, %332 : vector<14x8x128xf32>
        %335 = arith.addf %325, %334 : vector<14x8x128xf32>
        %336 = arith.index_cast %arg10 : i32 to index
        %c7_103 = arith.constant 7 : index
        %337 = memref.load %arg2[%336, %c7_103] : memref<8x9xf32, #tpu.memory_space<smem>>
        %338 = vector.extract_strided_slice %329 {offsets = [1, 0, 0], sizes = [14, 8, 128], strides = [1, 1, 1]} : vector<16x8x128xf32> to vector<14x8x128xf32>
        %339 = vector.broadcast %337 : f32 to vector<14x8x128xf32>
        %340 = arith.mulf %339, %338 : vector<14x8x128xf32>
        %341 = arith.addf %335, %340 : vector<14x8x128xf32>
        %342 = arith.index_cast %arg10 : i32 to index
        %c8_104 = arith.constant 8 : index
        %343 = memref.load %arg2[%342, %c8_104] : memref<8x9xf32, #tpu.memory_space<smem>>
        %344 = vector.extract_strided_slice %329 {offsets = [2, 0, 0], sizes = [14, 8, 128], strides = [1, 1, 1]} : vector<16x8x128xf32> to vector<14x8x128xf32>
        %345 = vector.broadcast %343 : f32 to vector<14x8x128xf32>
        %346 = arith.mulf %345, %344 : vector<14x8x128xf32>
        %347 = arith.addf %341, %346 : vector<14x8x128xf32>
        %348 = arith.maximumf %307, %347 : vector<14x8x128xf32>
        %349 = arith.index_cast %arg10 : i32 to index
        %350 = memref.load %arg3[%349] : memref<8xf32, #tpu.memory_space<smem>>
        %351 = vector.broadcast %350 : f32 to vector<14x8x128xf32>
        %352 = arith.addf %348, %351 : vector<14x8x128xf32>
        %cst_105 = arith.constant 0.000000e+00 : f32
        %353 = vector.broadcast %cst_105 : f32 to vector<14x8x128xf32>
        %354 = arith.maximumf %352, %353 : vector<14x8x128xf32>
        %355 = vector.extract_strided_slice %354 {offsets = [0, 0, 0], sizes = [1, 8, 128], strides = [1, 1, 1]} : vector<14x8x128xf32> to vector<1x8x128xf32>
        %356 = vector.shape_cast %355 : vector<1x8x128xf32> to vector<8x128xf32>
        %357 = vector.extract_strided_slice %354 {offsets = [1, 0, 0], sizes = [1, 8, 128], strides = [1, 1, 1]} : vector<14x8x128xf32> to vector<1x8x128xf32>
        %358 = vector.shape_cast %357 : vector<1x8x128xf32> to vector<8x128xf32>
        %359 = arith.maximumf %356, %358 : vector<8x128xf32>
        %360 = arith.index_cast %arg10 : i32 to index
        %361 = arith.index_cast %arg11 : i32 to index
        %c7_106 = arith.constant 7 : index
        %c0_107 = arith.constant 0 : index
        %c0_108 = arith.constant 0 : index
        %362 = vector.load %arg9[%360, %361, %c7_106, %c0_107, %c0_108] : memref<8x14x14x8x128xf32, #tpu.memory_space<vmem>>, vector<1x1x1x8x128xf32>
        %363 = vector.shape_cast %362 : vector<1x1x1x8x128xf32> to vector<8x128xf32>
        %364 = vector.shape_cast %359 : vector<8x128xf32> to vector<1x1x1x8x128xf32>
        tpu.vector_store %arg9[%360, %361, %c7_106, %c0_107, %c0_108], %364 {strides = array<i32>} : memref<8x14x14x8x128xf32, #tpu.memory_space<vmem>>, vector<1x1x1x8x128xf32>,
        %365 = vector.extract_strided_slice %354 {offsets = [2, 0, 0], sizes = [1, 8, 128], strides = [1, 1, 1]} : vector<14x8x128xf32> to vector<1x8x128xf32>
        %366 = vector.shape_cast %365 : vector<1x8x128xf32> to vector<8x128xf32>
        %367 = vector.extract_strided_slice %354 {offsets = [3, 0, 0], sizes = [1, 8, 128], strides = [1, 1, 1]} : vector<14x8x128xf32> to vector<1x8x128xf32>
        %368 = vector.shape_cast %367 : vector<1x8x128xf32> to vector<8x128xf32>
        %369 = arith.maximumf %366, %368 : vector<8x128xf32>
        %370 = arith.index_cast %arg10 : i32 to index
        %371 = arith.index_cast %arg11 : i32 to index
        %c8_109 = arith.constant 8 : index
        %c0_110 = arith.constant 0 : index
        %c0_111 = arith.constant 0 : index
        %372 = vector.load %arg9[%370, %371, %c8_109, %c0_110, %c0_111] : memref<8x14x14x8x128xf32, #tpu.memory_space<vmem>>, vector<1x1x1x8x128xf32>
        %373 = vector.shape_cast %372 : vector<1x1x1x8x128xf32> to vector<8x128xf32>
        %374 = vector.shape_cast %369 : vector<8x128xf32> to vector<1x1x1x8x128xf32>
        tpu.vector_store %arg9[%370, %371, %c8_109, %c0_110, %c0_111], %374 {strides = array<i32>} : memref<8x14x14x8x128xf32, #tpu.memory_space<vmem>>, vector<1x1x1x8x128xf32>,
        %375 = vector.extract_strided_slice %354 {offsets = [4, 0, 0], sizes = [1, 8, 128], strides = [1, 1, 1]} : vector<14x8x128xf32> to vector<1x8x128xf32>
        %376 = vector.shape_cast %375 : vector<1x8x128xf32> to vector<8x128xf32>
        %377 = vector.extract_strided_slice %354 {offsets = [5, 0, 0], sizes = [1, 8, 128], strides = [1, 1, 1]} : vector<14x8x128xf32> to vector<1x8x128xf32>
        %378 = vector.shape_cast %377 : vector<1x8x128xf32> to vector<8x128xf32>
        %379 = arith.maximumf %376, %378 : vector<8x128xf32>
        %380 = arith.index_cast %arg10 : i32 to index
        %381 = arith.index_cast %arg11 : i32 to index
        %c9 = arith.constant 9 : index
        %c0_112 = arith.constant 0 : index
        %c0_113 = arith.constant 0 : index
        %382 = vector.load %arg9[%380, %381, %c9, %c0_112, %c0_113] : memref<8x14x14x8x128xf32, #tpu.memory_space<vmem>>, vector<1x1x1x8x128xf32>
        %383 = vector.shape_cast %382 : vector<1x1x1x8x128xf32> to vector<8x128xf32>
        %384 = vector.shape_cast %379 : vector<8x128xf32> to vector<1x1x1x8x128xf32>
        tpu.vector_store %arg9[%380, %381, %c9, %c0_112, %c0_113], %384 {strides = array<i32>} : memref<8x14x14x8x128xf32, #tpu.memory_space<vmem>>, vector<1x1x1x8x128xf32>,
        %385 = vector.extract_strided_slice %354 {offsets = [6, 0, 0], sizes = [1, 8, 128], strides = [1, 1, 1]} : vector<14x8x128xf32> to vector<1x8x128xf32>
        %386 = vector.shape_cast %385 : vector<1x8x128xf32> to vector<8x128xf32>
        %387 = vector.extract_strided_slice %354 {offsets = [7, 0, 0], sizes = [1, 8, 128], strides = [1, 1, 1]} : vector<14x8x128xf32> to vector<1x8x128xf32>
        %388 = vector.shape_cast %387 : vector<1x8x128xf32> to vector<8x128xf32>
        %389 = arith.maximumf %386, %388 : vector<8x128xf32>
        %390 = arith.index_cast %arg10 : i32 to index
        %391 = arith.index_cast %arg11 : i32 to index
        %c10 = arith.constant 10 : index
        %c0_114 = arith.constant 0 : index
        %c0_115 = arith.constant 0 : index
        %392 = vector.load %arg9[%390, %391, %c10, %c0_114, %c0_115] : memref<8x14x14x8x128xf32, #tpu.memory_space<vmem>>, vector<1x1x1x8x128xf32>
        %393 = vector.shape_cast %392 : vector<1x1x1x8x128xf32> to vector<8x128xf32>
        %394 = vector.shape_cast %389 : vector<8x128xf32> to vector<1x1x1x8x128xf32>
        tpu.vector_store %arg9[%390, %391, %c10, %c0_114, %c0_115], %394 {strides = array<i32>} : memref<8x14x14x8x128xf32, #tpu.memory_space<vmem>>, vector<1x1x1x8x128xf32>,
        %395 = vector.extract_strided_slice %354 {offsets = [8, 0, 0], sizes = [1, 8, 128], strides = [1, 1, 1]} : vector<14x8x128xf32> to vector<1x8x128xf32>
        %396 = vector.shape_cast %395 : vector<1x8x128xf32> to vector<8x128xf32>
        %397 = vector.extract_strided_slice %354 {offsets = [9, 0, 0], sizes = [1, 8, 128], strides = [1, 1, 1]} : vector<14x8x128xf32> to vector<1x8x128xf32>
        %398 = vector.shape_cast %397 : vector<1x8x128xf32> to vector<8x128xf32>
        %399 = arith.maximumf %396, %398 : vector<8x128xf32>
        %400 = arith.index_cast %arg10 : i32 to index
        %401 = arith.index_cast %arg11 : i32 to index
        %c11 = arith.constant 11 : index
        %c0_116 = arith.constant 0 : index
        %c0_117 = arith.constant 0 : index
        %402 = vector.load %arg9[%400, %401, %c11, %c0_116, %c0_117] : memref<8x14x14x8x128xf32, #tpu.memory_space<vmem>>, vector<1x1x1x8x128xf32>
        %403 = vector.shape_cast %402 : vector<1x1x1x8x128xf32> to vector<8x128xf32>
        %404 = vector.shape_cast %399 : vector<8x128xf32> to vector<1x1x1x8x128xf32>
        tpu.vector_store %arg9[%400, %401, %c11, %c0_116, %c0_117], %404 {strides = array<i32>} : memref<8x14x14x8x128xf32, #tpu.memory_space<vmem>>, vector<1x1x1x8x128xf32>,
        %405 = vector.extract_strided_slice %354 {offsets = [10, 0, 0], sizes = [1, 8, 128], strides = [1, 1, 1]} : vector<14x8x128xf32> to vector<1x8x128xf32>
        %406 = vector.shape_cast %405 : vector<1x8x128xf32> to vector<8x128xf32>
        %407 = vector.extract_strided_slice %354 {offsets = [11, 0, 0], sizes = [1, 8, 128], strides = [1, 1, 1]} : vector<14x8x128xf32> to vector<1x8x128xf32>
        %408 = vector.shape_cast %407 : vector<1x8x128xf32> to vector<8x128xf32>
        %409 = arith.maximumf %406, %408 : vector<8x128xf32>
        %410 = arith.index_cast %arg10 : i32 to index
        %411 = arith.index_cast %arg11 : i32 to index
        %c12 = arith.constant 12 : index
        %c0_118 = arith.constant 0 : index
        %c0_119 = arith.constant 0 : index
        %412 = vector.load %arg9[%410, %411, %c12, %c0_118, %c0_119] : memref<8x14x14x8x128xf32, #tpu.memory_space<vmem>>, vector<1x1x1x8x128xf32>
        %413 = vector.shape_cast %412 : vector<1x1x1x8x128xf32> to vector<8x128xf32>
        %414 = vector.shape_cast %409 : vector<8x128xf32> to vector<1x1x1x8x128xf32>
        tpu.vector_store %arg9[%410, %411, %c12, %c0_118, %c0_119], %414 {strides = array<i32>} : memref<8x14x14x8x128xf32, #tpu.memory_space<vmem>>, vector<1x1x1x8x128xf32>,
        %415 = vector.extract_strided_slice %354 {offsets = [12, 0, 0], sizes = [1, 8, 128], strides = [1, 1, 1]} : vector<14x8x128xf32> to vector<1x8x128xf32>
        %416 = vector.shape_cast %415 : vector<1x8x128xf32> to vector<8x128xf32>
        %417 = vector.extract_strided_slice %354 {offsets = [13, 0, 0], sizes = [1, 8, 128], strides = [1, 1, 1]} : vector<14x8x128xf32> to vector<1x8x128xf32>
        %418 = vector.shape_cast %417 : vector<1x8x128xf32> to vector<8x128xf32>
        %419 = arith.maximumf %416, %418 : vector<8x128xf32>
        %420 = arith.index_cast %arg10 : i32 to index
        %421 = arith.index_cast %arg11 : i32 to index
        %c13 = arith.constant 13 : index
        %c0_120 = arith.constant 0 : index
        %c0_121 = arith.constant 0 : index
        %422 = vector.load %arg9[%420, %421, %c13, %c0_120, %c0_121] : memref<8x14x14x8x128xf32, #tpu.memory_space<vmem>>, vector<1x1x1x8x128xf32>
        %423 = vector.shape_cast %422 : vector<1x1x1x8x128xf32> to vector<8x128xf32>
        %424 = vector.shape_cast %419 : vector<8x128xf32> to vector<1x1x1x8x128xf32>
        tpu.vector_store %arg9[%420, %421, %c13, %c0_120, %c0_121], %424 {strides = array<i32>} : memref<8x14x14x8x128xf32, #tpu.memory_space<vmem>>, vector<1x1x1x8x128xf32>,
      }
      %c14_i32_12 = arith.constant 14 : i32
    }
    %c8_i32_0 = arith.constant 8 : i32
    %cst = arith.constant 0.000000e+00 : f32
    %1 = vector.broadcast %cst : f32 to vector<8x128xf32>
    %c0_i32_1 = arith.constant 0 : i32
    %c16_i32 = arith.constant 16 : i32
    %2 = arith.addi %c0_i32_1, %c16_i32 : i32
    %c1_i32_2 = arith.constant 1 : i32
    %3 = scf.for %arg10 = %c0_i32_1 to %2 step %c1_i32_2 iter_args(%arg11 = %1) -> (vector<8x128xf32>)  : i32 {
      %c0_i32_10 = arith.constant 0 : i32
      %c6_i32 = arith.constant 6 : i32
      %17 = arith.addi %c0_i32_10, %c6_i32 : i32
      %c1_i32_11 = arith.constant 1 : i32
      %18 = scf.for %arg12 = %c0_i32_10 to %17 step %c1_i32_11 iter_args(%arg13 = %arg11) -> (vector<8x128xf32>)  : i32 {
        %c2_i32 = arith.constant 2 : i32
        %19 = arith.muli %c2_i32, %arg12 : i32
        %cst_13 = arith.constant 0.000000e+00 : f32
        %20 = vector.broadcast %cst_13 : f32 to vector<12x8x128xf32>
        %cst_14 = arith.constant 0.000000e+00 : f32
        %21 = vector.broadcast %cst_14 : f32 to vector<12x8x128xf32>
        %c0_i32_15 = arith.constant 0 : i32
        %c4_i32 = arith.constant 4 : i32
        %22 = arith.addi %c0_i32_15, %c4_i32 : i32
        %c1_i32_16 = arith.constant 1 : i32
        %23:2 = scf.for %arg14 = %c0_i32_15 to %22 step %c1_i32_16 iter_args(%arg15 = %20, %arg16 = %21) -> (vector<12x8x128xf32>, vector<12x8x128xf32>)  : i32 {
          %c2_i32_35 = arith.constant 2 : i32
          %176 = arith.muli %c2_i32_35, %arg14 : i32
          %c0_i32_36 = arith.constant 0 : i32
          %177 = arith.addi %176, %c0_i32_36 : i32
          %c0_i32_37 = arith.constant 0 : i32
          %178 = arith.addi %19, %c0_i32_37 : i32
          %179 = arith.index_cast %177 : i32 to index
          %180 = arith.index_cast %178 : i32 to index
          %c0_38 = arith.constant 0 : index
          %c0_39 = arith.constant 0 : index
          %c0_40 = arith.constant 0 : index
          %181 = vector.load %arg9[%179, %180, %c0_38, %c0_39, %c0_40] : memref<8x14x14x8x128xf32, #tpu.memory_space<vmem>>, vector<1x1x14x8x128xf32>
          %182 = vector.shape_cast %181 : vector<1x1x14x8x128xf32> to vector<14x8x128xf32>
          %c9_i32 = arith.constant 9 : i32
          %183 = arith.muli %177, %c9_i32 : i32
          %c0_i32_41 = arith.constant 0 : i32
          %184 = arith.addi %183, %c0_i32_41 : i32
          %c0_i32_42 = arith.constant 0 : i32
          %185 = arith.addi %184, %c0_i32_42 : i32
          %186 = arith.index_cast %arg10 : i32 to index
          %187 = arith.index_cast %185 : i32 to index
          %188 = memref.load %arg4[%186, %187] : memref<16x72xf32, #tpu.memory_space<smem>>
          %189 = vector.extract_strided_slice %182 {offsets = [0, 0, 0], sizes = [12, 8, 128], strides = [1, 1, 1]} : vector<14x8x128xf32> to vector<12x8x128xf32>
          %190 = vector.broadcast %188 : f32 to vector<12x8x128xf32>
          %191 = arith.mulf %190, %189 : vector<12x8x128xf32>
          %192 = arith.addf %arg15, %191 : vector<12x8x128xf32>
          %c9_i32_43 = arith.constant 9 : i32
          %193 = arith.muli %177, %c9_i32_43 : i32
          %c0_i32_44 = arith.constant 0 : i32
          %194 = arith.addi %193, %c0_i32_44 : i32
          %c1_i32_45 = arith.constant 1 : i32
          %195 = arith.addi %194, %c1_i32_45 : i32
          %196 = arith.index_cast %arg10 : i32 to index
          %197 = arith.index_cast %195 : i32 to index
          %198 = memref.load %arg4[%196, %197] : memref<16x72xf32, #tpu.memory_space<smem>>
          %199 = vector.extract_strided_slice %182 {offsets = [1, 0, 0], sizes = [12, 8, 128], strides = [1, 1, 1]} : vector<14x8x128xf32> to vector<12x8x128xf32>
          %200 = vector.broadcast %198 : f32 to vector<12x8x128xf32>
          %201 = arith.mulf %200, %199 : vector<12x8x128xf32>
          %202 = arith.addf %192, %201 : vector<12x8x128xf32>
          %c9_i32_46 = arith.constant 9 : i32
          %203 = arith.muli %177, %c9_i32_46 : i32
          %c0_i32_47 = arith.constant 0 : i32
          %204 = arith.addi %203, %c0_i32_47 : i32
          %c2_i32_48 = arith.constant 2 : i32
          %205 = arith.addi %204, %c2_i32_48 : i32
          %206 = arith.index_cast %arg10 : i32 to index
          %207 = arith.index_cast %205 : i32 to index
          %208 = memref.load %arg4[%206, %207] : memref<16x72xf32, #tpu.memory_space<smem>>
          %209 = vector.extract_strided_slice %182 {offsets = [2, 0, 0], sizes = [12, 8, 128], strides = [1, 1, 1]} : vector<14x8x128xf32> to vector<12x8x128xf32>
          %210 = vector.broadcast %208 : f32 to vector<12x8x128xf32>
          %211 = arith.mulf %210, %209 : vector<12x8x128xf32>
          %212 = arith.addf %202, %211 : vector<12x8x128xf32>
          %c1_i32_49 = arith.constant 1 : i32
          %213 = arith.addi %19, %c1_i32_49 : i32
          %214 = arith.index_cast %177 : i32 to index
          %215 = arith.index_cast %213 : i32 to index
          %c0_50 = arith.constant 0 : index
          %c0_51 = arith.constant 0 : index
          %c0_52 = arith.constant 0 : index
          %216 = vector.load %arg9[%214, %215, %c0_50, %c0_51, %c0_52] : memref<8x14x14x8x128xf32, #tpu.memory_space<vmem>>, vector<1x1x14x8x128xf32>
          %217 = vector.shape_cast %216 : vector<1x1x14x8x128xf32> to vector<14x8x128xf32>
          %c9_i32_53 = arith.constant 9 : i32
          %218 = arith.muli %177, %c9_i32_53 : i32
          %c3_i32_54 = arith.constant 3 : i32
          %219 = arith.addi %218, %c3_i32_54 : i32
          %c0_i32_55 = arith.constant 0 : i32
          %220 = arith.addi %219, %c0_i32_55 : i32
          %221 = arith.index_cast %arg10 : i32 to index
          %222 = arith.index_cast %220 : i32 to index
          %223 = memref.load %arg4[%221, %222] : memref<16x72xf32, #tpu.memory_space<smem>>
          %224 = vector.extract_strided_slice %217 {offsets = [0, 0, 0], sizes = [12, 8, 128], strides = [1, 1, 1]} : vector<14x8x128xf32> to vector<12x8x128xf32>
          %225 = vector.broadcast %223 : f32 to vector<12x8x128xf32>
          %226 = arith.mulf %225, %224 : vector<12x8x128xf32>
          %227 = arith.addf %212, %226 : vector<12x8x128xf32>
          %c9_i32_56 = arith.constant 9 : i32
          %228 = arith.muli %177, %c9_i32_56 : i32
          %c3_i32_57 = arith.constant 3 : i32
          %229 = arith.addi %228, %c3_i32_57 : i32
          %c1_i32_58 = arith.constant 1 : i32
          %230 = arith.addi %229, %c1_i32_58 : i32
          %231 = arith.index_cast %arg10 : i32 to index
          %232 = arith.index_cast %230 : i32 to index
          %233 = memref.load %arg4[%231, %232] : memref<16x72xf32, #tpu.memory_space<smem>>
          %234 = vector.extract_strided_slice %217 {offsets = [1, 0, 0], sizes = [12, 8, 128], strides = [1, 1, 1]} : vector<14x8x128xf32> to vector<12x8x128xf32>
          %235 = vector.broadcast %233 : f32 to vector<12x8x128xf32>
          %236 = arith.mulf %235, %234 : vector<12x8x128xf32>
          %237 = arith.addf %227, %236 : vector<12x8x128xf32>
          %c9_i32_59 = arith.constant 9 : i32
          %238 = arith.muli %177, %c9_i32_59 : i32
          %c3_i32_60 = arith.constant 3 : i32
          %239 = arith.addi %238, %c3_i32_60 : i32
          %c2_i32_61 = arith.constant 2 : i32
          %240 = arith.addi %239, %c2_i32_61 : i32
          %241 = arith.index_cast %arg10 : i32 to index
          %242 = arith.index_cast %240 : i32 to index
          %243 = memref.load %arg4[%241, %242] : memref<16x72xf32, #tpu.memory_space<smem>>
          %244 = vector.extract_strided_slice %217 {offsets = [2, 0, 0], sizes = [12, 8, 128], strides = [1, 1, 1]} : vector<14x8x128xf32> to vector<12x8x128xf32>
          %245 = vector.broadcast %243 : f32 to vector<12x8x128xf32>
          %246 = arith.mulf %245, %244 : vector<12x8x128xf32>
          %247 = arith.addf %237, %246 : vector<12x8x128xf32>
          %c9_i32_62 = arith.constant 9 : i32
          %248 = arith.muli %177, %c9_i32_62 : i32
          %c0_i32_63 = arith.constant 0 : i32
          %249 = arith.addi %248, %c0_i32_63 : i32
          %c0_i32_64 = arith.constant 0 : i32
          %250 = arith.addi %249, %c0_i32_64 : i32
          %251 = arith.index_cast %arg10 : i32 to index
          %252 = arith.index_cast %250 : i32 to index
          %253 = memref.load %arg4[%251, %252] : memref<16x72xf32, #tpu.memory_space<smem>>
          %254 = vector.extract_strided_slice %217 {offsets = [0, 0, 0], sizes = [12, 8, 128], strides = [1, 1, 1]} : vector<14x8x128xf32> to vector<12x8x128xf32>
          %255 = vector.broadcast %253 : f32 to vector<12x8x128xf32>
          %256 = arith.mulf %255, %254 : vector<12x8x128xf32>
          %257 = arith.addf %arg16, %256 : vector<12x8x128xf32>
          %c9_i32_65 = arith.constant 9 : i32
          %258 = arith.muli %177, %c9_i32_65 : i32
          %c0_i32_66 = arith.constant 0 : i32
          %259 = arith.addi %258, %c0_i32_66 : i32
          %c1_i32_67 = arith.constant 1 : i32
          %260 = arith.addi %259, %c1_i32_67 : i32
          %261 = arith.index_cast %arg10 : i32 to index
          %262 = arith.index_cast %260 : i32 to index
          %263 = memref.load %arg4[%261, %262] : memref<16x72xf32, #tpu.memory_space<smem>>
          %264 = vector.extract_strided_slice %217 {offsets = [1, 0, 0], sizes = [12, 8, 128], strides = [1, 1, 1]} : vector<14x8x128xf32> to vector<12x8x128xf32>
          %265 = vector.broadcast %263 : f32 to vector<12x8x128xf32>
          %266 = arith.mulf %265, %264 : vector<12x8x128xf32>
          %267 = arith.addf %257, %266 : vector<12x8x128xf32>
          %c9_i32_68 = arith.constant 9 : i32
          %268 = arith.muli %177, %c9_i32_68 : i32
          %c0_i32_69 = arith.constant 0 : i32
          %269 = arith.addi %268, %c0_i32_69 : i32
          %c2_i32_70 = arith.constant 2 : i32
          %270 = arith.addi %269, %c2_i32_70 : i32
          %271 = arith.index_cast %arg10 : i32 to index
          %272 = arith.index_cast %270 : i32 to index
          %273 = memref.load %arg4[%271, %272] : memref<16x72xf32, #tpu.memory_space<smem>>
          %274 = vector.extract_strided_slice %217 {offsets = [2, 0, 0], sizes = [12, 8, 128], strides = [1, 1, 1]} : vector<14x8x128xf32> to vector<12x8x128xf32>
          %275 = vector.broadcast %273 : f32 to vector<12x8x128xf32>
          %276 = arith.mulf %275, %274 : vector<12x8x128xf32>
          %277 = arith.addf %267, %276 : vector<12x8x128xf32>
          %c2_i32_71 = arith.constant 2 : i32
          %278 = arith.addi %19, %c2_i32_71 : i32
          %279 = arith.index_cast %177 : i32 to index
          %280 = arith.index_cast %278 : i32 to index
          %c0_72 = arith.constant 0 : index
          %c0_73 = arith.constant 0 : index
          %c0_74 = arith.constant 0 : index
          %281 = vector.load %arg9[%279, %280, %c0_72, %c0_73, %c0_74] : memref<8x14x14x8x128xf32, #tpu.memory_space<vmem>>, vector<1x1x14x8x128xf32>
          %282 = vector.shape_cast %281 : vector<1x1x14x8x128xf32> to vector<14x8x128xf32>
          %c9_i32_75 = arith.constant 9 : i32
          %283 = arith.muli %177, %c9_i32_75 : i32
          %c6_i32_76 = arith.constant 6 : i32
          %284 = arith.addi %283, %c6_i32_76 : i32
          %c0_i32_77 = arith.constant 0 : i32
          %285 = arith.addi %284, %c0_i32_77 : i32
          %286 = arith.index_cast %arg10 : i32 to index
          %287 = arith.index_cast %285 : i32 to index
          %288 = memref.load %arg4[%286, %287] : memref<16x72xf32, #tpu.memory_space<smem>>
          %289 = vector.extract_strided_slice %282 {offsets = [0, 0, 0], sizes = [12, 8, 128], strides = [1, 1, 1]} : vector<14x8x128xf32> to vector<12x8x128xf32>
          %290 = vector.broadcast %288 : f32 to vector<12x8x128xf32>
          %291 = arith.mulf %290, %289 : vector<12x8x128xf32>
          %292 = arith.addf %247, %291 : vector<12x8x128xf32>
          %c9_i32_78 = arith.constant 9 : i32
          %293 = arith.muli %177, %c9_i32_78 : i32
          %c6_i32_79 = arith.constant 6 : i32
          %294 = arith.addi %293, %c6_i32_79 : i32
          %c1_i32_80 = arith.constant 1 : i32
          %295 = arith.addi %294, %c1_i32_80 : i32
          %296 = arith.index_cast %arg10 : i32 to index
          %297 = arith.index_cast %295 : i32 to index
          %298 = memref.load %arg4[%296, %297] : memref<16x72xf32, #tpu.memory_space<smem>>
          %299 = vector.extract_strided_slice %282 {offsets = [1, 0, 0], sizes = [12, 8, 128], strides = [1, 1, 1]} : vector<14x8x128xf32> to vector<12x8x128xf32>
          %300 = vector.broadcast %298 : f32 to vector<12x8x128xf32>
          %301 = arith.mulf %300, %299 : vector<12x8x128xf32>
          %302 = arith.addf %292, %301 : vector<12x8x128xf32>
          %c9_i32_81 = arith.constant 9 : i32
          %303 = arith.muli %177, %c9_i32_81 : i32
          %c6_i32_82 = arith.constant 6 : i32
          %304 = arith.addi %303, %c6_i32_82 : i32
          %c2_i32_83 = arith.constant 2 : i32
          %305 = arith.addi %304, %c2_i32_83 : i32
          %306 = arith.index_cast %arg10 : i32 to index
          %307 = arith.index_cast %305 : i32 to index
          %308 = memref.load %arg4[%306, %307] : memref<16x72xf32, #tpu.memory_space<smem>>
          %309 = vector.extract_strided_slice %282 {offsets = [2, 0, 0], sizes = [12, 8, 128], strides = [1, 1, 1]} : vector<14x8x128xf32> to vector<12x8x128xf32>
          %310 = vector.broadcast %308 : f32 to vector<12x8x128xf32>
          %311 = arith.mulf %310, %309 : vector<12x8x128xf32>
          %312 = arith.addf %302, %311 : vector<12x8x128xf32>
          %c9_i32_84 = arith.constant 9 : i32
          %313 = arith.muli %177, %c9_i32_84 : i32
          %c3_i32_85 = arith.constant 3 : i32
          %314 = arith.addi %313, %c3_i32_85 : i32
          %c0_i32_86 = arith.constant 0 : i32
          %315 = arith.addi %314, %c0_i32_86 : i32
          %316 = arith.index_cast %arg10 : i32 to index
          %317 = arith.index_cast %315 : i32 to index
          %318 = memref.load %arg4[%316, %317] : memref<16x72xf32, #tpu.memory_space<smem>>
          %319 = vector.extract_strided_slice %282 {offsets = [0, 0, 0], sizes = [12, 8, 128], strides = [1, 1, 1]} : vector<14x8x128xf32> to vector<12x8x128xf32>
          %320 = vector.broadcast %318 : f32 to vector<12x8x128xf32>
          %321 = arith.mulf %320, %319 : vector<12x8x128xf32>
          %322 = arith.addf %277, %321 : vector<12x8x128xf32>
          %c9_i32_87 = arith.constant 9 : i32
          %323 = arith.muli %177, %c9_i32_87 : i32
          %c3_i32_88 = arith.constant 3 : i32
          %324 = arith.addi %323, %c3_i32_88 : i32
          %c1_i32_89 = arith.constant 1 : i32
          %325 = arith.addi %324, %c1_i32_89 : i32
          %326 = arith.index_cast %arg10 : i32 to index
          %327 = arith.index_cast %325 : i32 to index
          %328 = memref.load %arg4[%326, %327] : memref<16x72xf32, #tpu.memory_space<smem>>
          %329 = vector.extract_strided_slice %282 {offsets = [1, 0, 0], sizes = [12, 8, 128], strides = [1, 1, 1]} : vector<14x8x128xf32> to vector<12x8x128xf32>
          %330 = vector.broadcast %328 : f32 to vector<12x8x128xf32>
          %331 = arith.mulf %330, %329 : vector<12x8x128xf32>
          %332 = arith.addf %322, %331 : vector<12x8x128xf32>
          %c9_i32_90 = arith.constant 9 : i32
          %333 = arith.muli %177, %c9_i32_90 : i32
          %c3_i32_91 = arith.constant 3 : i32
          %334 = arith.addi %333, %c3_i32_91 : i32
          %c2_i32_92 = arith.constant 2 : i32
          %335 = arith.addi %334, %c2_i32_92 : i32
          %336 = arith.index_cast %arg10 : i32 to index
          %337 = arith.index_cast %335 : i32 to index
          %338 = memref.load %arg4[%336, %337] : memref<16x72xf32, #tpu.memory_space<smem>>
          %339 = vector.extract_strided_slice %282 {offsets = [2, 0, 0], sizes = [12, 8, 128], strides = [1, 1, 1]} : vector<14x8x128xf32> to vector<12x8x128xf32>
          %340 = vector.broadcast %338 : f32 to vector<12x8x128xf32>
          %341 = arith.mulf %340, %339 : vector<12x8x128xf32>
          %342 = arith.addf %332, %341 : vector<12x8x128xf32>
          %c3_i32_93 = arith.constant 3 : i32
          %343 = arith.addi %19, %c3_i32_93 : i32
          %344 = arith.index_cast %177 : i32 to index
          %345 = arith.index_cast %343 : i32 to index
          %c0_94 = arith.constant 0 : index
          %c0_95 = arith.constant 0 : index
          %c0_96 = arith.constant 0 : index
          %346 = vector.load %arg9[%344, %345, %c0_94, %c0_95, %c0_96] : memref<8x14x14x8x128xf32, #tpu.memory_space<vmem>>, vector<1x1x14x8x128xf32>
          %347 = vector.shape_cast %346 : vector<1x1x14x8x128xf32> to vector<14x8x128xf32>
          %c9_i32_97 = arith.constant 9 : i32
          %348 = arith.muli %177, %c9_i32_97 : i32
          %c6_i32_98 = arith.constant 6 : i32
          %349 = arith.addi %348, %c6_i32_98 : i32
          %c0_i32_99 = arith.constant 0 : i32
          %350 = arith.addi %349, %c0_i32_99 : i32
          %351 = arith.index_cast %arg10 : i32 to index
          %352 = arith.index_cast %350 : i32 to index
          %353 = memref.load %arg4[%351, %352] : memref<16x72xf32, #tpu.memory_space<smem>>
          %354 = vector.extract_strided_slice %347 {offsets = [0, 0, 0], sizes = [12, 8, 128], strides = [1, 1, 1]} : vector<14x8x128xf32> to vector<12x8x128xf32>
          %355 = vector.broadcast %353 : f32 to vector<12x8x128xf32>
          %356 = arith.mulf %355, %354 : vector<12x8x128xf32>
          %357 = arith.addf %342, %356 : vector<12x8x128xf32>
          %c9_i32_100 = arith.constant 9 : i32
          %358 = arith.muli %177, %c9_i32_100 : i32
          %c6_i32_101 = arith.constant 6 : i32
          %359 = arith.addi %358, %c6_i32_101 : i32
          %c1_i32_102 = arith.constant 1 : i32
          %360 = arith.addi %359, %c1_i32_102 : i32
          %361 = arith.index_cast %arg10 : i32 to index
          %362 = arith.index_cast %360 : i32 to index
          %363 = memref.load %arg4[%361, %362] : memref<16x72xf32, #tpu.memory_space<smem>>
          %364 = vector.extract_strided_slice %347 {offsets = [1, 0, 0], sizes = [12, 8, 128], strides = [1, 1, 1]} : vector<14x8x128xf32> to vector<12x8x128xf32>
          %365 = vector.broadcast %363 : f32 to vector<12x8x128xf32>
          %366 = arith.mulf %365, %364 : vector<12x8x128xf32>
          %367 = arith.addf %357, %366 : vector<12x8x128xf32>
          %c9_i32_103 = arith.constant 9 : i32
          %368 = arith.muli %177, %c9_i32_103 : i32
          %c6_i32_104 = arith.constant 6 : i32
          %369 = arith.addi %368, %c6_i32_104 : i32
          %c2_i32_105 = arith.constant 2 : i32
          %370 = arith.addi %369, %c2_i32_105 : i32
          %371 = arith.index_cast %arg10 : i32 to index
          %372 = arith.index_cast %370 : i32 to index
          %373 = memref.load %arg4[%371, %372] : memref<16x72xf32, #tpu.memory_space<smem>>
          %374 = vector.extract_strided_slice %347 {offsets = [2, 0, 0], sizes = [12, 8, 128], strides = [1, 1, 1]} : vector<14x8x128xf32> to vector<12x8x128xf32>
          %375 = vector.broadcast %373 : f32 to vector<12x8x128xf32>
          %376 = arith.mulf %375, %374 : vector<12x8x128xf32>
          %377 = arith.addf %367, %376 : vector<12x8x128xf32>
          %c2_i32_106 = arith.constant 2 : i32
          %378 = arith.muli %c2_i32_106, %arg14 : i32
          %c1_i32_107 = arith.constant 1 : i32
          %379 = arith.addi %378, %c1_i32_107 : i32
          %c0_i32_108 = arith.constant 0 : i32
          %380 = arith.addi %19, %c0_i32_108 : i32
          %381 = arith.index_cast %379 : i32 to index
          %382 = arith.index_cast %380 : i32 to index
          %c0_109 = arith.constant 0 : index
          %c0_110 = arith.constant 0 : index
          %c0_111 = arith.constant 0 : index
          %383 = vector.load %arg9[%381, %382, %c0_109, %c0_110, %c0_111] : memref<8x14x14x8x128xf32, #tpu.memory_space<vmem>>, vector<1x1x14x8x128xf32>
          %384 = vector.shape_cast %383 : vector<1x1x14x8x128xf32> to vector<14x8x128xf32>
          %c9_i32_112 = arith.constant 9 : i32
          %385 = arith.muli %379, %c9_i32_112 : i32
          %c0_i32_113 = arith.constant 0 : i32
          %386 = arith.addi %385, %c0_i32_113 : i32
          %c0_i32_114 = arith.constant 0 : i32
          %387 = arith.addi %386, %c0_i32_114 : i32
          %388 = arith.index_cast %arg10 : i32 to index
          %389 = arith.index_cast %387 : i32 to index
          %390 = memref.load %arg4[%388, %389] : memref<16x72xf32, #tpu.memory_space<smem>>
          %391 = vector.extract_strided_slice %384 {offsets = [0, 0, 0], sizes = [12, 8, 128], strides = [1, 1, 1]} : vector<14x8x128xf32> to vector<12x8x128xf32>
          %392 = vector.broadcast %390 : f32 to vector<12x8x128xf32>
          %393 = arith.mulf %392, %391 : vector<12x8x128xf32>
          %394 = arith.addf %312, %393 : vector<12x8x128xf32>
          %c9_i32_115 = arith.constant 9 : i32
          %395 = arith.muli %379, %c9_i32_115 : i32
          %c0_i32_116 = arith.constant 0 : i32
          %396 = arith.addi %395, %c0_i32_116 : i32
          %c1_i32_117 = arith.constant 1 : i32
          %397 = arith.addi %396, %c1_i32_117 : i32
          %398 = arith.index_cast %arg10 : i32 to index
          %399 = arith.index_cast %397 : i32 to index
          %400 = memref.load %arg4[%398, %399] : memref<16x72xf32, #tpu.memory_space<smem>>
          %401 = vector.extract_strided_slice %384 {offsets = [1, 0, 0], sizes = [12, 8, 128], strides = [1, 1, 1]} : vector<14x8x128xf32> to vector<12x8x128xf32>
          %402 = vector.broadcast %400 : f32 to vector<12x8x128xf32>
          %403 = arith.mulf %402, %401 : vector<12x8x128xf32>
          %404 = arith.addf %394, %403 : vector<12x8x128xf32>
          %c9_i32_118 = arith.constant 9 : i32
          %405 = arith.muli %379, %c9_i32_118 : i32
          %c0_i32_119 = arith.constant 0 : i32
          %406 = arith.addi %405, %c0_i32_119 : i32
          %c2_i32_120 = arith.constant 2 : i32
          %407 = arith.addi %406, %c2_i32_120 : i32
          %408 = arith.index_cast %arg10 : i32 to index
          %409 = arith.index_cast %407 : i32 to index
          %410 = memref.load %arg4[%408, %409] : memref<16x72xf32, #tpu.memory_space<smem>>
          %411 = vector.extract_strided_slice %384 {offsets = [2, 0, 0], sizes = [12, 8, 128], strides = [1, 1, 1]} : vector<14x8x128xf32> to vector<12x8x128xf32>
          %412 = vector.broadcast %410 : f32 to vector<12x8x128xf32>
          %413 = arith.mulf %412, %411 : vector<12x8x128xf32>
          %414 = arith.addf %404, %413 : vector<12x8x128xf32>
          %c1_i32_121 = arith.constant 1 : i32
          %415 = arith.addi %19, %c1_i32_121 : i32
          %416 = arith.index_cast %379 : i32 to index
          %417 = arith.index_cast %415 : i32 to index
          %c0_122 = arith.constant 0 : index
          %c0_123 = arith.constant 0 : index
          %c0_124 = arith.constant 0 : index
          %418 = vector.load %arg9[%416, %417, %c0_122, %c0_123, %c0_124] : memref<8x14x14x8x128xf32, #tpu.memory_space<vmem>>, vector<1x1x14x8x128xf32>
          %419 = vector.shape_cast %418 : vector<1x1x14x8x128xf32> to vector<14x8x128xf32>
          %c9_i32_125 = arith.constant 9 : i32
          %420 = arith.muli %379, %c9_i32_125 : i32
          %c3_i32_126 = arith.constant 3 : i32
          %421 = arith.addi %420, %c3_i32_126 : i32
          %c0_i32_127 = arith.constant 0 : i32
          %422 = arith.addi %421, %c0_i32_127 : i32
          %423 = arith.index_cast %arg10 : i32 to index
          %424 = arith.index_cast %422 : i32 to index
          %425 = memref.load %arg4[%423, %424] : memref<16x72xf32, #tpu.memory_space<smem>>
          %426 = vector.extract_strided_slice %419 {offsets = [0, 0, 0], sizes = [12, 8, 128], strides = [1, 1, 1]} : vector<14x8x128xf32> to vector<12x8x128xf32>
          %427 = vector.broadcast %425 : f32 to vector<12x8x128xf32>
          %428 = arith.mulf %427, %426 : vector<12x8x128xf32>
          %429 = arith.addf %414, %428 : vector<12x8x128xf32>
          %c9_i32_128 = arith.constant 9 : i32
          %430 = arith.muli %379, %c9_i32_128 : i32
          %c3_i32_129 = arith.constant 3 : i32
          %431 = arith.addi %430, %c3_i32_129 : i32
          %c1_i32_130 = arith.constant 1 : i32
          %432 = arith.addi %431, %c1_i32_130 : i32
          %433 = arith.index_cast %arg10 : i32 to index
          %434 = arith.index_cast %432 : i32 to index
          %435 = memref.load %arg4[%433, %434] : memref<16x72xf32, #tpu.memory_space<smem>>
          %436 = vector.extract_strided_slice %419 {offsets = [1, 0, 0], sizes = [12, 8, 128], strides = [1, 1, 1]} : vector<14x8x128xf32> to vector<12x8x128xf32>
          %437 = vector.broadcast %435 : f32 to vector<12x8x128xf32>
          %438 = arith.mulf %437, %436 : vector<12x8x128xf32>
          %439 = arith.addf %429, %438 : vector<12x8x128xf32>
          %c9_i32_131 = arith.constant 9 : i32
          %440 = arith.muli %379, %c9_i32_131 : i32
          %c3_i32_132 = arith.constant 3 : i32
          %441 = arith.addi %440, %c3_i32_132 : i32
          %c2_i32_133 = arith.constant 2 : i32
          %442 = arith.addi %441, %c2_i32_133 : i32
          %443 = arith.index_cast %arg10 : i32 to index
          %444 = arith.index_cast %442 : i32 to index
          %445 = memref.load %arg4[%443, %444] : memref<16x72xf32, #tpu.memory_space<smem>>
          %446 = vector.extract_strided_slice %419 {offsets = [2, 0, 0], sizes = [12, 8, 128], strides = [1, 1, 1]} : vector<14x8x128xf32> to vector<12x8x128xf32>
          %447 = vector.broadcast %445 : f32 to vector<12x8x128xf32>
          %448 = arith.mulf %447, %446 : vector<12x8x128xf32>
          %449 = arith.addf %439, %448 : vector<12x8x128xf32>
          %c9_i32_134 = arith.constant 9 : i32
          %450 = arith.muli %379, %c9_i32_134 : i32
          %c0_i32_135 = arith.constant 0 : i32
          %451 = arith.addi %450, %c0_i32_135 : i32
          %c0_i32_136 = arith.constant 0 : i32
          %452 = arith.addi %451, %c0_i32_136 : i32
          %453 = arith.index_cast %arg10 : i32 to index
          %454 = arith.index_cast %452 : i32 to index
          %455 = memref.load %arg4[%453, %454] : memref<16x72xf32, #tpu.memory_space<smem>>
          %456 = vector.extract_strided_slice %419 {offsets = [0, 0, 0], sizes = [12, 8, 128], strides = [1, 1, 1]} : vector<14x8x128xf32> to vector<12x8x128xf32>
          %457 = vector.broadcast %455 : f32 to vector<12x8x128xf32>
          %458 = arith.mulf %457, %456 : vector<12x8x128xf32>
          %459 = arith.addf %377, %458 : vector<12x8x128xf32>
          %c9_i32_137 = arith.constant 9 : i32
          %460 = arith.muli %379, %c9_i32_137 : i32
          %c0_i32_138 = arith.constant 0 : i32
          %461 = arith.addi %460, %c0_i32_138 : i32
          %c1_i32_139 = arith.constant 1 : i32
          %462 = arith.addi %461, %c1_i32_139 : i32
          %463 = arith.index_cast %arg10 : i32 to index
          %464 = arith.index_cast %462 : i32 to index
          %465 = memref.load %arg4[%463, %464] : memref<16x72xf32, #tpu.memory_space<smem>>
          %466 = vector.extract_strided_slice %419 {offsets = [1, 0, 0], sizes = [12, 8, 128], strides = [1, 1, 1]} : vector<14x8x128xf32> to vector<12x8x128xf32>
          %467 = vector.broadcast %465 : f32 to vector<12x8x128xf32>
          %468 = arith.mulf %467, %466 : vector<12x8x128xf32>
          %469 = arith.addf %459, %468 : vector<12x8x128xf32>
          %c9_i32_140 = arith.constant 9 : i32
          %470 = arith.muli %379, %c9_i32_140 : i32
          %c0_i32_141 = arith.constant 0 : i32
          %471 = arith.addi %470, %c0_i32_141 : i32
          %c2_i32_142 = arith.constant 2 : i32
          %472 = arith.addi %471, %c2_i32_142 : i32
          %473 = arith.index_cast %arg10 : i32 to index
          %474 = arith.index_cast %472 : i32 to index
          %475 = memref.load %arg4[%473, %474] : memref<16x72xf32, #tpu.memory_space<smem>>
          %476 = vector.extract_strided_slice %419 {offsets = [2, 0, 0], sizes = [12, 8, 128], strides = [1, 1, 1]} : vector<14x8x128xf32> to vector<12x8x128xf32>
          %477 = vector.broadcast %475 : f32 to vector<12x8x128xf32>
          %478 = arith.mulf %477, %476 : vector<12x8x128xf32>
          %479 = arith.addf %469, %478 : vector<12x8x128xf32>
          %c2_i32_143 = arith.constant 2 : i32
          %480 = arith.addi %19, %c2_i32_143 : i32
          %481 = arith.index_cast %379 : i32 to index
          %482 = arith.index_cast %480 : i32 to index
          %c0_144 = arith.constant 0 : index
          %c0_145 = arith.constant 0 : index
          %c0_146 = arith.constant 0 : index
          %483 = vector.load %arg9[%481, %482, %c0_144, %c0_145, %c0_146] : memref<8x14x14x8x128xf32, #tpu.memory_space<vmem>>, vector<1x1x14x8x128xf32>
          %484 = vector.shape_cast %483 : vector<1x1x14x8x128xf32> to vector<14x8x128xf32>
          %c9_i32_147 = arith.constant 9 : i32
          %485 = arith.muli %379, %c9_i32_147 : i32
          %c6_i32_148 = arith.constant 6 : i32
          %486 = arith.addi %485, %c6_i32_148 : i32
          %c0_i32_149 = arith.constant 0 : i32
          %487 = arith.addi %486, %c0_i32_149 : i32
          %488 = arith.index_cast %arg10 : i32 to index
          %489 = arith.index_cast %487 : i32 to index
          %490 = memref.load %arg4[%488, %489] : memref<16x72xf32, #tpu.memory_space<smem>>
          %491 = vector.extract_strided_slice %484 {offsets = [0, 0, 0], sizes = [12, 8, 128], strides = [1, 1, 1]} : vector<14x8x128xf32> to vector<12x8x128xf32>
          %492 = vector.broadcast %490 : f32 to vector<12x8x128xf32>
          %493 = arith.mulf %492, %491 : vector<12x8x128xf32>
          %494 = arith.addf %449, %493 : vector<12x8x128xf32>
          %c9_i32_150 = arith.constant 9 : i32
          %495 = arith.muli %379, %c9_i32_150 : i32
          %c6_i32_151 = arith.constant 6 : i32
          %496 = arith.addi %495, %c6_i32_151 : i32
          %c1_i32_152 = arith.constant 1 : i32
          %497 = arith.addi %496, %c1_i32_152 : i32
          %498 = arith.index_cast %arg10 : i32 to index
          %499 = arith.index_cast %497 : i32 to index
          %500 = memref.load %arg4[%498, %499] : memref<16x72xf32, #tpu.memory_space<smem>>
          %501 = vector.extract_strided_slice %484 {offsets = [1, 0, 0], sizes = [12, 8, 128], strides = [1, 1, 1]} : vector<14x8x128xf32> to vector<12x8x128xf32>
          %502 = vector.broadcast %500 : f32 to vector<12x8x128xf32>
          %503 = arith.mulf %502, %501 : vector<12x8x128xf32>
          %504 = arith.addf %494, %503 : vector<12x8x128xf32>
          %c9_i32_153 = arith.constant 9 : i32
          %505 = arith.muli %379, %c9_i32_153 : i32
          %c6_i32_154 = arith.constant 6 : i32
          %506 = arith.addi %505, %c6_i32_154 : i32
          %c2_i32_155 = arith.constant 2 : i32
          %507 = arith.addi %506, %c2_i32_155 : i32
          %508 = arith.index_cast %arg10 : i32 to index
          %509 = arith.index_cast %507 : i32 to index
          %510 = memref.load %arg4[%508, %509] : memref<16x72xf32, #tpu.memory_space<smem>>
          %511 = vector.extract_strided_slice %484 {offsets = [2, 0, 0], sizes = [12, 8, 128], strides = [1, 1, 1]} : vector<14x8x128xf32> to vector<12x8x128xf32>
          %512 = vector.broadcast %510 : f32 to vector<12x8x128xf32>
          %513 = arith.mulf %512, %511 : vector<12x8x128xf32>
          %514 = arith.addf %504, %513 : vector<12x8x128xf32>
          %c9_i32_156 = arith.constant 9 : i32
          %515 = arith.muli %379, %c9_i32_156 : i32
          %c3_i32_157 = arith.constant 3 : i32
          %516 = arith.addi %515, %c3_i32_157 : i32
          %c0_i32_158 = arith.constant 0 : i32
          %517 = arith.addi %516, %c0_i32_158 : i32
          %518 = arith.index_cast %arg10 : i32 to index
          %519 = arith.index_cast %517 : i32 to index
          %520 = memref.load %arg4[%518, %519] : memref<16x72xf32, #tpu.memory_space<smem>>
          %521 = vector.extract_strided_slice %484 {offsets = [0, 0, 0], sizes = [12, 8, 128], strides = [1, 1, 1]} : vector<14x8x128xf32> to vector<12x8x128xf32>
          %522 = vector.broadcast %520 : f32 to vector<12x8x128xf32>
          %523 = arith.mulf %522, %521 : vector<12x8x128xf32>
          %524 = arith.addf %479, %523 : vector<12x8x128xf32>
          %c9_i32_159 = arith.constant 9 : i32
          %525 = arith.muli %379, %c9_i32_159 : i32
          %c3_i32_160 = arith.constant 3 : i32
          %526 = arith.addi %525, %c3_i32_160 : i32
          %c1_i32_161 = arith.constant 1 : i32
          %527 = arith.addi %526, %c1_i32_161 : i32
          %528 = arith.index_cast %arg10 : i32 to index
          %529 = arith.index_cast %527 : i32 to index
          %530 = memref.load %arg4[%528, %529] : memref<16x72xf32, #tpu.memory_space<smem>>
          %531 = vector.extract_strided_slice %484 {offsets = [1, 0, 0], sizes = [12, 8, 128], strides = [1, 1, 1]} : vector<14x8x128xf32> to vector<12x8x128xf32>
          %532 = vector.broadcast %530 : f32 to vector<12x8x128xf32>
          %533 = arith.mulf %532, %531 : vector<12x8x128xf32>
          %534 = arith.addf %524, %533 : vector<12x8x128xf32>
          %c9_i32_162 = arith.constant 9 : i32
          %535 = arith.muli %379, %c9_i32_162 : i32
          %c3_i32_163 = arith.constant 3 : i32
          %536 = arith.addi %535, %c3_i32_163 : i32
          %c2_i32_164 = arith.constant 2 : i32
          %537 = arith.addi %536, %c2_i32_164 : i32
          %538 = arith.index_cast %arg10 : i32 to index
          %539 = arith.index_cast %537 : i32 to index
          %540 = memref.load %arg4[%538, %539] : memref<16x72xf32, #tpu.memory_space<smem>>
          %541 = vector.extract_strided_slice %484 {offsets = [2, 0, 0], sizes = [12, 8, 128], strides = [1, 1, 1]} : vector<14x8x128xf32> to vector<12x8x128xf32>
          %542 = vector.broadcast %540 : f32 to vector<12x8x128xf32>
          %543 = arith.mulf %542, %541 : vector<12x8x128xf32>
          %544 = arith.addf %534, %543 : vector<12x8x128xf32>
          %c3_i32_165 = arith.constant 3 : i32
          %545 = arith.addi %19, %c3_i32_165 : i32
          %546 = arith.index_cast %379 : i32 to index
          %547 = arith.index_cast %545 : i32 to index
          %c0_166 = arith.constant 0 : index
          %c0_167 = arith.constant 0 : index
          %c0_168 = arith.constant 0 : index
          %548 = vector.load %arg9[%546, %547, %c0_166, %c0_167, %c0_168] : memref<8x14x14x8x128xf32, #tpu.memory_space<vmem>>, vector<1x1x14x8x128xf32>
          %549 = vector.shape_cast %548 : vector<1x1x14x8x128xf32> to vector<14x8x128xf32>
          %c9_i32_169 = arith.constant 9 : i32
          %550 = arith.muli %379, %c9_i32_169 : i32
          %c6_i32_170 = arith.constant 6 : i32
          %551 = arith.addi %550, %c6_i32_170 : i32
          %c0_i32_171 = arith.constant 0 : i32
          %552 = arith.addi %551, %c0_i32_171 : i32
          %553 = arith.index_cast %arg10 : i32 to index
          %554 = arith.index_cast %552 : i32 to index
          %555 = memref.load %arg4[%553, %554] : memref<16x72xf32, #tpu.memory_space<smem>>
          %556 = vector.extract_strided_slice %549 {offsets = [0, 0, 0], sizes = [12, 8, 128], strides = [1, 1, 1]} : vector<14x8x128xf32> to vector<12x8x128xf32>
          %557 = vector.broadcast %555 : f32 to vector<12x8x128xf32>
          %558 = arith.mulf %557, %556 : vector<12x8x128xf32>
          %559 = arith.addf %544, %558 : vector<12x8x128xf32>
          %c9_i32_172 = arith.constant 9 : i32
          %560 = arith.muli %379, %c9_i32_172 : i32
          %c6_i32_173 = arith.constant 6 : i32
          %561 = arith.addi %560, %c6_i32_173 : i32
          %c1_i32_174 = arith.constant 1 : i32
          %562 = arith.addi %561, %c1_i32_174 : i32
          %563 = arith.index_cast %arg10 : i32 to index
          %564 = arith.index_cast %562 : i32 to index
          %565 = memref.load %arg4[%563, %564] : memref<16x72xf32, #tpu.memory_space<smem>>
          %566 = vector.extract_strided_slice %549 {offsets = [1, 0, 0], sizes = [12, 8, 128], strides = [1, 1, 1]} : vector<14x8x128xf32> to vector<12x8x128xf32>
          %567 = vector.broadcast %565 : f32 to vector<12x8x128xf32>
          %568 = arith.mulf %567, %566 : vector<12x8x128xf32>
          %569 = arith.addf %559, %568 : vector<12x8x128xf32>
          %c9_i32_175 = arith.constant 9 : i32
          %570 = arith.muli %379, %c9_i32_175 : i32
          %c6_i32_176 = arith.constant 6 : i32
          %571 = arith.addi %570, %c6_i32_176 : i32
          %c2_i32_177 = arith.constant 2 : i32
          %572 = arith.addi %571, %c2_i32_177 : i32
          %573 = arith.index_cast %arg10 : i32 to index
          %574 = arith.index_cast %572 : i32 to index
          %575 = memref.load %arg4[%573, %574] : memref<16x72xf32, #tpu.memory_space<smem>>
          %576 = vector.extract_strided_slice %549 {offsets = [2, 0, 0], sizes = [12, 8, 128], strides = [1, 1, 1]} : vector<14x8x128xf32> to vector<12x8x128xf32>
          %577 = vector.broadcast %575 : f32 to vector<12x8x128xf32>
          %578 = arith.mulf %577, %576 : vector<12x8x128xf32>
          %579 = arith.addf %569, %578 : vector<12x8x128xf32>
          scf.yield %514, %579 : vector<12x8x128xf32>, vector<12x8x128xf32>
        }
        %c4_i32_17 = arith.constant 4 : i32
        %cst_18 = arith.constant 0.000000e+00 : f32
        %24 = vector.broadcast %cst_18 : f32 to vector<8x128xf32>
        %25 = vector.extract_strided_slice %23#0 {offsets = [0, 0, 0], sizes = [1, 8, 128], strides = [1, 1, 1]} : vector<12x8x128xf32> to vector<1x8x128xf32>
        %26 = vector.shape_cast %25 : vector<1x8x128xf32> to vector<8x128xf32>
        %27 = vector.extract_strided_slice %23#0 {offsets = [1, 0, 0], sizes = [1, 8, 128], strides = [1, 1, 1]} : vector<12x8x128xf32> to vector<1x8x128xf32>
        %28 = vector.shape_cast %27 : vector<1x8x128xf32> to vector<8x128xf32>
        %29 = arith.maximumf %26, %28 : vector<8x128xf32>
        %30 = vector.extract_strided_slice %23#1 {offsets = [0, 0, 0], sizes = [1, 8, 128], strides = [1, 1, 1]} : vector<12x8x128xf32> to vector<1x8x128xf32>
        %31 = vector.shape_cast %30 : vector<1x8x128xf32> to vector<8x128xf32>
        %32 = vector.extract_strided_slice %23#1 {offsets = [1, 0, 0], sizes = [1, 8, 128], strides = [1, 1, 1]} : vector<12x8x128xf32> to vector<1x8x128xf32>
        %33 = vector.shape_cast %32 : vector<1x8x128xf32> to vector<8x128xf32>
        %34 = arith.maximumf %31, %33 : vector<8x128xf32>
        %35 = arith.maximumf %29, %34 : vector<8x128xf32>
        %36 = arith.index_cast %arg10 : i32 to index
        %37 = memref.load %arg5[%36] : memref<16xf32, #tpu.memory_space<smem>>
        %38 = vector.broadcast %37 : f32 to vector<8x128xf32>
        %39 = arith.addf %35, %38 : vector<8x128xf32>
        %cst_19 = arith.constant 0.000000e+00 : f32
        %40 = vector.broadcast %cst_19 : f32 to vector<8x128xf32>
        %41 = arith.maximumf %39, %40 : vector<8x128xf32>
        %c6_i32_20 = arith.constant 6 : i32
        %42 = arith.muli %arg12, %c6_i32_20 : i32
        %c0_i32_21 = arith.constant 0 : i32
        %43 = arith.addi %42, %c0_i32_21 : i32
        %44 = arith.index_cast %arg10 : i32 to index
        %45 = arith.index_cast %43 : i32 to index
        %46 = memref.load %arg6[%44, %45] : memref<16x36xf32, #tpu.memory_space<smem>>
        %47 = vector.broadcast %46 : f32 to vector<8x128xf32>
        %48 = arith.mulf %47, %41 : vector<8x128xf32>
        %49 = arith.addf %24, %48 : vector<8x128xf32>
        %50 = vector.extract_strided_slice %23#0 {offsets = [2, 0, 0], sizes = [1, 8, 128], strides = [1, 1, 1]} : vector<12x8x128xf32> to vector<1x8x128xf32>
        %51 = vector.shape_cast %50 : vector<1x8x128xf32> to vector<8x128xf32>
        %52 = vector.extract_strided_slice %23#0 {offsets = [3, 0, 0], sizes = [1, 8, 128], strides = [1, 1, 1]} : vector<12x8x128xf32> to vector<1x8x128xf32>
        %53 = vector.shape_cast %52 : vector<1x8x128xf32> to vector<8x128xf32>
        %54 = arith.maximumf %51, %53 : vector<8x128xf32>
        %55 = vector.extract_strided_slice %23#1 {offsets = [2, 0, 0], sizes = [1, 8, 128], strides = [1, 1, 1]} : vector<12x8x128xf32> to vector<1x8x128xf32>
        %56 = vector.shape_cast %55 : vector<1x8x128xf32> to vector<8x128xf32>
        %57 = vector.extract_strided_slice %23#1 {offsets = [3, 0, 0], sizes = [1, 8, 128], strides = [1, 1, 1]} : vector<12x8x128xf32> to vector<1x8x128xf32>
        %58 = vector.shape_cast %57 : vector<1x8x128xf32> to vector<8x128xf32>
        %59 = arith.maximumf %56, %58 : vector<8x128xf32>
        %60 = arith.maximumf %54, %59 : vector<8x128xf32>
        %61 = arith.index_cast %arg10 : i32 to index
        %62 = memref.load %arg5[%61] : memref<16xf32, #tpu.memory_space<smem>>
        %63 = vector.broadcast %62 : f32 to vector<8x128xf32>
        %64 = arith.addf %60, %63 : vector<8x128xf32>
        %cst_22 = arith.constant 0.000000e+00 : f32
        %65 = vector.broadcast %cst_22 : f32 to vector<8x128xf32>
        %66 = arith.maximumf %64, %65 : vector<8x128xf32>
        %c6_i32_23 = arith.constant 6 : i32
        %67 = arith.muli %arg12, %c6_i32_23 : i32
        %c1_i32_24 = arith.constant 1 : i32
        %68 = arith.addi %67, %c1_i32_24 : i32
        %69 = arith.index_cast %arg10 : i32 to index
        %70 = arith.index_cast %68 : i32 to index
        %71 = memref.load %arg6[%69, %70] : memref<16x36xf32, #tpu.memory_space<smem>>
        %72 = vector.broadcast %71 : f32 to vector<8x128xf32>
        %73 = arith.mulf %72, %66 : vector<8x128xf32>
        %74 = arith.addf %49, %73 : vector<8x128xf32>
        %75 = vector.extract_strided_slice %23#0 {offsets = [4, 0, 0], sizes = [1, 8, 128], strides = [1, 1, 1]} : vector<12x8x128xf32> to vector<1x8x128xf32>
        %76 = vector.shape_cast %75 : vector<1x8x128xf32> to vector<8x128xf32>
        %77 = vector.extract_strided_slice %23#0 {offsets = [5, 0, 0], sizes = [1, 8, 128], strides = [1, 1, 1]} : vector<12x8x128xf32> to vector<1x8x128xf32>
        %78 = vector.shape_cast %77 : vector<1x8x128xf32> to vector<8x128xf32>
        %79 = arith.maximumf %76, %78 : vector<8x128xf32>
        %80 = vector.extract_strided_slice %23#1 {offsets = [4, 0, 0], sizes = [1, 8, 128], strides = [1, 1, 1]} : vector<12x8x128xf32> to vector<1x8x128xf32>
        %81 = vector.shape_cast %80 : vector<1x8x128xf32> to vector<8x128xf32>
        %82 = vector.extract_strided_slice %23#1 {offsets = [5, 0, 0], sizes = [1, 8, 128], strides = [1, 1, 1]} : vector<12x8x128xf32> to vector<1x8x128xf32>
        %83 = vector.shape_cast %82 : vector<1x8x128xf32> to vector<8x128xf32>
        %84 = arith.maximumf %81, %83 : vector<8x128xf32>
        %85 = arith.maximumf %79, %84 : vector<8x128xf32>
        %86 = arith.index_cast %arg10 : i32 to index
        %87 = memref.load %arg5[%86] : memref<16xf32, #tpu.memory_space<smem>>
        %88 = vector.broadcast %87 : f32 to vector<8x128xf32>
        %89 = arith.addf %85, %88 : vector<8x128xf32>
        %cst_25 = arith.constant 0.000000e+00 : f32
        %90 = vector.broadcast %cst_25 : f32 to vector<8x128xf32>
        %91 = arith.maximumf %89, %90 : vector<8x128xf32>
        %c6_i32_26 = arith.constant 6 : i32
        %92 = arith.muli %arg12, %c6_i32_26 : i32
        %c2_i32_27 = arith.constant 2 : i32
        %93 = arith.addi %92, %c2_i32_27 : i32
        %94 = arith.index_cast %arg10 : i32 to index
        %95 = arith.index_cast %93 : i32 to index
        %96 = memref.load %arg6[%94, %95] : memref<16x36xf32, #tpu.memory_space<smem>>
        %97 = vector.broadcast %96 : f32 to vector<8x128xf32>
        %98 = arith.mulf %97, %91 : vector<8x128xf32>
        %99 = arith.addf %74, %98 : vector<8x128xf32>
        %100 = vector.extract_strided_slice %23#0 {offsets = [6, 0, 0], sizes = [1, 8, 128], strides = [1, 1, 1]} : vector<12x8x128xf32> to vector<1x8x128xf32>
        %101 = vector.shape_cast %100 : vector<1x8x128xf32> to vector<8x128xf32>
        %102 = vector.extract_strided_slice %23#0 {offsets = [7, 0, 0], sizes = [1, 8, 128], strides = [1, 1, 1]} : vector<12x8x128xf32> to vector<1x8x128xf32>
        %103 = vector.shape_cast %102 : vector<1x8x128xf32> to vector<8x128xf32>
        %104 = arith.maximumf %101, %103 : vector<8x128xf32>
        %105 = vector.extract_strided_slice %23#1 {offsets = [6, 0, 0], sizes = [1, 8, 128], strides = [1, 1, 1]} : vector<12x8x128xf32> to vector<1x8x128xf32>
        %106 = vector.shape_cast %105 : vector<1x8x128xf32> to vector<8x128xf32>
        %107 = vector.extract_strided_slice %23#1 {offsets = [7, 0, 0], sizes = [1, 8, 128], strides = [1, 1, 1]} : vector<12x8x128xf32> to vector<1x8x128xf32>
        %108 = vector.shape_cast %107 : vector<1x8x128xf32> to vector<8x128xf32>
        %109 = arith.maximumf %106, %108 : vector<8x128xf32>
        %110 = arith.maximumf %104, %109 : vector<8x128xf32>
        %111 = arith.index_cast %arg10 : i32 to index
        %112 = memref.load %arg5[%111] : memref<16xf32, #tpu.memory_space<smem>>
        %113 = vector.broadcast %112 : f32 to vector<8x128xf32>
        %114 = arith.addf %110, %113 : vector<8x128xf32>
        %cst_28 = arith.constant 0.000000e+00 : f32
        %115 = vector.broadcast %cst_28 : f32 to vector<8x128xf32>
        %116 = arith.maximumf %114, %115 : vector<8x128xf32>
        %c6_i32_29 = arith.constant 6 : i32
        %117 = arith.muli %arg12, %c6_i32_29 : i32
        %c3_i32 = arith.constant 3 : i32
        %118 = arith.addi %117, %c3_i32 : i32
        %119 = arith.index_cast %arg10 : i32 to index
        %120 = arith.index_cast %118 : i32 to index
        %121 = memref.load %arg6[%119, %120] : memref<16x36xf32, #tpu.memory_space<smem>>
        %122 = vector.broadcast %121 : f32 to vector<8x128xf32>
        %123 = arith.mulf %122, %116 : vector<8x128xf32>
        %124 = arith.addf %99, %123 : vector<8x128xf32>
        %125 = vector.extract_strided_slice %23#0 {offsets = [8, 0, 0], sizes = [1, 8, 128], strides = [1, 1, 1]} : vector<12x8x128xf32> to vector<1x8x128xf32>
        %126 = vector.shape_cast %125 : vector<1x8x128xf32> to vector<8x128xf32>
        %127 = vector.extract_strided_slice %23#0 {offsets = [9, 0, 0], sizes = [1, 8, 128], strides = [1, 1, 1]} : vector<12x8x128xf32> to vector<1x8x128xf32>
        %128 = vector.shape_cast %127 : vector<1x8x128xf32> to vector<8x128xf32>
        %129 = arith.maximumf %126, %128 : vector<8x128xf32>
        %130 = vector.extract_strided_slice %23#1 {offsets = [8, 0, 0], sizes = [1, 8, 128], strides = [1, 1, 1]} : vector<12x8x128xf32> to vector<1x8x128xf32>
        %131 = vector.shape_cast %130 : vector<1x8x128xf32> to vector<8x128xf32>
        %132 = vector.extract_strided_slice %23#1 {offsets = [9, 0, 0], sizes = [1, 8, 128], strides = [1, 1, 1]} : vector<12x8x128xf32> to vector<1x8x128xf32>
        %133 = vector.shape_cast %132 : vector<1x8x128xf32> to vector<8x128xf32>
        %134 = arith.maximumf %131, %133 : vector<8x128xf32>
        %135 = arith.maximumf %129, %134 : vector<8x128xf32>
        %136 = arith.index_cast %arg10 : i32 to index
        %137 = memref.load %arg5[%136] : memref<16xf32, #tpu.memory_space<smem>>
        %138 = vector.broadcast %137 : f32 to vector<8x128xf32>
        %139 = arith.addf %135, %138 : vector<8x128xf32>
        %cst_30 = arith.constant 0.000000e+00 : f32
        %140 = vector.broadcast %cst_30 : f32 to vector<8x128xf32>
        %141 = arith.maximumf %139, %140 : vector<8x128xf32>
        %c6_i32_31 = arith.constant 6 : i32
        %142 = arith.muli %arg12, %c6_i32_31 : i32
        %c4_i32_32 = arith.constant 4 : i32
        %143 = arith.addi %142, %c4_i32_32 : i32
        %144 = arith.index_cast %arg10 : i32 to index
        %145 = arith.index_cast %143 : i32 to index
        %146 = memref.load %arg6[%144, %145] : memref<16x36xf32, #tpu.memory_space<smem>>
        %147 = vector.broadcast %146 : f32 to vector<8x128xf32>
        %148 = arith.mulf %147, %141 : vector<8x128xf32>
        %149 = arith.addf %124, %148 : vector<8x128xf32>
        %150 = vector.extract_strided_slice %23#0 {offsets = [10, 0, 0], sizes = [1, 8, 128], strides = [1, 1, 1]} : vector<12x8x128xf32> to vector<1x8x128xf32>
        %151 = vector.shape_cast %150 : vector<1x8x128xf32> to vector<8x128xf32>
        %152 = vector.extract_strided_slice %23#0 {offsets = [11, 0, 0], sizes = [1, 8, 128], strides = [1, 1, 1]} : vector<12x8x128xf32> to vector<1x8x128xf32>
        %153 = vector.shape_cast %152 : vector<1x8x128xf32> to vector<8x128xf32>
        %154 = arith.maximumf %151, %153 : vector<8x128xf32>
        %155 = vector.extract_strided_slice %23#1 {offsets = [10, 0, 0], sizes = [1, 8, 128], strides = [1, 1, 1]} : vector<12x8x128xf32> to vector<1x8x128xf32>
        %156 = vector.shape_cast %155 : vector<1x8x128xf32> to vector<8x128xf32>
        %157 = vector.extract_strided_slice %23#1 {offsets = [11, 0, 0], sizes = [1, 8, 128], strides = [1, 1, 1]} : vector<12x8x128xf32> to vector<1x8x128xf32>
        %158 = vector.shape_cast %157 : vector<1x8x128xf32> to vector<8x128xf32>
        %159 = arith.maximumf %156, %158 : vector<8x128xf32>
        %160 = arith.maximumf %154, %159 : vector<8x128xf32>
        %161 = arith.index_cast %arg10 : i32 to index
        %162 = memref.load %arg5[%161] : memref<16xf32, #tpu.memory_space<smem>>
        %163 = vector.broadcast %162 : f32 to vector<8x128xf32>
        %164 = arith.addf %160, %163 : vector<8x128xf32>
        %cst_33 = arith.constant 0.000000e+00 : f32
        %165 = vector.broadcast %cst_33 : f32 to vector<8x128xf32>
        %166 = arith.maximumf %164, %165 : vector<8x128xf32>
        %c6_i32_34 = arith.constant 6 : i32
        %167 = arith.muli %arg12, %c6_i32_34 : i32
        %c5_i32 = arith.constant 5 : i32
        %168 = arith.addi %167, %c5_i32 : i32
        %169 = arith.index_cast %arg10 : i32 to index
        %170 = arith.index_cast %168 : i32 to index
        %171 = memref.load %arg6[%169, %170] : memref<16x36xf32, #tpu.memory_space<smem>>
        %172 = vector.broadcast %171 : f32 to vector<8x128xf32>
        %173 = arith.mulf %172, %166 : vector<8x128xf32>
        %174 = arith.addf %149, %173 : vector<8x128xf32>
        %175 = arith.addf %arg13, %174 : vector<8x128xf32>
        scf.yield %175 : vector<8x128xf32>
      }
      %c6_i32_12 = arith.constant 6 : i32
      scf.yield %18 : vector<8x128xf32>
    }
    %c16_i32_3 = arith.constant 16 : i32
    %c0 = arith.constant 0 : index
    %4 = memref.load %arg7[%c0] : memref<1xf32, #tpu.memory_space<smem>>
    %5 = vector.broadcast %4 : f32 to vector<8x128xf32>
    %6 = arith.addf %3, %5 : vector<8x128xf32>
    %cst_4 = arith.constant 0.000000e+00 : f32
    %7 = vector.broadcast %cst_4 : f32 to vector<8x128xf32>
    %8 = arith.subf %7, %6 : vector<8x128xf32>
    %9 = math.exp %8 : vector<8x128xf32>
    %cst_5 = arith.constant 1.000000e+00 : f32
    %10 = vector.broadcast %cst_5 : f32 to vector<8x128xf32>
    %11 = arith.addf %10, %9 : vector<8x128xf32>
    %cst_6 = arith.constant 1.000000e+00 : f32
    %12 = vector.broadcast %cst_6 : f32 to vector<8x128xf32>
    %13 = arith.divf %12, %11 : vector<8x128xf32>
    %c0_7 = arith.constant 0 : index
    %c0_8 = arith.constant 0 : index
    %c0_9 = arith.constant 0 : index
    %14 = vector.load %arg8[%c0_7, %c0_8, %c0_9] : memref<1x8x128xf32, #tpu.memory_space<vmem>>, vector<1x8x128xf32>
    %15 = vector.shape_cast %14 : vector<1x8x128xf32> to vector<8x128xf32>
    %16 = vector.shape_cast %13 : vector<8x128xf32> to vector<1x8x128xf32>
    tpu.vector_store %arg8[%c0_7, %c0_8, %c0_9], %16 {strides = array<i32>} : memref<1x8x128xf32, #tpu.memory_space<vmem>>, vector<1x8x128xf32>,
    return
  }
  func.func @transform_0(%arg0: i32) -> (i32, i32, i32, i32, i32) {
    %c0_i32 = arith.constant 0 : i32
    %c0_i32_0 = arith.constant 0 : i32
    %c0_i32_1 = arith.constant 0 : i32
    %c0_i32_2 = arith.constant 0 : i32
    %c0_i32_3 = arith.constant 0 : i32
    return %arg0, %c0_i32, %c0_i32_0, %c0_i32_1, %c0_i32_2 : i32, i32, i32, i32, i32
  }
  func.func @transform_1(%arg0: i32) -> (i32, i32) {
    %c0_i32 = arith.constant 0 : i32
    %c0_i32_0 = arith.constant 0 : i32
    %c0_i32_1 = arith.constant 0 : i32
    return %c0_i32, %c0_i32_0 : i32, i32
  }
  func.func @transform_2(%arg0: i32) -> i32 {
    %c0_i32 = arith.constant 0 : i32
    %c0_i32_0 = arith.constant 0 : i32
    return %c0_i32 : i32
  }
  func.func @transform_3(%arg0: i32) -> (i32, i32) {
    %c0_i32 = arith.constant 0 : i32
    %c0_i32_0 = arith.constant 0 : i32
    %c0_i32_1 = arith.constant 0 : i32
    return %c0_i32, %c0_i32_0 : i32, i32
  }
  func.func @transform_4(%arg0: i32) -> i32 {
    %c0_i32 = arith.constant 0 : i32
    %c0_i32_0 = arith.constant 0 : i32
    return %c0_i32 : i32
  }
  func.func @transform_5(%arg0: i32) -> (i32, i32) {
    %c0_i32 = arith.constant 0 : i32
    %c0_i32_0 = arith.constant 0 : i32
    %c0_i32_1 = arith.constant 0 : i32
    return %c0_i32, %c0_i32_0 : i32, i32
  }
  func.func @transform_6(%arg0: i32) -> i32 {
    %c0_i32 = arith.constant 0 : i32
    %c0_i32_0 = arith.constant 0 : i32
    return %c0_i32 : i32
  }
  func.func @transform_7(%arg0: i32) -> (i32, i32, i32) {
    %c0_i32 = arith.constant 0 : i32
    %c0_i32_0 = arith.constant 0 : i32
    %c0_i32_1 = arith.constant 0 : i32
    return %arg0, %c0_i32, %c0_i32_0 : i32, i32, i32
  }
}

</mosaic_0001>

<bundles_post_ra>
// kernel: xy_forward.1
= control target key start
LH: loop header
LB: loop body
LE: loop exit
PB: predicated region body
PF: predicated region fallthrough
CT: control target
= control target key end

     0   :  { %s7706_s0 = inlined_call_operand.vmem [shape: f32[1,30,30,8,128], index: 0, kind: input, shape index: {}]   ;;  %s7707_s1 = inlined_call_operand.vmem [shape: f32[8,9], index: 1, kind: input, shape index: {}]   ;;  %s7708_s2 = inlined_call_operand.vmem [shape: f32[8], index: 2, kind: input, shape index: {}]   ;;  %s7709_s3 = inlined_call_operand.vmem [shape: f32[16,72], index: 3, kind: input, shape index: {}]   ;;  %s7710_s4 = inlined_call_operand.vmem [shape: f32[16], index: 4, kind: input, shape index: {}]   ;;  %s7711_s5 = inlined_call_operand.vmem [shape: f32[16,36], index: 5, kind: input, shape index: {}]   ;;  %s7712_s6 = inlined_call_operand.<no memory space> [shape: f32[1], index: 6, kind: input, shape index: {}]   ;;  %s7713_s7 = inlined_call_operand.vmem [shape: f32[1,8,128], index: 7, kind: output, shape index: {}]  }
   0x1   :  { %12 = sst [smem:[#allocation3]] %s7712_s6 }
   0x2   :  { %13 = vsyncpa [#allocation5], 0 }
   0x3   :  { %14 = vsyncpa [#allocation7], 0  ;;  %s34_s28 = sshll.u32 %s7708_s2, 4  ;;  %s35_s28 = int_to_ptr.vmem [resolvable:$true] %s34_s28 }
   0x4   :  { %15 = vsyncpa [#allocation10], 0  ;;  %s56_s8 = sshll.u32 %s7710_s4, 4  ;;  %s3607_s9 = scalar_lea.vmem %s35_s28, 16  ;;  %s57_s8 = int_to_ptr.vmem [resolvable:$true] %s56_s8 }
   0x5   :  { %p3608_p0 = scmp.ne.s32.totalorder %s35_s28, %s3607_s9  ;;  %p3612_p1 = scmp.lt.s32.totalorder %s35_s28, %s35_s28 }
   0x6   :  { %p3613_p2 = scmp.lt.s32.totalorder %s3607_s9, %s3607_s9 }
   0x8   :  { %p3614_p3 = por %p3613_p2, %p3612_p1 }
   0xa   :  { %p3615_p4 = pnand %p3614_p3, %p3608_p0 }
   0xc   :  { %3618 = shalt.err (!%p3615_p4)
}
   0xd   :  { %s3921_s6 = smov [#allocation6]   ;;  %s3619_s10 = scalar_lea.vmem %s57_s8, 16 }
   0xe   :  { %37 = dma.vmem_to_smem %s35_s28, 16, %s3921_s6, [#allocation7]  }
   0xf   :  { %p3620_p5 = scmp.ne.s32.totalorder %s57_s8, %s3619_s10  ;;  %p3624_p6 = scmp.lt.s32.totalorder %s57_s8, %s57_s8 }
  0x10   :  { %p3625_p7 = scmp.lt.s32.totalorder %s3619_s10, %s3619_s10 }
  0x12   :  { %p3626_p8 = por %p3625_p7, %p3624_p6 }
  0x14   :  { %p3627_p9 = pnand %p3626_p8, %p3620_p5 }
  0x16   :  { %3630 = shalt.err (!%p3627_p9)
}
  0x17   :  { %s3922_s2 = smov [#allocation9]   ;;  %s24_s12 = sshll.u32 %s7707_s1, 4  ;;  %s25_s12 = int_to_ptr.vmem [resolvable:$true] %s24_s12 }
  0x18   :  { %59 = dma.vmem_to_smem %s57_s8, 16, %s3922_s2, [#allocation10]  }
  0x19   :  { %s43_s15 = sshll.u32 %s7709_s3, 4  ;;  %s3631_s16 = scalar_lea.vmem %s25_s12, 128  ;;  %s44_s15 = int_to_ptr.vmem [resolvable:$true] %s43_s15 }
  0x1a   :  { %p3632_p10 = scmp.ne.s32.totalorder %s25_s12, %s3631_s16  ;;  %p3636_p11 = scmp.lt.s32.totalorder %s25_s12, %s25_s12 }
  0x1b   :  { %p3637_p12 = scmp.lt.s32.totalorder %s3631_s16, %s3631_s16 }
  0x1d   :  { %p3638_p13 = por %p3637_p12, %p3636_p11 }
  0x1f   :  { %p3639_p0 = pnand %p3638_p13, %p3632_p10 }
  0x21   :  { %3642 = shalt.err (!%p3639_p0)
}
  0x22   :  { %s3923_s17 = smov [#allocation4]   ;;  %s3643_s18 = scalar_lea.vmem %s44_s15, 256 }
  0x23   :  { %27 = dma.vmem_to_smem %s25_s12, 128, %s3923_s17, [#allocation5]  }
  0x24   :  { %p3644_p1 = scmp.ne.s32.totalorder %s44_s15, %s3643_s18  ;;  %p3648_p2 = scmp.lt.s32.totalorder %s44_s15, %s44_s15 }
  0x25   :  { %p3649_p3 = scmp.lt.s32.totalorder %s3643_s18, %s3643_s18 }
  0x27   :  { %p3650_p4 = por %p3649_p3, %p3648_p2 }
  0x29   :  { %p3651_p5 = pnand %p3650_p4, %p3644_p1 }
  0x2b   :  { %3654 = shalt.err (!%p3651_p5)
}
  0x2c   :  { %s3924_s1 = smov [#allocation8]   ;;  %s3925_s19 = smov 128  }
  0x2d   :  { %s3926_s3 = smov 8   ;;  %s65_s22 = sshll.u32 %s7711_s5, 4  ;;  %s66_s22 = int_to_ptr.vmem [resolvable:$true] %s65_s22 }
  0x2e   :  { %49 = dma.vmem_to_smem %s44_s15, 256, %s3924_s1, [#allocation7], %s3925_s19, %s3925_s19, %s3926_s3  }
  0x2f   :  { %s3655_s23 = scalar_lea.vmem %s66_s22, 256  ;;  %p3660_p7 = scmp.lt.s32.totalorder %s66_s22, %s66_s22 }
  0x30   :  { %p3656_p6 = scmp.ne.s32.totalorder %s66_s22, %s3655_s23  ;;  %p3661_p8 = scmp.lt.s32.totalorder %s3655_s23, %s3655_s23 }
  0x32   :  { %p3662_p9 = por %p3661_p8, %p3660_p7 }
  0x34   :  { %p3663_p10 = pnand %p3662_p9, %p3656_p6 }
  0x36   :  { %3666 = shalt.err (!%p3663_p10)
}
  0x37   :  { %s3927_s24 = smov [#allocation11]  }
  0x38   :  { %71 = dma.vmem_to_smem %s66_s22, 256, %s3927_s24, [#allocation10], %s3925_s19, %s3925_s19, %s3926_s3  }
  0x39   :  { %3791 = dma.done.wait [#allocation5], 128  }
  0x3a   :  { %3792 = vsyncadd [#allocation5], 4294967168 }
  0x3b   :  { %3793 = dma.done.wait [#allocation7], 272  }
  0x3c   :  { %3794 = vsyncadd [#allocation7], 4294967024 }
  0x3d   :  { %3795 = dma.done.wait [#allocation10], 272  }
  0x3e   :  { %3796 = vsyncadd [#allocation10], 4294967024 }
  0x3f   :  { %89 = sfence }
  0x40   :  { %s3986_s25 = smov 0  }
  0x41 LB: > { %s3991_s5 = smov 0   ;;  %s3799_s25 = sphi %s3986_s25, %s95_s25  }
  0x42 LB: >> { %s3997_s26 = sshll.u32 %s3799_s25, 7  ;;  %s3063_s28 = smul.u32 480, %s3803_s5  ;;  %s3803_s5 = sphi %s3991_s5, %s101_s5  }
  0x43   : >> { %s122_s27 = sld [smem:[#allocation4 + %s3997_s26]]  ;;  %s152_s29 = sadd.s32 1, %s3997_s26 }
  0x44   : >> { %s4004_s30 = sld [smem:[#allocation4 + %s152_s29]]  ;;  %s183_s8 = sadd.s32 2, %s3997_s26 }
  0x45   : >> { %s4010_s10 = scalar_lea.vmem %s7706_s0, %s3063_s28  ;;  %s4014_s2 = sld [smem:[#allocation4 + %s183_s8]] }
  0x46   : >> { %v105_v0 = vld [vmem:[%s4010_s10] sm:$0xff]  ;;  %v106_v1 = vld [vmem:[%s4010_s10 + $0x8] sm:$0xff]  ;;  %v4019_v2 = vld [vmem:[%s4010_s10 + $0x10] sm:$0xff]  ;;  %s233_s4 = sadd.s32 3, %s3997_s26  ;;  %s264_s11 = sadd.s32 4, %s3997_s26 }
  0x47   : >> { %v4022_v3 = vld [vmem:[%s4010_s10 + $0x18] sm:$0xff]  ;;  %v4025_v4 = vld [vmem:[%s4010_s10 + $0x20] sm:$0xff]  ;;  %v4028_v5 = vld [vmem:[%s4010_s10 + $0x28] sm:$0xff]  ;;  %s295_s12 = sadd.s32 5, %s3997_s26  ;;  %s4112_s13 = sld [smem:[#allocation4 + %s233_s4]] }
  0x48   : >> { %v4031_v6 = vld [vmem:[%s4010_s10 + $0x30] sm:$0xff]  ;;  %v4034_v7 = vld [vmem:[%s4010_s10 + $0x38] sm:$0xff]  ;;  %v4037_v8 = vld [vmem:[%s4010_s10 + $0x40] sm:$0xff]  ;;  %s4116_s14 = sld [smem:[#allocation4 + %s264_s11]]  ;;  %s429_s16 = sadd.s32 6, %s3997_s26 }
  0x49   : >> { %v4039_v9 = vstv %s122_s27  ;;  %v4042_v10 = vld [vmem:[%s4010_s10 + $0x48] sm:$0xff]  ;;  %v4045_v11 = vld [vmem:[%s4010_s10 + $0x50] sm:$0xff]  ;;  %v4048_v12 = vld [vmem:[%s4010_s10 + $0x58] sm:$0xff]  ;;  %s4120_s15 = sld [smem:[#allocation4 + %s295_s12]]  ;;  %s460_s17 = sadd.s32 7, %s3997_s26 }
  0x4a   : >> { %v124_v13 = vmul.f32 %v4039_v9, %v105_v0  ;;  %v125_v14 = vmul.f32 %v4039_v9, %v106_v1  ;;  %v126_v15 = vmul.f32 %v4039_v9, %v4019_v2  ;;  %v127_v16 = vmul.f32 %v4039_v9, %v4022_v3  ;;  %v117_v17 = vld [vmem:[%s4010_s10 + $0x60] sm:$0xff]  ;;  %v118_v18 = vld [vmem:[%s4010_s10 + $0x68] sm:$0xff]  ;;  %v119_v31 = vld [vmem:[%s4010_s10 + $0x70] sm:$0xff]  ;;  %s491_s18 = sadd.s32 8, %s3997_s26  ;;  %s4376_s1 = sld [smem:[#allocation4 + %s429_s16]] }
  0x4b   : >> { %v128_v19 = vmul.f32 %v4039_v9, %v4025_v4  ;;  %v129_v20 = vmul.f32 %v4039_v9, %v4028_v5  ;;  %v130_v21 = vmul.f32 %v4039_v9, %v4031_v6  ;;  %v131_v22 = vmul.f32 %v4039_v9, %v4034_v7  ;;  %v120_v60 = vld [vmem:[%s4010_s10 + $0x78] sm:$0xff]  ;;  %s4380_s19 = sld [smem:[#allocation4 + %s460_s17]]  ;;  %s754_s22 = smul.u32 112, %s3803_s5 }
  0x4c   : >> { %v132_v23 = vmul.f32 %v4039_v9, %v4037_v8  ;;  %v133_v24 = vmul.f32 %v4039_v9, %v4042_v10  ;;  %v134_v25 = vmul.f32 %v4039_v9, %v4045_v11  ;;  %v135_v26 = vmul.f32 %v4039_v9, %v4048_v12  ;;  %s4384_s3 = sld [smem:[#allocation4 + %s491_s18]]  ;;  %s755_s23 = smul.u32 1568, %s3799_s25 }
  0x4d   : >> { %v136_v27 = vmul.f32 %v4039_v9, %v117_v17  ;;  %v137_v28 = vmul.f32 %v4039_v9, %v118_v18  ;;  %v4077_v29 = vstv %s4004_s30  ;;  %v4080_v30 = vstv %s4014_s2  ;;  %s4832_s20 = sld [smem:[#allocation6 + %s3799_s25]]  ;;  %s101_s5 = sadd.s32 1, %s3803_s5  }
  0x4e   : >> { %v155_v32 = vmul.f32 %v4077_v29, %v106_v1  ;;  %v156_v33 = vmul.f32 %v4077_v29, %v4019_v2  ;;  %v157_v34 = vmul.f32 %v4077_v29, %v4022_v3  ;;  %v158_v35 = vmul.f32 %v4077_v29, %v4025_v4  ;;  %s4843_s21 = sld [smem:[#allocation4 + %s3997_s26]]  ;;  %s4867_s24 = sadd.s32 %s755_s23, %s754_s22 }
  0x4f   : >> { %v159_v36 = vmul.f32 %v4077_v29, %v4028_v5  ;;  %v160_v37 = vmul.f32 %v4077_v29, %v4031_v6  ;;  %v161_v38 = vmul.f32 %v4077_v29, %v4034_v7  ;;  %v162_v39 = vmul.f32 %v4077_v29, %v4037_v8  ;;  %s4871_s27 = sld [smem:[#allocation4 + %s152_s29]]  ;;  %s4918_s29 = scalar_lea.vmem [#allocation2], %s4867_s24 }
  0x50   : >> { %v163_v40 = vmul.f32 %v4077_v29, %v4042_v10  ;;  %v164_v41 = vmul.f32 %v4077_v29, %v4045_v11  ;;  %v165_v42 = vmul.f32 %v4077_v29, %v4048_v12  ;;  %v166_v43 = vmul.f32 %v4077_v29, %v117_v17  ;;  %s4875_s28 = sld [smem:[#allocation4 + %s183_s8]]  ;;  %p98_p11 = scmp.ge.s32.totalorder %s101_s5, 14  }
  0x51   : >> { %v167_v44 = vmul.f32 %v4077_v29, %v118_v18  ;;  %v168_v45 = vmul.f32 %v4077_v29, %v119_v31  ;;  %v169_v46 = vadd.f32 %v155_v32, %v124_v13  ;;  %v170_v47 = vadd.f32 %v156_v33, %v125_v14  ;;  %v4158_v32 = vld [vmem:[%s4010_s10 + $0x110] sm:$0xff]  ;;  %v4161_v33 = vld [vmem:[%s4010_s10 + $0x118] sm:$0xff]  ;;  %s4880_s30 = sld [smem:[#allocation4 + %s233_s4]] }
  0x52   : >> { %v171_v48 = vadd.f32 %v157_v34, %v126_v15  ;;  %v172_v49 = vadd.f32 %v158_v35, %v127_v16  ;;  %v173_v50 = vadd.f32 %v159_v36, %v128_v19  ;;  %v174_v51 = vadd.f32 %v160_v37, %v129_v20  ;;  %v3067_v20 = vld [vmem:[%s4010_s10 + $0xf0] sm:$0xff]  ;;  %s5022_s8 = sld [smem:[#allocation4 + %s264_s11]] }
  0x53   : >> { %v175_v52 = vadd.f32 %v161_v38, %v130_v21  ;;  %v176_v53 = vadd.f32 %v162_v39, %v131_v22  ;;  %v177_v54 = vadd.f32 %v163_v40, %v132_v23  ;;  %v178_v55 = vadd.f32 %v164_v41, %v133_v24  ;;  %v4149_v23 = vld [vmem:[%s4010_s10 + $0xf8] sm:$0xff]  ;;  %v4176_v38 = vld [vmem:[%s4010_s10 + $0x120] sm:$0xff]  ;;  %v4179_v39 = vld [vmem:[%s4010_s10 + $0x128] sm:$0xff]  ;;  %s5035_s9 = sld [smem:[#allocation4 + %s295_s12]] }
  0x54   : >> { %v179_v56 = vadd.f32 %v165_v42, %v134_v25  ;;  %v180_v57 = vadd.f32 %v166_v43, %v135_v26  ;;  %v181_v58 = vadd.f32 %v167_v44, %v136_v27  ;;  %v182_v59 = vadd.f32 %v168_v45, %v137_v28  ;;  %v4152_v28 = vld [vmem:[%s4010_s10 + $0x100] sm:$0xff]  ;;  %v4182_v40 = vld [vmem:[%s4010_s10 + $0x130] sm:$0xff]  ;;  %v4192_v45 = vld [vmem:[%s4010_s10 + $0x138] sm:$0xff]  ;;  %s5247_s6 = sld [smem:[#allocation4 + %s429_s16]] }
  0x55   : >> { %v186_v61 = vmul.f32 %v4080_v30, %v4019_v2  ;;  %v187_v62 = vmul.f32 %v4080_v30, %v4022_v3  ;;  %v188_v63 = vmul.f32 %v4080_v30, %v4025_v4  ;;  %v189_v0 = vmul.f32 %v4080_v30, %v4028_v5  ;;  %s5251_s2 = sld [smem:[#allocation4 + %s460_s17]] }
  0x56   : >> { %v190_v1 = vmul.f32 %v4080_v30, %v4031_v6  ;;  %v191_v13 = vmul.f32 %v4080_v30, %v4034_v7  ;;  %v192_v14 = vmul.f32 %v4080_v30, %v4037_v8  ;;  %v193_v2 = vmul.f32 %v4080_v30, %v4042_v10  ;;  %s5255_s4 = sld [smem:[#allocation4 + %s491_s18]] }
  0x57   : >> { %v194_v3 = vmul.f32 %v4080_v30, %v4045_v11  ;;  %v195_v4 = vmul.f32 %v4080_v30, %v4048_v12  ;;  %v196_v5 = vmul.f32 %v4080_v30, %v117_v17  ;;  %v197_v6 = vmul.f32 %v4080_v30, %v118_v18  ;;  %s1397_s26 = sld [smem:[#allocation6 + %s3799_s25]]  ;;  %s95_s25 = sadd.s32 (%p98_p11), 1, %s3799_s25  }
  0x58   : >> { %v198_v15 = vmul.f32 %v4080_v30, %v119_v31  ;;  %v199_v7 = vmul.f32 %v4080_v30, %v120_v60  ;;  %v200_v16 = vadd.f32 %v186_v61, %v169_v46  ;;  %v201_v8 = vadd.f32 %v187_v62, %v170_v47  ;;  %v4155_v31 = vld [vmem:[%s4010_s10 + $0x108] sm:$0xff]  ;;  %v4195_v46 = vld [vmem:[%s4010_s10 + $0x140] sm:$0xff]  ;;  %p92_p12 = scmp.ge.s32.totalorder (%p98_p11), %s95_s25, 8  }
  0x59   : >> { %v202_v10 = vadd.f32 %v188_v63, %v171_v48  ;;  %v203_v19 = vadd.f32 %v189_v0, %v172_v49  ;;  %v204_v11 = vadd.f32 %v190_v1, %v173_v50  ;;  %v205_v12 = vadd.f32 %v191_v13, %v174_v51  ;;  %v4198_v47 = vld [vmem:[%s4010_s10 + $0x148] sm:$0xff] }
  0x5a   : >> { %v206_v17 = vadd.f32 %v192_v14, %v175_v52  ;;  %v207_v18 = vadd.f32 %v193_v2, %v176_v53  ;;  %v208_v21 = vadd.f32 %v194_v3, %v177_v54  ;;  %v209_v22 = vadd.f32 %v195_v4, %v178_v55  ;;  %v4209_v52 = vld [vmem:[%s4010_s10 + $0x150] sm:$0xff]  ;;  %v4212_v53 = vld [vmem:[%s4010_s10 + $0x158] sm:$0xff] }
  0x5b   : >> { %v210_v24 = vadd.f32 %v196_v5, %v179_v56  ;;  %v211_v25 = vadd.f32 %v197_v6, %v180_v57  ;;  %v212_v26 = vadd.f32 %v198_v15, %v181_v58  ;;  %v213_v27 = vadd.f32 %v199_v7, %v182_v59 }
  0x5c   : >> { %v4164_v34 = vstv %s4112_s13  ;;  %v4167_v35 = vstv %s4116_s14  ;;  %v4170_v36 = vstv %s4120_s15  ;;  %v4173_v37 = vmul.f32 %v3067_v20, %v4039_v9 }
  0x5d   : >> { %7755 = vst [vmem:[#allocation15_spill] sm:$0xff] %v4164_v34  ;;  %7756 = vst [vmem:[#allocation16_spill] sm:$0xff] %v4167_v35  ;;  %v236_v41 = vmul.f32 %v3067_v20, %v4164_v34  ;;  %v237_v42 = vmul.f32 %v4149_v23, %v4164_v34  ;;  %v238_v43 = vmul.f32 %v4152_v28, %v4164_v34 }
  0x5e   : >> { %7757 = vst [vmem:[#allocation17_spill] sm:$0xff] %v4170_v36  ;;  %v239_v44 = vmul.f32 %v4155_v31, %v4164_v34  ;;  %v240_v48 = vmul.f32 %v4158_v32, %v4164_v34  ;;  %v241_v49 = vmul.f32 %v4161_v33, %v4164_v34  ;;  %v242_v50 = vmul.f32 %v4176_v38, %v4164_v34 }
  0x5f   : >> { %v243_v51 = vmul.f32 %v4179_v39, %v4164_v34  ;;  %v244_v54 = vmul.f32 %v4182_v40, %v4164_v34  ;;  %v245_v55 = vmul.f32 %v4192_v45, %v4164_v34  ;;  %v246_v56 = vmul.f32 %v4195_v46, %v4164_v34 }
  0x60   : >> { %v247_v57 = vmul.f32 %v4198_v47, %v4164_v34  ;;  %v248_v58 = vmul.f32 %v4209_v52, %v4164_v34  ;;  %v249_v59 = vmul.f32 %v4212_v53, %v4164_v34  ;;  %v250_v60 = vadd.f32 %v236_v41, %v200_v16 }
  0x61   : >> { %v251_v61 = vadd.f32 %v237_v42, %v201_v8  ;;  %v252_v62 = vadd.f32 %v238_v43, %v202_v10  ;;  %v253_v63 = vadd.f32 %v239_v44, %v203_v19  ;;  %v254_v0 = vadd.f32 %v240_v48, %v204_v11 }
  0x62   : >> { %v255_v1 = vadd.f32 %v241_v49, %v205_v12  ;;  %v256_v13 = vadd.f32 %v242_v50, %v206_v17  ;;  %v257_v14 = vadd.f32 %v243_v51, %v207_v18  ;;  %v258_v2 = vadd.f32 %v244_v54, %v208_v21  ;;  %v4243_v17 = vld [vmem:[%s4010_s10 + $0x160] sm:$0xff] }
  0x63   : >> { %v259_v3 = vadd.f32 %v245_v55, %v209_v22  ;;  %v260_v4 = vadd.f32 %v246_v56, %v210_v24  ;;  %v261_v5 = vadd.f32 %v247_v57, %v211_v25  ;;  %v262_v6 = vadd.f32 %v248_v58, %v212_v26 }
  0x64   : >> { %v263_v15 = vadd.f32 %v249_v59, %v213_v27  ;;  %v267_v7 = vmul.f32 %v4149_v23, %v4167_v35  ;;  %v268_v16 = vmul.f32 %v4152_v28, %v4167_v35  ;;  %v269_v8 = vmul.f32 %v4155_v31, %v4167_v35 }
  0x65   : >> { %v270_v10 = vmul.f32 %v4158_v32, %v4167_v35  ;;  %v271_v19 = vmul.f32 %v4161_v33, %v4167_v35  ;;  %v272_v11 = vmul.f32 %v4176_v38, %v4167_v35  ;;  %v273_v12 = vmul.f32 %v4179_v39, %v4167_v35 }
  0x66   : >> { %v274_v20 = vmul.f32 %v4182_v40, %v4167_v35  ;;  %v275_v18 = vmul.f32 %v4192_v45, %v4167_v35  ;;  %v276_v21 = vmul.f32 %v4195_v46, %v4167_v35  ;;  %v277_v22 = vmul.f32 %v4198_v47, %v4167_v35 }
  0x67   : >> { %v278_v24 = vmul.f32 %v4209_v52, %v4167_v35  ;;  %v279_v25 = vmul.f32 %v4212_v53, %v4167_v35  ;;  %v280_v26 = vmul.f32 %v4243_v17, %v4167_v35  ;;  %v281_v27 = vadd.f32 %v267_v7, %v250_v60 }
  0x68   : >> { %v282_v41 = vadd.f32 %v268_v16, %v251_v61  ;;  %v283_v42 = vadd.f32 %v269_v8, %v252_v62  ;;  %v284_v43 = vadd.f32 %v270_v10, %v253_v63  ;;  %v285_v44 = vadd.f32 %v271_v19, %v254_v0 }
  0x69   : >> { %v286_v48 = vadd.f32 %v272_v11, %v255_v1  ;;  %v287_v49 = vadd.f32 %v273_v12, %v256_v13  ;;  %v288_v50 = vadd.f32 %v274_v20, %v257_v14  ;;  %v289_v51 = vadd.f32 %v275_v18, %v258_v2  ;;  %v4274_v14 = vld [vmem:[%s4010_s10 + $0x168] sm:$0xff] }
  0x6a   : >> { %v290_v54 = vadd.f32 %v276_v21, %v259_v3  ;;  %v291_v55 = vadd.f32 %v277_v22, %v260_v4  ;;  %v292_v56 = vadd.f32 %v278_v24, %v261_v5  ;;  %v293_v57 = vadd.f32 %v279_v25, %v262_v6 }
  0x6b   : >> { %v294_v58 = vadd.f32 %v280_v26, %v263_v15  ;;  %v298_v59 = vmul.f32 %v4152_v28, %v4170_v36  ;;  %v299_v60 = vmul.f32 %v4155_v31, %v4170_v36  ;;  %v300_v61 = vmul.f32 %v4158_v32, %v4170_v36 }
  0x6c   : >> { %v301_v62 = vmul.f32 %v4161_v33, %v4170_v36  ;;  %v302_v63 = vmul.f32 %v4176_v38, %v4170_v36  ;;  %v303_v0 = vmul.f32 %v4179_v39, %v4170_v36  ;;  %v304_v1 = vmul.f32 %v4182_v40, %v4170_v36 }
  0x6d   : >> { %v305_v13 = vmul.f32 %v4192_v45, %v4170_v36  ;;  %v306_v2 = vmul.f32 %v4195_v46, %v4170_v36  ;;  %v307_v3 = vmul.f32 %v4198_v47, %v4170_v36  ;;  %v308_v4 = vmul.f32 %v4209_v52, %v4170_v36 }
  0x6e   : >> { %v309_v5 = vmul.f32 %v4212_v53, %v4170_v36  ;;  %v310_v6 = vmul.f32 %v4243_v17, %v4170_v36  ;;  %v311_v15 = vmul.f32 %v4274_v14, %v4170_v36  ;;  %v4288_v7 = vadd.f32 %v298_v59, %v281_v27 }
  0x6f   : >> { %v4290_v16 = vadd.f32 %v299_v60, %v282_v41  ;;  %v4292_v8 = vadd.f32 %v300_v61, %v283_v42  ;;  %v4294_v10 = vadd.f32 %v301_v62, %v284_v43  ;;  %v4296_v19 = vadd.f32 %v302_v63, %v285_v44 }
  0x70   : >> { %v4298_v11 = vadd.f32 %v303_v0, %v286_v48  ;;  %v4300_v12 = vadd.f32 %v304_v1, %v287_v49  ;;  %v4302_v20 = vadd.f32 %v305_v13, %v288_v50  ;;  %v4304_v18 = vadd.f32 %v306_v2, %v289_v51 }
  0x71   : >> { %v4306_v21 = vadd.f32 %v307_v3, %v290_v54  ;;  %v4308_v22 = vadd.f32 %v308_v4, %v291_v55  ;;  %v4310_v24 = vadd.f32 %v309_v5, %v292_v56  ;;  %v4312_v25 = vadd.f32 %v310_v6, %v293_v57 }
  0x72   : >> { %v4314_v26 = vadd.f32 %v311_v15, %v294_v58  ;;  %v327_v27 = vmul.f32 %v4149_v23, %v4039_v9  ;;  %v328_v41 = vmul.f32 %v4152_v28, %v4039_v9  ;;  %v329_v42 = vmul.f32 %v4155_v31, %v4039_v9 }
  0x73   : >> { %7758 = vst [vmem:[#allocation18_spill] sm:$0xff] %v4306_v21  ;;  %7759 = vst [vmem:[#allocation19_spill] sm:$0xff] %v4308_v22  ;;  %v330_v43 = vmul.f32 %v4158_v32, %v4039_v9  ;;  %v331_v44 = vmul.f32 %v4161_v33, %v4039_v9  ;;  %v332_v48 = vmul.f32 %v4176_v38, %v4039_v9 }
  0x74   : >> { %7760 = vst [vmem:[#allocation20_spill] sm:$0xff] %v4310_v24  ;;  %7761 = vst [vmem:[#allocation21_spill] sm:$0xff] %v4312_v25  ;;  %v333_v49 = vmul.f32 %v4179_v39, %v4039_v9  ;;  %v334_v50 = vmul.f32 %v4182_v40, %v4039_v9  ;;  %v335_v51 = vmul.f32 %v4192_v45, %v4039_v9 }
  0x75   : >> { %7762 = vst [vmem:[#allocation22_spill] sm:$0xff] %v4314_v26  ;;  %v336_v54 = vmul.f32 %v4195_v46, %v4039_v9  ;;  %v337_v55 = vmul.f32 %v4198_v47, %v4039_v9  ;;  %v338_v56 = vmul.f32 %v4209_v52, %v4039_v9  ;;  %v339_v57 = vmul.f32 %v4212_v53, %v4039_v9 }
  0x76   : >> { %v354_v58 = vmul.f32 %v4149_v23, %v4077_v29  ;;  %v355_v59 = vmul.f32 %v4152_v28, %v4077_v29  ;;  %v356_v60 = vmul.f32 %v4155_v31, %v4077_v29  ;;  %v357_v61 = vmul.f32 %v4158_v32, %v4077_v29 }
  0x77   : >> { %v358_v62 = vmul.f32 %v4161_v33, %v4077_v29  ;;  %v359_v63 = vmul.f32 %v4176_v38, %v4077_v29  ;;  %v360_v9 = vmul.f32 %v4179_v39, %v4077_v29  ;;  %v361_v23 = vmul.f32 %v4182_v40, %v4077_v29 }
  0x78   : >> { %v362_v0 = vmul.f32 %v4192_v45, %v4077_v29  ;;  %v363_v1 = vmul.f32 %v4195_v46, %v4077_v29  ;;  %v364_v13 = vmul.f32 %v4198_v47, %v4077_v29  ;;  %v365_v2 = vmul.f32 %v4209_v52, %v4077_v29 }
  0x79   : >> { %v366_v3 = vmul.f32 %v4212_v53, %v4077_v29  ;;  %v367_v4 = vmul.f32 %v4243_v17, %v4077_v29  ;;  %v368_v5 = vadd.f32 %v354_v58, %v4173_v37  ;;  %v369_v6 = vadd.f32 %v355_v59, %v327_v27  ;;  %v4458_v58 = vld [vmem:[%s4010_s10 + $0x208] sm:$0xff] }
  0x7a   : >> { %v370_v15 = vadd.f32 %v356_v60, %v328_v41  ;;  %v371_v36 = vadd.f32 %v357_v61, %v329_v42  ;;  %v372_v35 = vadd.f32 %v358_v62, %v330_v43  ;;  %v373_v34 = vadd.f32 %v359_v63, %v331_v44  ;;  %v4470_v60 = vld [vmem:[%s4010_s10 + $0x210] sm:$0xff]  ;;  %v4473_v61 = vld [vmem:[%s4010_s10 + $0x218] sm:$0xff]  ;;  %v4476_v62 = vld [vmem:[%s4010_s10 + $0x220] sm:$0xff] }
  0x7b   : >> { %v374_v26 = vadd.f32 %v360_v9, %v332_v48  ;;  %v375_v25 = vadd.f32 %v361_v23, %v333_v49  ;;  %v376_v24 = vadd.f32 %v362_v0, %v334_v50  ;;  %v377_v22 = vadd.f32 %v363_v1, %v335_v51  ;;  %v4487_v1 = vld [vmem:[%s4010_s10 + $0x228] sm:$0xff] }
  0x7c   : >> { %v378_v29 = vadd.f32 %v364_v13, %v336_v54  ;;  %v379_v21 = vadd.f32 %v365_v2, %v337_v55  ;;  %v380_v37 = vadd.f32 %v366_v3, %v338_v56  ;;  %v381_v27 = vadd.f32 %v367_v4, %v339_v57  ;;  %v4433_v54 = vld [vmem:[%s4010_s10 + $0x1e0] sm:$0xff]  ;;  %v4490_v13 = vld [vmem:[%s4010_s10 + $0x230] sm:$0xff]  ;;  %v4493_v2 = vld [vmem:[%s4010_s10 + $0x238] sm:$0xff] }
  0x7d   : >> { %v382_v41 = vmul.f32 %v4152_v28, %v4080_v30  ;;  %v383_v42 = vmul.f32 %v4155_v31, %v4080_v30  ;;  %v384_v43 = vmul.f32 %v4158_v32, %v4080_v30  ;;  %v385_v44 = vmul.f32 %v4161_v33, %v4080_v30  ;;  %v4453_v56 = vld [vmem:[%s4010_s10 + $0x200] sm:$0xff] }
  0x7e   : >> { %v386_v48 = vmul.f32 %v4176_v38, %v4080_v30  ;;  %v387_v49 = vmul.f32 %v4179_v39, %v4080_v30  ;;  %v388_v50 = vmul.f32 %v4182_v40, %v4080_v30  ;;  %v389_v28 = vmul.f32 %v4192_v45, %v4080_v30 }
  0x7f   : >> { %v390_v31 = vmul.f32 %v4195_v46, %v4080_v30  ;;  %v391_v32 = vmul.f32 %v4198_v47, %v4080_v30  ;;  %v392_v33 = vmul.f32 %v4209_v52, %v4080_v30  ;;  %v393_v38 = vmul.f32 %v4212_v53, %v4080_v30 }
  0x80   : >> { %v394_v39 = vmul.f32 %v4243_v17, %v4080_v30  ;;  %v395_v40 = vmul.f32 %v4274_v14, %v4080_v30  ;;  %v4414_v45 = vadd.f32 %v382_v41, %v368_v5  ;;  %v4416_v46 = vadd.f32 %v383_v42, %v369_v6 }
  0x81   : >> { %v4418_v47 = vadd.f32 %v384_v43, %v370_v15  ;;  %v4420_v51 = vadd.f32 %v385_v44, %v371_v36  ;;  %v4422_v52 = vadd.f32 %v386_v48, %v372_v35  ;;  %v4424_v53 = vadd.f32 %v387_v49, %v373_v34  ;;  %v4436_v36 = vld [vmem:[%s4010_s10 + $0x1e8] sm:$0xff]  ;;  %v4504_v15 = vld [vmem:[%s4010_s10 + $0x240] sm:$0xff] }
  0x82   : >> { %v4426_v17 = vadd.f32 %v388_v50, %v374_v26  ;;  %v4428_v30 = vadd.f32 %v389_v28, %v375_v25  ;;  %v4430_v14 = vadd.f32 %v390_v31, %v376_v24  ;;  %v4438_v35 = vadd.f32 %v391_v32, %v377_v22  ;;  %v4447_v25 = vld [vmem:[%s4010_s10 + $0x1f0] sm:$0xff]  ;;  %v4450_v24 = vld [vmem:[%s4010_s10 + $0x1f8] sm:$0xff] }
  0x83   : >> { %7763 = vst [vmem:[#allocation23_spill] sm:$0xff] %v4422_v52  ;;  %7764 = vst [vmem:[#allocation24_spill] sm:$0xff] %v4424_v53  ;;  %v4440_v55 = vadd.f32 %v392_v33, %v378_v29  ;;  %v4442_v34 = vadd.f32 %v393_v38, %v379_v21  ;;  %v4444_v26 = vadd.f32 %v394_v39, %v380_v37  ;;  %v4461_v22 = vstv %s4376_s1  ;;  %v4507_v29 = vld [vmem:[%s4010_s10 + $0x248] sm:$0xff] }
  0x84   : >> { %7765 = vst [vmem:[#allocation25_spill] sm:$0xff] %v4426_v17  ;;  %7766 = vst [vmem:[#allocation26_spill] sm:$0xff] %v4428_v30  ;;  %v4455_v57 = vadd.f32 %v395_v40, %v381_v27  ;;  %v4464_v59 = vstv %s4380_s19  ;;  %v4467_v21 = vstv %s4384_s3  ;;  %v432_v63 = vmul.f32 %v4433_v54, %v4461_v22  ;;  %v7774_v40 = vld [vmem:[#allocation18_spill] sm:$0xff] }
  0x85   : >> { %7767 = vst [vmem:[#allocation27_spill] sm:$0xff] %v4430_v14  ;;  %7768 = vst [vmem:[#allocation28_spill] sm:$0xff] %v4438_v35  ;;  %v433_v9 = vmul.f32 %v4436_v36, %v4461_v22  ;;  %v434_v23 = vmul.f32 %v4447_v25, %v4461_v22  ;;  %v435_v0 = vmul.f32 %v4450_v24, %v4461_v22 }
  0x86   : >> { %7769 = vst [vmem:[#allocation29_spill] sm:$0xff] %v4440_v55  ;;  %7770 = vst [vmem:[#allocation30_spill] sm:$0xff] %v4442_v34  ;;  %v436_v3 = vmul.f32 %v4453_v56, %v4461_v22  ;;  %v437_v4 = vmul.f32 %v4458_v58, %v4461_v22  ;;  %v438_v5 = vmul.f32 %v4470_v60, %v4461_v22 }
  0x87   : >> { %7771 = vst [vmem:[#allocation31_spill] sm:$0xff] %v4444_v26  ;;  %7772 = vst [vmem:[#allocation32_spill] sm:$0xff] %v4455_v57  ;;  %v439_v6 = vmul.f32 %v4473_v61, %v4461_v22  ;;  %v440_v37 = vmul.f32 %v4476_v62, %v4461_v22  ;;  %v441_v27 = vmul.f32 %v4487_v1, %v4461_v22 }
  0x88   : >> { %7773 = vst [vmem:[#allocation33_spill] sm:$0xff] %v4461_v22  ;;  %v442_v41 = vmul.f32 %v4490_v13, %v4461_v22  ;;  %v443_v42 = vmul.f32 %v4493_v2, %v4461_v22  ;;  %v444_v43 = vmul.f32 %v4504_v15, %v4461_v22  ;;  %v445_v44 = vmul.f32 %v4507_v29, %v4461_v22 }
  0x89   : >> { %v446_v48 = vadd.f32 %v432_v63, %v4288_v7  ;;  %v447_v49 = vadd.f32 %v433_v9, %v4290_v16  ;;  %v448_v50 = vadd.f32 %v434_v23, %v4292_v8  ;;  %v449_v28 = vadd.f32 %v435_v0, %v4294_v10  ;;  %v7775_v7 = vld [vmem:[#allocation19_spill] sm:$0xff]  ;;  %v7776_v16 = vld [vmem:[#allocation20_spill] sm:$0xff]  ;;  %v7777_v8 = vld [vmem:[#allocation21_spill] sm:$0xff] }
  0x8a   : >> { %v450_v31 = vadd.f32 %v436_v3, %v4296_v19  ;;  %v451_v32 = vadd.f32 %v437_v4, %v4298_v11  ;;  %v452_v33 = vadd.f32 %v438_v5, %v4300_v12  ;;  %v453_v38 = vadd.f32 %v439_v6, %v4302_v20  ;;  %v7778_v10 = vld [vmem:[#allocation22_spill] sm:$0xff]  ;;  %v4552_v6 = vld [vmem:[%s4010_s10 + $0x250] sm:$0xff] }
  0x8b   : >> { %v454_v39 = vadd.f32 %v440_v37, %v4304_v18  ;;  %v455_v22 = vadd.f32 %v441_v27, %v7774_v40  ;;  %v456_v63 = vadd.f32 %v442_v41, %v7775_v7  ;;  %v457_v9 = vadd.f32 %v443_v42, %v7776_v16 }
  0x8c   : >> { %v458_v23 = vadd.f32 %v444_v43, %v7777_v8  ;;  %v459_v0 = vadd.f32 %v445_v44, %v7778_v10  ;;  %v463_v19 = vmul.f32 %v4436_v36, %v4464_v59  ;;  %v464_v11 = vmul.f32 %v4447_v25, %v4464_v59 }
  0x8d   : >> { %v465_v12 = vmul.f32 %v4450_v24, %v4464_v59  ;;  %v466_v20 = vmul.f32 %v4453_v56, %v4464_v59  ;;  %v467_v18 = vmul.f32 %v4458_v58, %v4464_v59  ;;  %v468_v3 = vmul.f32 %v4470_v60, %v4464_v59 }
  0x8e   : >> { %v469_v4 = vmul.f32 %v4473_v61, %v4464_v59  ;;  %v470_v5 = vmul.f32 %v4476_v62, %v4464_v59  ;;  %v471_v37 = vmul.f32 %v4487_v1, %v4464_v59  ;;  %v472_v27 = vmul.f32 %v4490_v13, %v4464_v59 }
  0x8f   : >> { %v473_v41 = vmul.f32 %v4493_v2, %v4464_v59  ;;  %v474_v42 = vmul.f32 %v4504_v15, %v4464_v59  ;;  %v475_v43 = vmul.f32 %v4507_v29, %v4464_v59  ;;  %v476_v44 = vmul.f32 %v4552_v6, %v4464_v59 }
  0x90   : >> { %v477_v40 = vadd.f32 %v463_v19, %v446_v48  ;;  %v478_v7 = vadd.f32 %v464_v11, %v447_v49  ;;  %v479_v16 = vadd.f32 %v465_v12, %v448_v50  ;;  %v480_v8 = vadd.f32 %v466_v20, %v449_v28 }
  0x91   : >> { %v481_v10 = vadd.f32 %v467_v18, %v450_v31  ;;  %v482_v57 = vadd.f32 %v468_v3, %v451_v32  ;;  %v483_v26 = vadd.f32 %v469_v4, %v452_v33  ;;  %v484_v34 = vadd.f32 %v470_v5, %v453_v38  ;;  %v4583_v33 = vld [vmem:[%s4010_s10 + $0x258] sm:$0xff] }
  0x92   : >> { %v485_v55 = vadd.f32 %v471_v37, %v454_v39  ;;  %v486_v35 = vadd.f32 %v472_v27, %v455_v22  ;;  %v487_v14 = vadd.f32 %v473_v41, %v456_v63  ;;  %v488_v30 = vadd.f32 %v474_v42, %v457_v9 }
  0x93   : >> { %v489_v17 = vadd.f32 %v475_v43, %v458_v23  ;;  %v490_v53 = vadd.f32 %v476_v44, %v459_v0  ;;  %v494_v52 = vmul.f32 %v4447_v25, %v4467_v21  ;;  %v495_v48 = vmul.f32 %v4450_v24, %v4467_v21  ;;  %v7790_v44 = vld [vmem:[#allocation15_spill] sm:$0xff] }
  0x94   : >> { %v496_v49 = vmul.f32 %v4453_v56, %v4467_v21  ;;  %v497_v50 = vmul.f32 %v4458_v58, %v4467_v21  ;;  %v498_v28 = vmul.f32 %v4470_v60, %v4467_v21  ;;  %v499_v22 = vmul.f32 %v4473_v61, %v4467_v21 }
  0x95   : >> { %v500_v31 = vmul.f32 %v4476_v62, %v4467_v21  ;;  %v501_v32 = vmul.f32 %v4487_v1, %v4467_v21  ;;  %v502_v38 = vmul.f32 %v4490_v13, %v4467_v21  ;;  %v503_v39 = vmul.f32 %v4493_v2, %v4467_v21 }
  0x96   : >> { %v504_v63 = vmul.f32 %v4504_v15, %v4467_v21  ;;  %v505_v9 = vmul.f32 %v4507_v29, %v4467_v21  ;;  %v506_v23 = vmul.f32 %v4552_v6, %v4467_v21  ;;  %v507_v0 = vmul.f32 %v4583_v33, %v4467_v21 }
  0x97   : >> { %v4597_v19 = vadd.f32 %v494_v52, %v477_v40  ;;  %v4599_v11 = vadd.f32 %v495_v48, %v478_v7  ;;  %v4601_v12 = vadd.f32 %v496_v49, %v479_v16  ;;  %v4603_v20 = vadd.f32 %v497_v50, %v480_v8 }
  0x98   : >> { %v4605_v18 = vadd.f32 %v498_v28, %v481_v10  ;;  %v4607_v3 = vadd.f32 %v499_v22, %v482_v57  ;;  %v4609_v4 = vadd.f32 %v500_v31, %v483_v26  ;;  %v4611_v5 = vadd.f32 %v501_v32, %v484_v34  ;;  %v7791_v28 = vld [vmem:[#allocation23_spill] sm:$0xff]  ;;  %v7792_v31 = vld [vmem:[#allocation24_spill] sm:$0xff] }
  0x99   : >> { %7779 = vst [vmem:[#allocation18_spill] sm:$0xff] %v4603_v20  ;;  %v4613_v37 = vadd.f32 %v502_v38, %v485_v55  ;;  %v4615_v27 = vadd.f32 %v503_v39, %v486_v35  ;;  %v4617_v52 = vadd.f32 %v504_v63, %v487_v14  ;;  %v4619_v41 = vadd.f32 %v505_v9, %v488_v30  ;;  %v7793_v38 = vld [vmem:[#allocation25_spill] sm:$0xff]  ;;  %v7794_v63 = vld [vmem:[#allocation26_spill] sm:$0xff] }
  0x9a   : >> { %7780 = vst [vmem:[#allocation19_spill] sm:$0xff] %v4605_v18  ;;  %7781 = vst [vmem:[#allocation20_spill] sm:$0xff] %v4607_v3  ;;  %v4621_v42 = vadd.f32 %v506_v23, %v489_v17  ;;  %v4623_v43 = vadd.f32 %v507_v0, %v490_v53  ;;  %v522_v57 = vmul.f32 %v4433_v54, %v7790_v44  ;;  %v7795_v23 = vld [vmem:[#allocation27_spill] sm:$0xff]  ;;  %v7802_v18 = vld [vmem:[#allocation17_spill] sm:$0xff] }
  0x9b   : >> { %7782 = vst [vmem:[#allocation21_spill] sm:$0xff] %v4609_v4  ;;  %7783 = vst [vmem:[#allocation22_spill] sm:$0xff] %v4611_v5  ;;  %v523_v26 = vmul.f32 %v4436_v36, %v7790_v44  ;;  %v524_v55 = vmul.f32 %v4447_v25, %v7790_v44  ;;  %v525_v35 = vmul.f32 %v4450_v24, %v7790_v44 }
  0x9c   : >> { %7784 = vst [vmem:[#allocation34_spill] sm:$0xff] %v4613_v37  ;;  %7785 = vst [vmem:[#allocation35_spill] sm:$0xff] %v4615_v27  ;;  %v526_v30 = vmul.f32 %v4453_v56, %v7790_v44  ;;  %v527_v17 = vmul.f32 %v4458_v58, %v7790_v44  ;;  %v528_v53 = vmul.f32 %v4470_v60, %v7790_v44 }
  0x9d   : >> { %7786 = vst [vmem:[#allocation36_spill] sm:$0xff] %v4617_v52  ;;  %7787 = vst [vmem:[#allocation37_spill] sm:$0xff] %v4619_v41  ;;  %v529_v14 = vmul.f32 %v4473_v61, %v7790_v44  ;;  %v530_v54 = vmul.f32 %v4476_v62, %v7790_v44  ;;  %v531_v34 = vmul.f32 %v4487_v1, %v7790_v44 }
  0x9e   : >> { %7788 = vst [vmem:[#allocation38_spill] sm:$0xff] %v4621_v42  ;;  %7789 = vst [vmem:[#allocation39_spill] sm:$0xff] %v4623_v43  ;;  %v532_v40 = vmul.f32 %v4490_v13, %v7790_v44  ;;  %v533_v7 = vmul.f32 %v4493_v2, %v7790_v44  ;;  %v534_v16 = vmul.f32 %v4504_v15, %v7790_v44  ;;  %v7796_v43 = vld [vmem:[#allocation28_spill] sm:$0xff]  ;;  %v7797_v42 = vld [vmem:[#allocation29_spill] sm:$0xff] }
  0x9f   : >> { %v535_v8 = vmul.f32 %v4507_v29, %v7790_v44  ;;  %v536_v10 = vadd.f32 %v522_v57, %v4414_v45  ;;  %v537_v48 = vadd.f32 %v523_v26, %v4416_v46  ;;  %v538_v49 = vadd.f32 %v524_v55, %v4418_v47  ;;  %v7798_v57 = vld [vmem:[#allocation30_spill] sm:$0xff]  ;;  %v7799_v26 = vld [vmem:[#allocation31_spill] sm:$0xff]  ;;  %v7800_v55 = vld [vmem:[#allocation32_spill] sm:$0xff] }
  0xa0   : >> { %v539_v50 = vadd.f32 %v525_v35, %v4420_v51  ;;  %v540_v22 = vadd.f32 %v526_v30, %v7791_v28  ;;  %v541_v32 = vadd.f32 %v527_v17, %v7792_v31  ;;  %v542_v39 = vadd.f32 %v528_v53, %v7793_v38  ;;  %v7801_v35 = vld [vmem:[#allocation16_spill] sm:$0xff] }
  0xa1   : >> { %v543_v9 = vadd.f32 %v529_v14, %v7794_v63  ;;  %v544_v0 = vadd.f32 %v530_v54, %v7795_v23  ;;  %v545_v44 = vadd.f32 %v531_v34, %v7796_v43  ;;  %v546_v45 = vadd.f32 %v532_v40, %v7797_v42 }
  0xa2   : >> { %v547_v46 = vadd.f32 %v533_v7, %v7798_v57  ;;  %v548_v47 = vadd.f32 %v534_v16, %v7799_v26  ;;  %v549_v51 = vadd.f32 %v535_v8, %v7800_v55  ;;  %v550_v30 = vmul.f32 %v4436_v36, %v7801_v35 }
  0xa3   : >> { %v551_v17 = vmul.f32 %v4447_v25, %v7801_v35  ;;  %v552_v53 = vmul.f32 %v4450_v24, %v7801_v35  ;;  %v553_v43 = vmul.f32 %v4453_v56, %v7801_v35  ;;  %v554_v42 = vmul.f32 %v4458_v58, %v7801_v35 }
  0xa4   : >> { %v555_v14 = vmul.f32 %v4470_v60, %v7801_v35  ;;  %v556_v54 = vmul.f32 %v4473_v61, %v7801_v35  ;;  %v557_v36 = vmul.f32 %v4476_v62, %v7801_v35  ;;  %v558_v34 = vmul.f32 %v4487_v1, %v7801_v35 }
  0xa5   : >> { %v559_v40 = vmul.f32 %v4490_v13, %v7801_v35  ;;  %v560_v7 = vmul.f32 %v4493_v2, %v7801_v35  ;;  %v561_v16 = vmul.f32 %v4504_v15, %v7801_v35  ;;  %v562_v8 = vmul.f32 %v4507_v29, %v7801_v35 }
  0xa6   : >> { %v563_v28 = vmul.f32 %v4552_v6, %v7801_v35  ;;  %v564_v31 = vadd.f32 %v550_v30, %v536_v10  ;;  %v565_v38 = vadd.f32 %v551_v17, %v537_v48  ;;  %v566_v63 = vadd.f32 %v552_v53, %v538_v49  ;;  %v4741_v35 = vld [vmem:[%s4010_s10 + $0x308] sm:$0xff]  ;;  %v4744_v30 = vld [vmem:[%s4010_s10 + $0x310] sm:$0xff] }
  0xa7   : >> { %v567_v23 = vadd.f32 %v553_v43, %v539_v50  ;;  %v568_v57 = vadd.f32 %v554_v42, %v540_v22  ;;  %v569_v26 = vadd.f32 %v555_v14, %v541_v32  ;;  %v570_v55 = vadd.f32 %v556_v54, %v542_v39  ;;  %v3103_v39 = vld [vmem:[%s4010_s10 + $0x2d0] sm:$0xff]  ;;  %v4747_v14 = vld [vmem:[%s4010_s10 + $0x318] sm:$0xff]  ;;  %v4750_v54 = vld [vmem:[%s4010_s10 + $0x320] sm:$0xff] }
  0xa8   : >> { %v571_v41 = vadd.f32 %v557_v36, %v543_v9  ;;  %v572_v52 = vadd.f32 %v558_v34, %v544_v0  ;;  %v573_v27 = vadd.f32 %v559_v40, %v545_v44  ;;  %v574_v37 = vadd.f32 %v560_v7, %v546_v45  ;;  %v4726_v9 = vld [vmem:[%s4010_s10 + $0x2e0] sm:$0xff]  ;;  %v4729_v45 = vld [vmem:[%s4010_s10 + $0x2e8] sm:$0xff]  ;;  %v4756_v34 = vld [vmem:[%s4010_s10 + $0x330] sm:$0xff] }
  0xa9   : >> { %v575_v5 = vadd.f32 %v561_v16, %v547_v46  ;;  %v576_v4 = vadd.f32 %v562_v8, %v548_v47  ;;  %v577_v3 = vadd.f32 %v563_v28, %v549_v51  ;;  %v578_v20 = vmul.f32 %v4447_v25, %v7802_v18  ;;  %v4738_v51 = vld [vmem:[%s4010_s10 + $0x300] sm:$0xff]  ;;  %v4753_v36 = vld [vmem:[%s4010_s10 + $0x328] sm:$0xff] }
  0xaa   : >> { %v579_v10 = vmul.f32 %v4450_v24, %v7802_v18  ;;  %v580_v48 = vmul.f32 %v4453_v56, %v7802_v18  ;;  %v581_v49 = vmul.f32 %v4458_v58, %v7802_v18  ;;  %v582_v50 = vmul.f32 %v4470_v60, %v7802_v18 }
  0xab   : >> { %v583_v22 = vmul.f32 %v4473_v61, %v7802_v18  ;;  %v584_v25 = vmul.f32 %v4476_v62, %v7802_v18  ;;  %v585_v24 = vmul.f32 %v4487_v1, %v7802_v18  ;;  %v586_v56 = vmul.f32 %v4490_v13, %v7802_v18 }
  0xac   : >> { %v587_v58 = vmul.f32 %v4493_v2, %v7802_v18  ;;  %v588_v60 = vmul.f32 %v4504_v15, %v7802_v18  ;;  %v589_v61 = vmul.f32 %v4507_v29, %v7802_v18  ;;  %v590_v62 = vmul.f32 %v4552_v6, %v7802_v18  ;;  %v3104_v2 = vld [vmem:[%s4010_s10 + $0x2d8] sm:$0xff]  ;;  %v4732_v6 = vld [vmem:[%s4010_s10 + $0x2f0] sm:$0xff] }
  0xad   : >> { %v591_v1 = vmul.f32 %v4583_v33, %v7802_v18  ;;  %v592_v32 = vadd.f32 %v578_v20, %v564_v31  ;;  %v593_v13 = vadd.f32 %v579_v10, %v565_v38  ;;  %v594_v0 = vadd.f32 %v580_v48, %v566_v63  ;;  %v4735_v33 = vld [vmem:[%s4010_s10 + $0x2f8] sm:$0xff] }
  0xae   : >> { %v595_v15 = vadd.f32 %v581_v49, %v567_v23  ;;  %v596_v44 = vadd.f32 %v582_v50, %v568_v57  ;;  %v597_v29 = vadd.f32 %v583_v22, %v569_v26  ;;  %v598_v20 = vadd.f32 %v584_v25, %v570_v55 }
  0xaf   : >> { %v599_v18 = vadd.f32 %v585_v24, %v571_v41  ;;  %v600_v46 = vadd.f32 %v586_v56, %v572_v52  ;;  %v601_v47 = vadd.f32 %v587_v58, %v573_v27  ;;  %v602_v17 = vadd.f32 %v588_v60, %v574_v37  ;;  %v4759_v52 = vld [vmem:[%s4010_s10 + $0x338] sm:$0xff]  ;;  %v7803_v27 = vld [vmem:[#allocation33_spill] sm:$0xff] }
  0xb0   : >> { %v603_v53 = vadd.f32 %v589_v61, %v575_v5  ;;  %v604_v43 = vadd.f32 %v590_v62, %v576_v4  ;;  %v605_v42 = vadd.f32 %v591_v1, %v577_v3  ;;  %v625_v41 = vmul.f32 %v3103_v39, %v7803_v27  ;;  %v3117_v62 = vld [vmem:[%s4010_s10 + $0x340] sm:$0xff] }
  0xb1   : >> { %v626_v40 = vmul.f32 %v3104_v2, %v7803_v27  ;;  %v627_v37 = vmul.f32 %v4726_v9, %v7803_v27  ;;  %v628_v3 = vmul.f32 %v4729_v45, %v7803_v27  ;;  %v629_v4 = vmul.f32 %v4732_v6, %v7803_v27 }
  0xb2   : >> { %v630_v5 = vmul.f32 %v4735_v33, %v7803_v27  ;;  %v631_v7 = vmul.f32 %v4738_v51, %v7803_v27  ;;  %v632_v16 = vmul.f32 %v4741_v35, %v7803_v27  ;;  %v633_v8 = vmul.f32 %v4744_v30, %v7803_v27 }
  0xb3   : >> { %v634_v28 = vmul.f32 %v4747_v14, %v7803_v27  ;;  %v635_v31 = vmul.f32 %v4750_v54, %v7803_v27  ;;  %v636_v38 = vmul.f32 %v4753_v36, %v7803_v27  ;;  %v637_v63 = vmul.f32 %v4756_v34, %v7803_v27 }
  0xb4   : >> { %v638_v23 = vmul.f32 %v4759_v52, %v7803_v27  ;;  %v639_v57 = vadd.f32 %v625_v41, %v592_v32  ;;  %v640_v26 = vadd.f32 %v626_v40, %v593_v13  ;;  %v641_v55 = vadd.f32 %v627_v37, %v594_v0 }
  0xb5   : >> { %v642_v10 = vadd.f32 %v628_v3, %v595_v15  ;;  %v643_v48 = vadd.f32 %v629_v4, %v596_v44  ;;  %v644_v49 = vadd.f32 %v630_v5, %v597_v29  ;;  %v645_v50 = vadd.f32 %v631_v7, %v598_v20 }
  0xb6   : >> { %v646_v22 = vadd.f32 %v632_v16, %v599_v18  ;;  %v647_v25 = vadd.f32 %v633_v8, %v600_v46  ;;  %v648_v24 = vadd.f32 %v634_v28, %v601_v47  ;;  %v649_v56 = vadd.f32 %v635_v31, %v602_v17  ;;  %v3118_v31 = vld [vmem:[%s4010_s10 + $0x348] sm:$0xff] }
  0xb7   : >> { %v650_v58 = vadd.f32 %v636_v38, %v603_v53  ;;  %v651_v60 = vadd.f32 %v637_v63, %v604_v43  ;;  %v652_v61 = vadd.f32 %v638_v23, %v605_v42  ;;  %v653_v1 = vmul.f32 %v3104_v2, %v4464_v59 }
  0xb8   : >> { %v654_v39 = vmul.f32 %v4726_v9, %v4464_v59  ;;  %v655_v32 = vmul.f32 %v4729_v45, %v4464_v59  ;;  %v656_v13 = vmul.f32 %v4732_v6, %v4464_v59  ;;  %v657_v0 = vmul.f32 %v4735_v33, %v4464_v59 }
  0xb9   : >> { %v658_v15 = vmul.f32 %v4738_v51, %v4464_v59  ;;  %v659_v44 = vmul.f32 %v4741_v35, %v4464_v59  ;;  %v660_v2 = vmul.f32 %v4744_v30, %v4464_v59  ;;  %v661_v29 = vmul.f32 %v4747_v14, %v4464_v59 }
  0xba   : >> { %v662_v20 = vmul.f32 %v4750_v54, %v4464_v59  ;;  %v663_v18 = vmul.f32 %v4753_v36, %v4464_v59  ;;  %v664_v46 = vmul.f32 %v4756_v34, %v4464_v59  ;;  %v665_v47 = vmul.f32 %v4759_v52, %v4464_v59 }
  0xbb   : >> { %v666_v17 = vmul.f32 %v3117_v62, %v4464_v59  ;;  %v667_v53 = vadd.f32 %v653_v1, %v639_v57  ;;  %v668_v43 = vadd.f32 %v654_v39, %v640_v26  ;;  %v669_v42 = vadd.f32 %v655_v32, %v641_v55  ;;  %v7805_v39 = vld [vmem:[#allocation19_spill] sm:$0xff] }
  0xbc   : >> { %v670_v27 = vadd.f32 %v656_v13, %v642_v10  ;;  %v671_v41 = vadd.f32 %v657_v0, %v643_v48  ;;  %v672_v40 = vadd.f32 %v658_v15, %v644_v49  ;;  %v673_v37 = vadd.f32 %v659_v44, %v645_v50  ;;  %v7806_v13 = vld [vmem:[#allocation20_spill] sm:$0xff]  ;;  %v7807_v15 = vld [vmem:[#allocation21_spill] sm:$0xff] }
  0xbd   : >> { %v674_v3 = vadd.f32 %v660_v2, %v646_v22  ;;  %v675_v4 = vadd.f32 %v661_v29, %v647_v25  ;;  %v676_v5 = vadd.f32 %v662_v20, %v648_v24  ;;  %v677_v7 = vadd.f32 %v663_v18, %v649_v56  ;;  %v7808_v2 = vld [vmem:[#allocation22_spill] sm:$0xff] }
  0xbe   : >> { %v678_v16 = vadd.f32 %v664_v46, %v650_v58  ;;  %v679_v8 = vadd.f32 %v665_v47, %v651_v60  ;;  %v680_v28 = vadd.f32 %v666_v17, %v652_v61  ;;  %v681_v59 = vmul.f32 %v4726_v9, %v4467_v21  ;;  %v7809_v20 = vld [vmem:[#allocation34_spill] sm:$0xff]  ;;  %v7810_v46 = vld [vmem:[#allocation35_spill] sm:$0xff]  ;;  %v7811_v47 = vld [vmem:[#allocation36_spill] sm:$0xff] }
  0xbf   : >> { %v682_v38 = vmul.f32 %v4729_v45, %v4467_v21  ;;  %v683_v63 = vmul.f32 %v4732_v6, %v4467_v21  ;;  %v684_v23 = vmul.f32 %v4735_v33, %v4467_v21  ;;  %v685_v57 = vmul.f32 %v4738_v51, %v4467_v21  ;;  %v7812_v17 = vld [vmem:[#allocation37_spill] sm:$0xff] }
  0xc0   : >> { %v686_v26 = vmul.f32 %v4741_v35, %v4467_v21  ;;  %v687_v55 = vmul.f32 %v4744_v30, %v4467_v21  ;;  %v688_v9 = vmul.f32 %v4747_v14, %v4467_v21  ;;  %v689_v45 = vmul.f32 %v4750_v54, %v4467_v21 }
  0xc1   : >> { %v690_v6 = vmul.f32 %v4753_v36, %v4467_v21  ;;  %v691_v33 = vmul.f32 %v4756_v34, %v4467_v21  ;;  %v692_v51 = vmul.f32 %v4759_v52, %v4467_v21  ;;  %v693_v35 = vmul.f32 %v3117_v62, %v4467_v21  ;;  %v7804_v62 = vld [vmem:[#allocation18_spill] sm:$0xff] }
  0xc2   : >> { %v694_v30 = vmul.f32 %v3118_v31, %v4467_v21  ;;  %v695_v14 = vadd.f32 %v681_v59, %v667_v53  ;;  %v696_v10 = vadd.f32 %v682_v38, %v668_v43  ;;  %v697_v48 = vadd.f32 %v683_v63, %v669_v42  ;;  %v7813_v53 = vld [vmem:[#allocation38_spill] sm:$0xff]  ;;  %v7814_v42 = vld [vmem:[#allocation39_spill] sm:$0xff] }
  0xc3   : >> { %v698_v54 = vadd.f32 %v684_v23, %v670_v27  ;;  %v699_v49 = vadd.f32 %v685_v57, %v671_v41  ;;  %v700_v36 = vadd.f32 %v686_v26, %v672_v40  ;;  %v701_v50 = vadd.f32 %v687_v55, %v673_v37 }
  0xc4   : >> { %v702_v22 = vadd.f32 %v688_v9, %v674_v3  ;;  %v703_v34 = vadd.f32 %v689_v45, %v675_v4  ;;  %v704_v25 = vadd.f32 %v690_v6, %v676_v5  ;;  %v705_v24 = vadd.f32 %v691_v33, %v677_v7  ;;  %v3125_v9 = vld [vmem:[%s4010_s10 + $0x70] sm:$0xff] }
  0xc5   : >> { %v706_v52 = vadd.f32 %v692_v51, %v678_v16  ;;  %v707_v56 = vadd.f32 %v693_v35, %v679_v8  ;;  %v708_v58 = vadd.f32 %v694_v30, %v680_v28  ;;  %v709_v60 = vmax.f32 %v4597_v19, %v695_v14  ;;  %v3126_v35 = vld [vmem:[%s4010_s10 + $0x78] sm:$0xff]  ;;  %v4884_v30 = vld [vmem:[%s4010_s10 + $0x80] sm:$0xff] }
  0xc6   : >> { %v710_v21 = vmax.f32 %v4599_v11, %v696_v10  ;;  %v711_v61 = vmax.f32 %v4601_v12, %v697_v48  ;;  %v712_v1 = vmax.f32 %v7804_v62, %v698_v54  ;;  %v713_v32 = vmax.f32 %v7805_v39, %v699_v49  ;;  %v4887_v49 = vld [vmem:[%s4010_s10 + $0x88] sm:$0xff]  ;;  %v4902_v62 = vld [vmem:[%s4010_s10 + $0xb0] sm:$0xff] }
  0xc7   : >> { %v714_v0 = vmax.f32 %v7806_v13, %v700_v36  ;;  %v715_v44 = vmax.f32 %v7807_v15, %v701_v50  ;;  %v716_v29 = vmax.f32 %v7808_v2, %v702_v22  ;;  %v717_v18 = vmax.f32 %v7809_v20, %v703_v34  ;;  %v4890_v36 = vld [vmem:[%s4010_s10 + $0x90] sm:$0xff]  ;;  %v4911_v15 = vld [vmem:[%s4010_s10 + $0xc8] sm:$0xff] }
  0xc8   : >> { %v718_v19 = vmax.f32 %v7810_v46, %v704_v25  ;;  %v719_v11 = vmax.f32 %v7811_v47, %v705_v24  ;;  %v720_v12 = vmax.f32 %v7812_v17, %v706_v52  ;;  %v721_v43 = vmax.f32 %v7813_v53, %v707_v56  ;;  %v4893_v24 = vld [vmem:[%s4010_s10 + $0x98] sm:$0xff]  ;;  %v4896_v52 = vld [vmem:[%s4010_s10 + $0xa0] sm:$0xff] }
  0xc9   : >> { %v722_v27 = vmax.f32 %v7814_v42, %v708_v58  ;;  %v724_v41 = vstv %s4832_s20  ;;  %v4865_v40 = vstv %s4843_s21 }
  0xca   : >> { %v725_v37 = vadd.f32 %v724_v41, %v709_v60  ;;  %v726_v3 = vadd.f32 %v724_v41, %v710_v21  ;;  %v727_v4 = vadd.f32 %v724_v41, %v711_v61  ;;  %v728_v5 = vadd.f32 %v724_v41, %v712_v1  ;;  %v4899_v61 = vld [vmem:[%s4010_s10 + $0xa8] sm:$0xff]  ;;  %v4905_v1 = vld [vmem:[%s4010_s10 + $0xb8] sm:$0xff] }
  0xcb   : >> { %v729_v7 = vadd.f32 %v724_v41, %v713_v32  ;;  %v730_v16 = vadd.f32 %v724_v41, %v714_v0  ;;  %v731_v8 = vadd.f32 %v724_v41, %v715_v44  ;;  %v732_v28 = vadd.f32 %v724_v41, %v716_v29  ;;  %v4908_v0 = vld [vmem:[%s4010_s10 + $0xc0] sm:$0xff]  ;;  %v4914_v44 = vld [vmem:[%s4010_s10 + $0xd0] sm:$0xff]  ;;  %v3138_v29 = vld [vmem:[%s4010_s10 + $0xd8] sm:$0xff] }
  0xcc   : >> { %v733_v31 = vadd.f32 %v724_v41, %v717_v18  ;;  %v734_v59 = vadd.f32 %v724_v41, %v718_v19  ;;  %v735_v38 = vadd.f32 %v724_v41, %v719_v11  ;;  %v736_v63 = vadd.f32 %v724_v41, %v720_v12 }
  0xcd   : >> { %v737_v23 = vadd.f32 %v724_v41, %v721_v43  ;;  %v738_v57 = vadd.f32 %v724_v41, %v722_v27  ;;  %v739_v26 = vmax.f32 %v725_v37, 0.0  ;;  %v740_v55 = vmax.f32 %v726_v3, 0.0 }
  0xce   : >> { %v741_v45 = vmax.f32 %v727_v4, 0.0  ;;  %v742_v6 = vmax.f32 %v728_v5, 0.0  ;;  %v743_v33 = vmax.f32 %v729_v7, 0.0  ;;  %v744_v51 = vmax.f32 %v730_v16, 0.0  ;;  %v3139_v5 = vld [vmem:[%s4010_s10 + $0xe0] sm:$0xff] }
  0xcf   : >> { %v745_v14 = vmax.f32 %v731_v8, 0.0  ;;  %v746_v10 = vmax.f32 %v732_v28, 0.0  ;;  %v747_v48 = vmax.f32 %v733_v31, 0.0  ;;  %v748_v54 = vmax.f32 %v734_v59, 0.0 }
  0xd0   : >> { %v749_v50 = vmax.f32 %v735_v38, 0.0  ;;  %v750_v22 = vmax.f32 %v736_v63, 0.0  ;;  %v751_v34 = vmax.f32 %v737_v23, 0.0  ;;  %v752_v25 = vmax.f32 %v738_v57, 0.0 }
  0xd1   : >> { %v753_v56 = vmax.f32 %v739_v26, %v740_v55  ;;  %v759_v58 = vmax.f32 %v741_v45, %v742_v6  ;;  %v764_v60 = vmax.f32 %v743_v33, %v744_v51  ;;  %v769_v21 = vmax.f32 %v745_v14, %v746_v10 }
  0xd2   : >> { %v774_v39 = vmax.f32 %v747_v48, %v748_v54  ;;  %v779_v32 = vmax.f32 %v749_v50, %v750_v22  ;;  %v784_v13 = vmax.f32 %v751_v34, %v752_v25  ;;  %v809_v2 = vmul.f32 %v3125_v9, %v4865_v40 }
  0xd3   : >> { %758 = vst [vmem:[%s4918_s29] sm:$0xff] %v753_v56  ;;  %3119 = vst [vmem:[%s4918_s29 + $0x8] sm:$0xff] %v759_v58  ;;  %v810_v20 = vmul.f32 %v3126_v35, %v4865_v40  ;;  %v811_v18 = vmul.f32 %v4884_v30, %v4865_v40  ;;  %v812_v46 = vmul.f32 %v4887_v49, %v4865_v40  ;;  %v4953_v37 = vstv %s4871_s27 }
  0xd4   : >> { %3120 = vst [vmem:[%s4918_s29 + $0x10] sm:$0xff] %v764_v60  ;;  %3121 = vst [vmem:[%s4918_s29 + $0x18] sm:$0xff] %v769_v21  ;;  %v813_v19 = vmul.f32 %v4890_v36, %v4865_v40  ;;  %v814_v47 = vmul.f32 %v4893_v24, %v4865_v40  ;;  %v815_v11 = vmul.f32 %v4896_v52, %v4865_v40  ;;  %v4956_v3 = vstv %s4875_s28  ;;  %v3140_v60 = vld [vmem:[%s4010_s10 + $0xe8] sm:$0xff] }
  0xd5   : >> { %3122 = vst [vmem:[%s4918_s29 + $0x20] sm:$0xff] %v774_v39  ;;  %3123 = vst [vmem:[%s4918_s29 + $0x28] sm:$0xff] %v779_v32  ;;  %v816_v17 = vmul.f32 %v4899_v61, %v4865_v40  ;;  %v817_v12 = vmul.f32 %v4902_v62, %v4865_v40  ;;  %v818_v53 = vmul.f32 %v4905_v1, %v4865_v40  ;;  %v4959_v4 = vstv %s4880_s30 }
  0xd6   : >> { %3124 = vst [vmem:[%s4918_s29 + $0x30] sm:$0xff] %v784_v13  ;;  %v819_v43 = vmul.f32 %v4908_v0, %v4865_v40  ;;  %v820_v42 = vmul.f32 %v4911_v15, %v4865_v40  ;;  %v821_v27 = vmul.f32 %v4914_v44, %v4865_v40  ;;  %v822_v41 = vmul.f32 %v3138_v29, %v4865_v40 }
  0xd7   : >> { %7815 = vst [vmem:[#allocation15_spill] sm:$0xff] %v4959_v4  ;;  %v839_v7 = vmul.f32 %v3126_v35, %v4953_v37  ;;  %v840_v16 = vmul.f32 %v4884_v30, %v4953_v37  ;;  %v841_v8 = vmul.f32 %v4887_v49, %v4953_v37  ;;  %v842_v28 = vmul.f32 %v4890_v36, %v4953_v37 }
  0xd8   : >> { %v843_v31 = vmul.f32 %v4893_v24, %v4953_v37  ;;  %v844_v59 = vmul.f32 %v4896_v52, %v4953_v37  ;;  %v845_v38 = vmul.f32 %v4899_v61, %v4953_v37  ;;  %v846_v63 = vmul.f32 %v4902_v62, %v4953_v37 }
  0xd9   : >> { %v847_v23 = vmul.f32 %v4905_v1, %v4953_v37  ;;  %v848_v57 = vmul.f32 %v4908_v0, %v4953_v37  ;;  %v849_v26 = vmul.f32 %v4911_v15, %v4953_v37  ;;  %v850_v55 = vmul.f32 %v4914_v44, %v4953_v37 }
  0xda   : >> { %v851_v9 = vmul.f32 %v3138_v29, %v4953_v37  ;;  %v852_v45 = vmul.f32 %v3139_v5, %v4953_v37  ;;  %v853_v6 = vadd.f32 %v839_v7, %v809_v2  ;;  %v854_v33 = vadd.f32 %v840_v16, %v810_v20  ;;  %v5025_v7 = vld [vmem:[%s4010_s10 + $0x178] sm:$0xff]  ;;  %v5028_v16 = vld [vmem:[%s4010_s10 + $0x180] sm:$0xff] }
  0xdb   : >> { %v855_v51 = vadd.f32 %v841_v8, %v811_v18  ;;  %v856_v35 = vadd.f32 %v842_v28, %v812_v46  ;;  %v857_v14 = vadd.f32 %v843_v31, %v813_v19  ;;  %v858_v10 = vadd.f32 %v844_v59, %v814_v47  ;;  %v5031_v8 = vld [vmem:[%s4010_s10 + $0x188] sm:$0xff]  ;;  %v5038_v28 = vld [vmem:[%s4010_s10 + $0x190] sm:$0xff]  ;;  %v5041_v31 = vld [vmem:[%s4010_s10 + $0x198] sm:$0xff] }
  0xdc   : >> { %v859_v48 = vadd.f32 %v845_v38, %v815_v11  ;;  %v860_v54 = vadd.f32 %v846_v63, %v816_v17  ;;  %v861_v50 = vadd.f32 %v847_v23, %v817_v12  ;;  %v862_v22 = vadd.f32 %v848_v57, %v818_v53  ;;  %v3143_v12 = vld [vmem:[%s4010_s10 + $0x160] sm:$0xff]  ;;  %v5015_v53 = vld [vmem:[%s4010_s10 + $0x168] sm:$0xff] }
  0xdd   : >> { %v863_v34 = vadd.f32 %v849_v26, %v819_v43  ;;  %v864_v25 = vadd.f32 %v850_v55, %v820_v42  ;;  %v865_v56 = vadd.f32 %v851_v9, %v821_v27  ;;  %v866_v58 = vadd.f32 %v852_v45, %v822_v41  ;;  %v5018_v43 = vld [vmem:[%s4010_s10 + $0x170] sm:$0xff]  ;;  %v5044_v59 = vld [vmem:[%s4010_s10 + $0x1a0] sm:$0xff]  ;;  %v5054_v26 = vld [vmem:[%s4010_s10 + $0x1a8] sm:$0xff] }
  0xde   : >> { %v869_v21 = vmul.f32 %v4884_v30, %v4956_v3  ;;  %v870_v39 = vmul.f32 %v4887_v49, %v4956_v3  ;;  %v871_v32 = vmul.f32 %v4890_v36, %v4956_v3  ;;  %v872_v13 = vmul.f32 %v4893_v24, %v4956_v3  ;;  %v5057_v55 = vld [vmem:[%s4010_s10 + $0x1b0] sm:$0xff]  ;;  %v5060_v9 = vld [vmem:[%s4010_s10 + $0x1b8] sm:$0xff] }
  0xdf   : >> { %v873_v2 = vmul.f32 %v4896_v52, %v4956_v3  ;;  %v874_v20 = vmul.f32 %v4899_v61, %v4956_v3  ;;  %v875_v18 = vmul.f32 %v4902_v62, %v4956_v3  ;;  %v876_v30 = vmul.f32 %v4905_v1, %v4956_v3 }
  0xe0   : >> { %v877_v49 = vmul.f32 %v4908_v0, %v4956_v3  ;;  %v878_v36 = vmul.f32 %v4911_v15, %v4956_v3  ;;  %v879_v24 = vmul.f32 %v4914_v44, %v4956_v3  ;;  %v880_v52 = vmul.f32 %v3138_v29, %v4956_v3 }
  0xe1   : >> { %v881_v61 = vmul.f32 %v3139_v5, %v4956_v3  ;;  %v882_v62 = vmul.f32 %v3140_v60, %v4956_v3  ;;  %v883_v1 = vadd.f32 %v869_v21, %v853_v6  ;;  %v884_v46 = vadd.f32 %v870_v39, %v854_v33 }
  0xe2   : >> { %v885_v19 = vadd.f32 %v871_v32, %v855_v51  ;;  %v886_v0 = vadd.f32 %v872_v13, %v856_v35  ;;  %v887_v47 = vadd.f32 %v873_v2, %v857_v14  ;;  %v888_v15 = vadd.f32 %v874_v20, %v858_v10  ;;  %v5071_v35 = vld [vmem:[%s4010_s10 + $0x1c0] sm:$0xff]  ;;  %v5074_v14 = vld [vmem:[%s4010_s10 + $0x1c8] sm:$0xff] }
  0xe3   : >> { %v889_v11 = vadd.f32 %v875_v18, %v859_v48  ;;  %v890_v44 = vadd.f32 %v876_v30, %v860_v54  ;;  %v891_v29 = vadd.f32 %v877_v49, %v861_v50  ;;  %v892_v17 = vadd.f32 %v878_v36, %v862_v22 }
  0xe4   : >> { %v893_v42 = vadd.f32 %v879_v24, %v863_v34  ;;  %v894_v27 = vadd.f32 %v880_v52, %v864_v25  ;;  %v895_v41 = vadd.f32 %v881_v61, %v865_v56  ;;  %v896_v5 = vadd.f32 %v882_v62, %v866_v58 }
  0xe5   : >> { %v917_v38 = vmul.f32 %v3143_v12, %v4959_v4  ;;  %v918_v63 = vmul.f32 %v5015_v53, %v4959_v4  ;;  %v919_v23 = vmul.f32 %v5018_v43, %v4959_v4  ;;  %v920_v57 = vmul.f32 %v5025_v7, %v4959_v4 }
  0xe6   : >> { %v921_v45 = vmul.f32 %v5028_v16, %v4959_v4  ;;  %v922_v6 = vmul.f32 %v5031_v8, %v4959_v4  ;;  %v923_v33 = vmul.f32 %v5038_v28, %v4959_v4  ;;  %v924_v51 = vmul.f32 %v5041_v31, %v4959_v4 }
  0xe7   : >> { %v925_v10 = vmul.f32 %v5044_v59, %v4959_v4  ;;  %v926_v48 = vmul.f32 %v5054_v26, %v4959_v4  ;;  %v927_v54 = vmul.f32 %v5057_v55, %v4959_v4  ;;  %v928_v50 = vmul.f32 %v5060_v9, %v4959_v4 }
  0xe8   : >> { %v929_v22 = vmul.f32 %v5071_v35, %v4959_v4  ;;  %v930_v34 = vmul.f32 %v5074_v14, %v4959_v4  ;;  %v931_v25 = vadd.f32 %v917_v38, %v883_v1  ;;  %v932_v56 = vadd.f32 %v918_v63, %v884_v46 }
  0xe9   : >> { %v933_v58 = vadd.f32 %v919_v23, %v885_v19  ;;  %v934_v60 = vadd.f32 %v920_v57, %v886_v0  ;;  %v935_v21 = vadd.f32 %v921_v45, %v887_v47  ;;  %v936_v39 = vadd.f32 %v922_v6, %v888_v15 }
  0xea   : >> { %v937_v32 = vadd.f32 %v923_v33, %v889_v11  ;;  %v938_v13 = vadd.f32 %v924_v51, %v890_v44  ;;  %v939_v2 = vadd.f32 %v925_v10, %v891_v29  ;;  %v940_v20 = vadd.f32 %v926_v48, %v892_v17  ;;  %v5118_v29 = vld [vmem:[%s4010_s10 + $0x1d0] sm:$0xff] }
  0xeb   : >> { %v941_v18 = vadd.f32 %v927_v54, %v893_v42  ;;  %v942_v30 = vadd.f32 %v928_v50, %v894_v27  ;;  %v943_v49 = vadd.f32 %v929_v22, %v895_v41  ;;  %v944_v36 = vadd.f32 %v930_v34, %v896_v5 }
  0xec   : >> { %v5089_v24 = vstv %s5022_s8  ;;  %v5092_v52 = vstv %s5035_s9  ;;  %v5095_v61 = vmul.f32 %v3143_v12, %v4865_v40  ;;  %v5099_v62 = vmul.f32 %v5015_v53, %v4865_v40 }
  0xed   : >> { %7816 = vst [vmem:[#allocation23_spill] sm:$0xff] %v5089_v24  ;;  %7817 = vst [vmem:[#allocation24_spill] sm:$0xff] %v5092_v52  ;;  %v947_v1 = vmul.f32 %v5015_v53, %v5089_v24  ;;  %v948_v46 = vmul.f32 %v5018_v43, %v5089_v24  ;;  %v949_v19 = vmul.f32 %v5025_v7, %v5089_v24 }
  0xee   : >> { %v950_v0 = vmul.f32 %v5028_v16, %v5089_v24  ;;  %v951_v47 = vmul.f32 %v5031_v8, %v5089_v24  ;;  %v952_v15 = vmul.f32 %v5038_v28, %v5089_v24  ;;  %v953_v11 = vmul.f32 %v5041_v31, %v5089_v24 }
  0xef   : >> { %v954_v44 = vmul.f32 %v5044_v59, %v5089_v24  ;;  %v955_v17 = vmul.f32 %v5054_v26, %v5089_v24  ;;  %v956_v12 = vmul.f32 %v5057_v55, %v5089_v24  ;;  %v957_v42 = vmul.f32 %v5060_v9, %v5089_v24 }
  0xf0   : >> { %v958_v27 = vmul.f32 %v5071_v35, %v5089_v24  ;;  %v959_v41 = vmul.f32 %v5074_v14, %v5089_v24  ;;  %v960_v5 = vmul.f32 %v5118_v29, %v5089_v24  ;;  %v961_v38 = vadd.f32 %v947_v1, %v931_v25 }
  0xf1   : >> { %v962_v63 = vadd.f32 %v948_v46, %v932_v56  ;;  %v963_v23 = vadd.f32 %v949_v19, %v933_v58  ;;  %v964_v57 = vadd.f32 %v950_v0, %v934_v60  ;;  %v965_v45 = vadd.f32 %v951_v47, %v935_v21 }
  0xf2   : >> { %v966_v6 = vadd.f32 %v952_v15, %v936_v39  ;;  %v967_v33 = vadd.f32 %v953_v11, %v937_v32  ;;  %v968_v51 = vadd.f32 %v954_v44, %v938_v13  ;;  %v969_v10 = vadd.f32 %v955_v17, %v939_v2  ;;  %v5149_v13 = vld [vmem:[%s4010_s10 + $0x1d8] sm:$0xff] }
  0xf3   : >> { %v970_v48 = vadd.f32 %v956_v12, %v940_v20  ;;  %v971_v54 = vadd.f32 %v957_v42, %v941_v18  ;;  %v972_v50 = vadd.f32 %v958_v27, %v942_v30  ;;  %v973_v22 = vadd.f32 %v959_v41, %v943_v49 }
  0xf4   : >> { %v974_v34 = vadd.f32 %v960_v5, %v944_v36  ;;  %v977_v4 = vmul.f32 %v5018_v43, %v5092_v52  ;;  %v978_v25 = vmul.f32 %v5025_v7, %v5092_v52  ;;  %v979_v56 = vmul.f32 %v5028_v16, %v5092_v52 }
  0xf5   : >> { %v980_v58 = vmul.f32 %v5031_v8, %v5092_v52  ;;  %v981_v60 = vmul.f32 %v5038_v28, %v5092_v52  ;;  %v982_v21 = vmul.f32 %v5041_v31, %v5092_v52  ;;  %v983_v39 = vmul.f32 %v5044_v59, %v5092_v52 }
  0xf6   : >> { %v984_v32 = vmul.f32 %v5054_v26, %v5092_v52  ;;  %v985_v2 = vmul.f32 %v5057_v55, %v5092_v52  ;;  %v986_v20 = vmul.f32 %v5060_v9, %v5092_v52  ;;  %v987_v18 = vmul.f32 %v5071_v35, %v5092_v52 }
  0xf7   : >> { %v988_v30 = vmul.f32 %v5074_v14, %v5092_v52  ;;  %v989_v49 = vmul.f32 %v5118_v29, %v5092_v52  ;;  %v990_v36 = vmul.f32 %v5149_v13, %v5092_v52  ;;  %v5163_v1 = vadd.f32 %v977_v4, %v961_v38 }
  0xf8   : >> { %v5165_v46 = vadd.f32 %v978_v25, %v962_v63  ;;  %v5167_v19 = vadd.f32 %v979_v56, %v963_v23  ;;  %v5169_v0 = vadd.f32 %v980_v58, %v964_v57  ;;  %v5171_v47 = vadd.f32 %v981_v60, %v965_v45 }
  0xf9   : >> { %v5173_v15 = vadd.f32 %v982_v21, %v966_v6  ;;  %v5175_v11 = vadd.f32 %v983_v39, %v967_v33  ;;  %v5177_v44 = vadd.f32 %v984_v32, %v968_v51  ;;  %v5179_v17 = vadd.f32 %v985_v2, %v969_v10 }
  0xfa   : >> { %v5181_v12 = vadd.f32 %v986_v20, %v970_v48  ;;  %v5183_v4 = vadd.f32 %v987_v18, %v971_v54  ;;  %v5185_v42 = vadd.f32 %v988_v30, %v972_v50  ;;  %v5187_v27 = vadd.f32 %v989_v49, %v973_v22 }
  0xfb   : >> { %v5189_v41 = vadd.f32 %v990_v36, %v974_v34  ;;  %v1007_v5 = vmul.f32 %v5018_v43, %v4865_v40  ;;  %v1008_v38 = vmul.f32 %v5025_v7, %v4865_v40  ;;  %v1009_v63 = vmul.f32 %v5028_v16, %v4865_v40 }
  0xfc   : >> { %7818 = vst [vmem:[#allocation25_spill] sm:$0xff] %v5181_v12  ;;  %7819 = vst [vmem:[#allocation26_spill] sm:$0xff] %v5183_v4  ;;  %v1010_v23 = vmul.f32 %v5031_v8, %v4865_v40  ;;  %v1011_v57 = vmul.f32 %v5038_v28, %v4865_v40  ;;  %v1012_v45 = vmul.f32 %v5041_v31, %v4865_v40 }
  0xfd   : >> { %7820 = vst [vmem:[#allocation27_spill] sm:$0xff] %v5185_v42  ;;  %7821 = vst [vmem:[#allocation28_spill] sm:$0xff] %v5187_v27  ;;  %v1013_v6 = vmul.f32 %v5044_v59, %v4865_v40  ;;  %v1014_v33 = vmul.f32 %v5054_v26, %v4865_v40  ;;  %v1015_v51 = vmul.f32 %v5057_v55, %v4865_v40 }
  0xfe   : >> { %7822 = vst [vmem:[#allocation29_spill] sm:$0xff] %v5189_v41  ;;  %v1016_v10 = vmul.f32 %v5060_v9, %v4865_v40  ;;  %v1017_v48 = vmul.f32 %v5071_v35, %v4865_v40  ;;  %v1018_v54 = vmul.f32 %v5074_v14, %v4865_v40  ;;  %v1033_v50 = vmul.f32 %v5015_v53, %v4953_v37 }
  0xff   : >> { %v1034_v22 = vmul.f32 %v5018_v43, %v4953_v37  ;;  %v1035_v34 = vmul.f32 %v5025_v7, %v4953_v37  ;;  %v1036_v25 = vmul.f32 %v5028_v16, %v4953_v37  ;;  %v1037_v56 = vmul.f32 %v5031_v8, %v4953_v37 }
 0x100   : >> { %v1038_v58 = vmul.f32 %v5038_v28, %v4953_v37  ;;  %v1039_v40 = vmul.f32 %v5041_v31, %v4953_v37  ;;  %v1040_v53 = vmul.f32 %v5044_v59, %v4953_v37  ;;  %v1041_v60 = vmul.f32 %v5054_v26, %v4953_v37 }
 0x101   : >> { %v1042_v21 = vmul.f32 %v5057_v55, %v4953_v37  ;;  %v1043_v39 = vmul.f32 %v5060_v9, %v4953_v37  ;;  %v1044_v32 = vmul.f32 %v5071_v35, %v4953_v37  ;;  %v1045_v2 = vmul.f32 %v5074_v14, %v4953_v37 }
 0x102   : >> { %v1046_v20 = vmul.f32 %v5118_v29, %v4953_v37  ;;  %v1047_v18 = vadd.f32 %v1033_v50, %v5095_v61  ;;  %v1048_v30 = vadd.f32 %v1034_v22, %v5099_v62  ;;  %v1049_v49 = vadd.f32 %v1035_v34, %v1007_v5 }
 0x103   : >> { %v1050_v36 = vadd.f32 %v1036_v25, %v1008_v38  ;;  %v1051_v52 = vadd.f32 %v1037_v56, %v1009_v63  ;;  %v1052_v24 = vadd.f32 %v1038_v58, %v1010_v23  ;;  %v1053_v41 = vadd.f32 %v1039_v40, %v1011_v57  ;;  %v7835_v25 = vld [vmem:[#allocation15_spill] sm:$0xff]  ;;  %v5345_v40 = vld [vmem:[%s4010_s10 + $0x288] sm:$0xff] }
 0x104   : >> { %v1054_v27 = vadd.f32 %v1040_v53, %v1012_v45  ;;  %v1055_v42 = vadd.f32 %v1041_v60, %v1013_v6  ;;  %v1056_v4 = vadd.f32 %v1042_v21, %v1014_v33  ;;  %v1057_v37 = vadd.f32 %v1043_v39, %v1015_v51  ;;  %v5342_v58 = vld [vmem:[%s4010_s10 + $0x280] sm:$0xff]  ;;  %v5348_v53 = vld [vmem:[%s4010_s10 + $0x290] sm:$0xff] }
 0x105   : >> { %v1058_v12 = vadd.f32 %v1044_v32, %v1016_v10  ;;  %v1059_v61 = vadd.f32 %v1045_v2, %v1017_v48  ;;  %v1060_v50 = vadd.f32 %v1046_v20, %v1018_v54  ;;  %v1061_v62 = vmul.f32 %v5018_v43, %v4956_v3  ;;  %v5307_v10 = vld [vmem:[%s4010_s10 + $0x258] sm:$0xff]  ;;  %v5361_v20 = vld [vmem:[%s4010_s10 + $0x2a0] sm:$0xff] }
 0x106   : >> { %v1062_v5 = vmul.f32 %v5025_v7, %v4956_v3  ;;  %v1063_v38 = vmul.f32 %v5028_v16, %v4956_v3  ;;  %v1064_v63 = vmul.f32 %v5031_v8, %v4956_v3  ;;  %v1065_v23 = vmul.f32 %v5038_v28, %v4956_v3  ;;  %v5358_v2 = vld [vmem:[%s4010_s10 + $0x298] sm:$0xff] }
 0x107   : >> { %v1066_v57 = vmul.f32 %v5041_v31, %v4956_v3  ;;  %v1067_v45 = vmul.f32 %v5044_v59, %v4956_v3  ;;  %v1068_v43 = vmul.f32 %v5054_v26, %v4956_v3  ;;  %v1069_v7 = vmul.f32 %v5057_v55, %v4956_v3 }
 0x108   : >> { %v1070_v16 = vmul.f32 %v5060_v9, %v4956_v3  ;;  %v1071_v8 = vmul.f32 %v5071_v35, %v4956_v3  ;;  %v1072_v28 = vmul.f32 %v5074_v14, %v4956_v3  ;;  %v1073_v31 = vmul.f32 %v5118_v29, %v4956_v3  ;;  %v3161_v29 = vld [vmem:[%s4010_s10 + $0x250] sm:$0xff] }
 0x109   : >> { %v1074_v59 = vmul.f32 %v5149_v13, %v4956_v3  ;;  %v5285_v26 = vadd.f32 %v1061_v62, %v1047_v18  ;;  %v5287_v55 = vadd.f32 %v1062_v5, %v1048_v30  ;;  %v5289_v9 = vadd.f32 %v1063_v38, %v1049_v49  ;;  %v5364_v18 = vld [vmem:[%s4010_s10 + $0x2a8] sm:$0xff] }
 0x10a   : >> { %v5291_v6 = vadd.f32 %v1064_v63, %v1050_v36  ;;  %v5293_v35 = vadd.f32 %v1065_v23, %v1051_v52  ;;  %v5295_v14 = vadd.f32 %v1066_v57, %v1052_v24  ;;  %v5298_v3 = vadd.f32 %v1067_v45, %v1053_v41  ;;  %v5327_v41 = vld [vmem:[%s4010_s10 + $0x278] sm:$0xff] }
 0x10b   : >> { %v5300_v13 = vadd.f32 %v1068_v43, %v1054_v27  ;;  %v5302_v33 = vadd.f32 %v1069_v7, %v1055_v42  ;;  %v5304_v51 = vadd.f32 %v1070_v16, %v1056_v4  ;;  %v5309_v52 = vadd.f32 %v1071_v8, %v1057_v37  ;;  %v5318_v27 = vld [vmem:[%s4010_s10 + $0x260] sm:$0xff]  ;;  %v5321_v42 = vld [vmem:[%s4010_s10 + $0x268] sm:$0xff]  ;;  %v5324_v4 = vld [vmem:[%s4010_s10 + $0x270] sm:$0xff] }
 0x10c   : >> { %7823 = vst [vmem:[#allocation30_spill] sm:$0xff] %v5291_v6  ;;  %7824 = vst [vmem:[#allocation31_spill] sm:$0xff] %v5293_v35  ;;  %v5311_v24 = vadd.f32 %v1072_v28, %v1058_v12  ;;  %v5313_v48 = vadd.f32 %v1073_v31, %v1059_v61  ;;  %v5315_v54 = vadd.f32 %v1074_v59, %v1060_v50  ;;  %v5330_v22 = vstv %s5247_s6  ;;  %v5375_v61 = vld [vmem:[%s4010_s10 + $0x2b0] sm:$0xff]  ;;  %v5378_v50 = vld [vmem:[%s4010_s10 + $0x2b8] sm:$0xff] }
 0x10d   : >> { %7825 = vst [vmem:[#allocation32_spill] sm:$0xff] %v5295_v14  ;;  %7826 = vst [vmem:[#allocation16_spill] sm:$0xff] %v5298_v3  ;;  %v5333_v34 = vstv %s5251_s2  ;;  %v5336_v12 = vstv %s5255_s4  ;;  %v5339_v56 = vmul.f32 %v3161_v29, %v7835_v25  ;;  %v1109_v60 = vmul.f32 %v3161_v29, %v5330_v22 }
 0x10e   : >> { %7827 = vst [vmem:[#allocation17_spill] sm:$0xff] %v5300_v13  ;;  %7828 = vst [vmem:[#allocation33_spill] sm:$0xff] %v5302_v33  ;;  %v1110_v21 = vmul.f32 %v5307_v10, %v5330_v22  ;;  %v1111_v39 = vmul.f32 %v5318_v27, %v5330_v22  ;;  %v1112_v32 = vmul.f32 %v5321_v42, %v5330_v22 }
 0x10f   : >> { %7829 = vst [vmem:[#allocation18_spill] sm:$0xff] %v5304_v51  ;;  %7830 = vst [vmem:[#allocation19_spill] sm:$0xff] %v5309_v52  ;;  %v1113_v30 = vmul.f32 %v5324_v4, %v5330_v22  ;;  %v1114_v49 = vmul.f32 %v5327_v41, %v5330_v22  ;;  %v1115_v36 = vmul.f32 %v5342_v58, %v5330_v22 }
 0x110   : >> { %7831 = vst [vmem:[#allocation20_spill] sm:$0xff] %v5311_v24  ;;  %7832 = vst [vmem:[#allocation21_spill] sm:$0xff] %v5313_v48  ;;  %v1116_v37 = vmul.f32 %v5345_v40, %v5330_v22  ;;  %v1117_v62 = vmul.f32 %v5348_v53, %v5330_v22  ;;  %v1118_v5 = vmul.f32 %v5358_v2, %v5330_v22 }
 0x111   : >> { %7833 = vst [vmem:[#allocation22_spill] sm:$0xff] %v5315_v54  ;;  %7834 = vst [vmem:[#allocation34_spill] sm:$0xff] %v5330_v22  ;;  %v1119_v38 = vmul.f32 %v5361_v20, %v5330_v22  ;;  %v1120_v63 = vmul.f32 %v5364_v18, %v5330_v22  ;;  %v1121_v23 = vmul.f32 %v5375_v61, %v5330_v22 }
 0x112   : >> { %v1122_v57 = vmul.f32 %v5378_v50, %v5330_v22  ;;  %v1123_v45 = vadd.f32 %v1109_v60, %v5163_v1  ;;  %v1124_v43 = vadd.f32 %v1110_v21, %v5165_v46  ;;  %v1125_v7 = vadd.f32 %v1111_v39, %v5167_v19  ;;  %v7836_v22 = vld [vmem:[#allocation25_spill] sm:$0xff]  ;;  %v7837_v1 = vld [vmem:[#allocation26_spill] sm:$0xff]  ;;  %v7838_v46 = vld [vmem:[#allocation27_spill] sm:$0xff] }
 0x113   : >> { %v1126_v16 = vadd.f32 %v1112_v32, %v5169_v0  ;;  %v1127_v8 = vadd.f32 %v1113_v30, %v5171_v47  ;;  %v1128_v28 = vadd.f32 %v1114_v49, %v5173_v15  ;;  %v1129_v31 = vadd.f32 %v1115_v36, %v5175_v11  ;;  %v7839_v19 = vld [vmem:[#allocation28_spill] sm:$0xff]  ;;  %v7840_v0 = vld [vmem:[#allocation29_spill] sm:$0xff]  ;;  %v5423_v36 = vld [vmem:[%s4010_s10 + $0x2c0] sm:$0xff] }
 0x114   : >> { %v1130_v59 = vadd.f32 %v1116_v37, %v5177_v44  ;;  %v1131_v29 = vadd.f32 %v1117_v62, %v5179_v17  ;;  %v1132_v54 = vadd.f32 %v1118_v5, %v7836_v22  ;;  %v1133_v60 = vadd.f32 %v1119_v38, %v7837_v1 }
 0x115   : >> { %v1134_v21 = vadd.f32 %v1120_v63, %v7838_v46  ;;  %v1135_v39 = vadd.f32 %v1121_v23, %v7839_v19  ;;  %v1136_v32 = vadd.f32 %v1122_v57, %v7840_v0  ;;  %v1139_v47 = vmul.f32 %v5307_v10, %v5333_v34 }
 0x116   : >> { %v1140_v15 = vmul.f32 %v5318_v27, %v5333_v34  ;;  %v1141_v11 = vmul.f32 %v5321_v42, %v5333_v34  ;;  %v1142_v44 = vmul.f32 %v5324_v4, %v5333_v34  ;;  %v1143_v17 = vmul.f32 %v5327_v41, %v5333_v34 }
 0x117   : >> { %v1144_v22 = vmul.f32 %v5342_v58, %v5333_v34  ;;  %v1145_v30 = vmul.f32 %v5345_v40, %v5333_v34  ;;  %v1146_v49 = vmul.f32 %v5348_v53, %v5333_v34  ;;  %v1147_v37 = vmul.f32 %v5358_v2, %v5333_v34 }
 0x118   : >> { %v1148_v62 = vmul.f32 %v5361_v20, %v5333_v34  ;;  %v1149_v5 = vmul.f32 %v5364_v18, %v5333_v34  ;;  %v1150_v38 = vmul.f32 %v5375_v61, %v5333_v34  ;;  %v1151_v63 = vmul.f32 %v5378_v50, %v5333_v34 }
 0x119   : >> { %v1152_v23 = vmul.f32 %v5423_v36, %v5333_v34  ;;  %v1153_v57 = vadd.f32 %v1139_v47, %v1123_v45  ;;  %v1154_v1 = vadd.f32 %v1140_v15, %v1124_v43  ;;  %v1155_v46 = vadd.f32 %v1141_v11, %v1125_v7 }
 0x11a   : >> { %v1156_v19 = vadd.f32 %v1142_v44, %v1126_v16  ;;  %v1157_v0 = vadd.f32 %v1143_v17, %v1127_v8  ;;  %v1158_v48 = vadd.f32 %v1144_v22, %v1128_v28  ;;  %v1159_v24 = vadd.f32 %v1145_v30, %v1129_v31  ;;  %v5454_v31 = vld [vmem:[%s4010_s10 + $0x2c8] sm:$0xff] }
 0x11b   : >> { %v1160_v52 = vadd.f32 %v1146_v49, %v1130_v59  ;;  %v1161_v51 = vadd.f32 %v1147_v37, %v1131_v29  ;;  %v1162_v33 = vadd.f32 %v1148_v62, %v1132_v54  ;;  %v1163_v13 = vadd.f32 %v1149_v5, %v1133_v60 }
 0x11c   : >> { %v1164_v3 = vadd.f32 %v1150_v38, %v1134_v21  ;;  %v1165_v14 = vadd.f32 %v1151_v63, %v1135_v39  ;;  %v1166_v35 = vadd.f32 %v1152_v23, %v1136_v32  ;;  %v1169_v6 = vmul.f32 %v5318_v27, %v5336_v12 }
 0x11d   : >> { %v1170_v45 = vmul.f32 %v5321_v42, %v5336_v12  ;;  %v1171_v43 = vmul.f32 %v5324_v4, %v5336_v12  ;;  %v1172_v7 = vmul.f32 %v5327_v41, %v5336_v12  ;;  %v1173_v16 = vmul.f32 %v5342_v58, %v5336_v12 }
 0x11e   : >> { %v1174_v54 = vmul.f32 %v5345_v40, %v5336_v12  ;;  %v1175_v8 = vmul.f32 %v5348_v53, %v5336_v12  ;;  %v1176_v28 = vmul.f32 %v5358_v2, %v5336_v12  ;;  %v1177_v59 = vmul.f32 %v5361_v20, %v5336_v12 }
 0x11f   : >> { %v1178_v29 = vmul.f32 %v5364_v18, %v5336_v12  ;;  %v1179_v60 = vmul.f32 %v5375_v61, %v5336_v12  ;;  %v1180_v21 = vmul.f32 %v5378_v50, %v5336_v12  ;;  %v1181_v39 = vmul.f32 %v5423_v36, %v5336_v12 }
 0x120   : >> { %v1182_v32 = vmul.f32 %v5454_v31, %v5336_v12  ;;  %v5468_v47 = vadd.f32 %v1169_v6, %v1153_v57  ;;  %v5470_v15 = vadd.f32 %v1170_v45, %v1154_v1  ;;  %v5472_v11 = vadd.f32 %v1171_v43, %v1155_v46  ;;  %v7852_v43 = vld [vmem:[#allocation30_spill] sm:$0xff] }
 0x121   : >> { %v5474_v44 = vadd.f32 %v1172_v7, %v1156_v19  ;;  %v5476_v17 = vadd.f32 %v1173_v16, %v1157_v0  ;;  %v5478_v22 = vadd.f32 %v1174_v54, %v1158_v48  ;;  %v5480_v30 = vadd.f32 %v1175_v8, %v1159_v24  ;;  %v7853_v16 = vld [vmem:[#allocation31_spill] sm:$0xff]  ;;  %v7854_v8 = vld [vmem:[#allocation32_spill] sm:$0xff] }
 0x122   : >> { %v5482_v49 = vadd.f32 %v1176_v28, %v1160_v52  ;;  %v5484_v37 = vadd.f32 %v1177_v59, %v1161_v51  ;;  %v5486_v62 = vadd.f32 %v1178_v29, %v1162_v33  ;;  %v5488_v6 = vadd.f32 %v1179_v60, %v1163_v13  ;;  %v7855_v59 = vld [vmem:[#allocation16_spill] sm:$0xff]  ;;  %v7856_v60 = vld [vmem:[#allocation17_spill] sm:$0xff] }
 0x123   : >> { %7841 = vst [vmem:[#allocation35_spill] sm:$0xff] %v5474_v44  ;;  %7842 = vst [vmem:[#allocation36_spill] sm:$0xff] %v5476_v17  ;;  %v5490_v5 = vadd.f32 %v1180_v21, %v1164_v3  ;;  %v5492_v38 = vadd.f32 %v1181_v39, %v1165_v14  ;;  %v5494_v63 = vadd.f32 %v1182_v32, %v1166_v35  ;;  %v7857_v39 = vld [vmem:[#allocation33_spill] sm:$0xff]  ;;  %v7864_v17 = vld [vmem:[#allocation24_spill] sm:$0xff] }
 0x124   : >> { %7843 = vst [vmem:[#allocation37_spill] sm:$0xff] %v5478_v22  ;;  %7844 = vst [vmem:[#allocation38_spill] sm:$0xff] %v5480_v30  ;;  %v1198_v48 = vmul.f32 %v5307_v10, %v7835_v25  ;;  %v1199_v24 = vmul.f32 %v5318_v27, %v7835_v25  ;;  %v1200_v51 = vmul.f32 %v5321_v42, %v7835_v25 }
 0x125   : >> { %7845 = vst [vmem:[#allocation39_spill] sm:$0xff] %v5482_v49  ;;  %7846 = vst [vmem:[#allocation15_spill] sm:$0xff] %v5484_v37  ;;  %v1201_v33 = vmul.f32 %v5324_v4, %v7835_v25  ;;  %v1202_v3 = vmul.f32 %v5327_v41, %v7835_v25  ;;  %v1203_v14 = vmul.f32 %v5342_v58, %v7835_v25 }
 0x126   : >> { %7847 = vst [vmem:[#allocation25_spill] sm:$0xff] %v5486_v62  ;;  %7848 = vst [vmem:[#allocation26_spill] sm:$0xff] %v5488_v6  ;;  %v1204_v35 = vmul.f32 %v5345_v40, %v7835_v25  ;;  %v1205_v13 = vmul.f32 %v5348_v53, %v7835_v25  ;;  %v1206_v52 = vmul.f32 %v5358_v2, %v7835_v25 }
 0x127   : >> { %7849 = vst [vmem:[#allocation27_spill] sm:$0xff] %v5490_v5  ;;  %7850 = vst [vmem:[#allocation28_spill] sm:$0xff] %v5492_v38  ;;  %v1207_v23 = vmul.f32 %v5361_v20, %v7835_v25  ;;  %v1208_v57 = vmul.f32 %v5364_v18, %v7835_v25  ;;  %v1209_v1 = vmul.f32 %v5375_v61, %v7835_v25  ;;  %v7859_v38 = vld [vmem:[#allocation19_spill] sm:$0xff] }
 0x128   : >> { %7851 = vst [vmem:[#allocation29_spill] sm:$0xff] %v5494_v63  ;;  %v1210_v46 = vmul.f32 %v5378_v50, %v7835_v25  ;;  %v1211_v19 = vadd.f32 %v5339_v56, %v5285_v26  ;;  %v1212_v0 = vadd.f32 %v1198_v48, %v5287_v55  ;;  %v1213_v45 = vadd.f32 %v1199_v24, %v5289_v9  ;;  %v7858_v25 = vld [vmem:[#allocation18_spill] sm:$0xff]  ;;  %v7860_v56 = vld [vmem:[#allocation20_spill] sm:$0xff]  ;;  %v7861_v48 = vld [vmem:[#allocation21_spill] sm:$0xff] }
 0x129   : >> { %v1214_v7 = vadd.f32 %v1200_v51, %v7852_v43  ;;  %v1215_v54 = vadd.f32 %v1201_v33, %v7853_v16  ;;  %v1216_v28 = vadd.f32 %v1202_v3, %v7854_v8  ;;  %v1217_v29 = vadd.f32 %v1203_v14, %v7855_v59  ;;  %v7862_v24 = vld [vmem:[#allocation22_spill] sm:$0xff]  ;;  %v7863_v43 = vld [vmem:[#allocation23_spill] sm:$0xff] }
 0x12a   : >> { %v1218_v21 = vadd.f32 %v1204_v35, %v7856_v60  ;;  %v1219_v32 = vadd.f32 %v1205_v13, %v7857_v39  ;;  %v1220_v63 = vadd.f32 %v1206_v52, %v7858_v25  ;;  %v1221_v26 = vadd.f32 %v1207_v23, %v7859_v38 }
 0x12b   : >> { %v1222_v55 = vadd.f32 %v1208_v57, %v7860_v56  ;;  %v1223_v9 = vadd.f32 %v1209_v1, %v7861_v48  ;;  %v1224_v51 = vadd.f32 %v1210_v46, %v7862_v24  ;;  %v1225_v33 = vmul.f32 %v5307_v10, %v7863_v43 }
 0x12c   : >> { %v1226_v3 = vmul.f32 %v5318_v27, %v7863_v43  ;;  %v1227_v14 = vmul.f32 %v5321_v42, %v7863_v43  ;;  %v1228_v35 = vmul.f32 %v5324_v4, %v7863_v43  ;;  %v1229_v38 = vmul.f32 %v5327_v41, %v7863_v43 }
 0x12d   : >> { %v1230_v13 = vmul.f32 %v5342_v58, %v7863_v43  ;;  %v1231_v52 = vmul.f32 %v5345_v40, %v7863_v43  ;;  %v1232_v10 = vmul.f32 %v5348_v53, %v7863_v43  ;;  %v1233_v23 = vmul.f32 %v5358_v2, %v7863_v43 }
 0x12e   : >> { %v1234_v57 = vmul.f32 %v5361_v20, %v7863_v43  ;;  %v1235_v1 = vmul.f32 %v5364_v18, %v7863_v43  ;;  %v1236_v46 = vmul.f32 %v5375_v61, %v7863_v43  ;;  %v1237_v16 = vmul.f32 %v5378_v50, %v7863_v43 }
 0x12f   : >> { %v1238_v8 = vmul.f32 %v5423_v36, %v7863_v43  ;;  %v1239_v59 = vadd.f32 %v1225_v33, %v1211_v19  ;;  %v1240_v60 = vadd.f32 %v1226_v3, %v1212_v0  ;;  %v1241_v39 = vadd.f32 %v1227_v14, %v1213_v45  ;;  %v5611_v33 = vld [vmem:[%s4010_s10 + $0x378] sm:$0xff]  ;;  %v5614_v3 = vld [vmem:[%s4010_s10 + $0x380] sm:$0xff]  ;;  %v5617_v14 = vld [vmem:[%s4010_s10 + $0x388] sm:$0xff] }
 0x130   : >> { %v1242_v25 = vadd.f32 %v1228_v35, %v1214_v7  ;;  %v1243_v56 = vadd.f32 %v1229_v38, %v1215_v54  ;;  %v1244_v48 = vadd.f32 %v1230_v13, %v1216_v28  ;;  %v1245_v24 = vadd.f32 %v1231_v52, %v1217_v29  ;;  %v3179_v54 = vld [vmem:[%s4010_s10 + $0x340] sm:$0xff]  ;;  %v3180_v29 = vld [vmem:[%s4010_s10 + $0x348] sm:$0xff]  ;;  %v5620_v52 = vld [vmem:[%s4010_s10 + $0x390] sm:$0xff] }
 0x131   : >> { %v1246_v5 = vadd.f32 %v1232_v10, %v1218_v21  ;;  %v1247_v6 = vadd.f32 %v1233_v23, %v1219_v32  ;;  %v1248_v62 = vadd.f32 %v1234_v57, %v1220_v63  ;;  %v1249_v37 = vadd.f32 %v1235_v1, %v1221_v26  ;;  %v5599_v21 = vld [vmem:[%s4010_s10 + $0x358] sm:$0xff]  ;;  %v5626_v23 = vld [vmem:[%s4010_s10 + $0x3a0] sm:$0xff] }
 0x132   : >> { %v1250_v49 = vadd.f32 %v1236_v46, %v1222_v55  ;;  %v1251_v30 = vadd.f32 %v1237_v16, %v1223_v9  ;;  %v1252_v22 = vadd.f32 %v1238_v8, %v1224_v51  ;;  %v1253_v44 = vmul.f32 %v5318_v27, %v7864_v17  ;;  %v5602_v55 = vld [vmem:[%s4010_s10 + $0x360] sm:$0xff]  ;;  %v5623_v10 = vld [vmem:[%s4010_s10 + $0x398] sm:$0xff] }
 0x133   : >> { %v1254_v19 = vmul.f32 %v5321_v42, %v7864_v17  ;;  %v1255_v0 = vmul.f32 %v5324_v4, %v7864_v17  ;;  %v1256_v45 = vmul.f32 %v5327_v41, %v7864_v17  ;;  %v1257_v63 = vmul.f32 %v5342_v58, %v7864_v17  ;;  %v7865_v57 = vld [vmem:[#allocation34_spill] sm:$0xff] }
 0x134   : >> { %v1258_v7 = vmul.f32 %v5345_v40, %v7864_v17  ;;  %v1259_v27 = vmul.f32 %v5348_v53, %v7864_v17  ;;  %v1260_v42 = vmul.f32 %v5358_v2, %v7864_v17  ;;  %v1261_v4 = vmul.f32 %v5361_v20, %v7864_v17 }
 0x135   : >> { %v1262_v41 = vmul.f32 %v5364_v18, %v7864_v17  ;;  %v1263_v58 = vmul.f32 %v5375_v61, %v7864_v17  ;;  %v1264_v40 = vmul.f32 %v5378_v50, %v7864_v17  ;;  %v1265_v53 = vmul.f32 %v5423_v36, %v7864_v17  ;;  %v5596_v61 = vld [vmem:[%s4010_s10 + $0x350] sm:$0xff] }
 0x136   : >> { %v1266_v2 = vmul.f32 %v5454_v31, %v7864_v17  ;;  %v1267_v20 = vadd.f32 %v1253_v44, %v1239_v59  ;;  %v1268_v28 = vadd.f32 %v1254_v19, %v1240_v60  ;;  %v1269_v18 = vadd.f32 %v1255_v0, %v1241_v39  ;;  %v5605_v31 = vld [vmem:[%s4010_s10 + $0x368] sm:$0xff]  ;;  %v5608_v44 = vld [vmem:[%s4010_s10 + $0x370] sm:$0xff] }
 0x137   : >> { %v1270_v50 = vadd.f32 %v1256_v45, %v1242_v25  ;;  %v1271_v32 = vadd.f32 %v1257_v63, %v1243_v56  ;;  %v1272_v26 = vadd.f32 %v1258_v7, %v1244_v48  ;;  %v1273_v36 = vadd.f32 %v1259_v27, %v1245_v24 }
 0x138   : >> { %v1274_v17 = vadd.f32 %v1260_v42, %v1246_v5  ;;  %v1275_v9 = vadd.f32 %v1261_v4, %v1247_v6  ;;  %v1276_v51 = vadd.f32 %v1262_v41, %v1248_v62  ;;  %v1277_v43 = vadd.f32 %v1263_v58, %v1249_v37  ;;  %v5630_v6 = vld [vmem:[%s4010_s10 + $0x3a8] sm:$0xff] }
 0x139   : >> { %v1278_v35 = vadd.f32 %v1264_v40, %v1250_v49  ;;  %v1279_v38 = vadd.f32 %v1265_v53, %v1251_v30  ;;  %v1280_v13 = vadd.f32 %v1266_v2, %v1252_v22  ;;  %v1299_v5 = vmul.f32 %v3179_v54, %v7865_v57  ;;  %v3193_v54 = vld [vmem:[%s4010_s10 + $0x3b0] sm:$0xff] }
 0x13a   : >> { %v1300_v37 = vmul.f32 %v3180_v29, %v7865_v57  ;;  %v1301_v62 = vmul.f32 %v5596_v61, %v7865_v57  ;;  %v1302_v49 = vmul.f32 %v5599_v21, %v7865_v57  ;;  %v1303_v22 = vmul.f32 %v5602_v55, %v7865_v57 }
 0x13b   : >> { %v1304_v30 = vmul.f32 %v5605_v31, %v7865_v57  ;;  %v1305_v1 = vmul.f32 %v5608_v44, %v7865_v57  ;;  %v1306_v46 = vmul.f32 %v5611_v33, %v7865_v57  ;;  %v1307_v16 = vmul.f32 %v5614_v3, %v7865_v57 }
 0x13c   : >> { %v1308_v8 = vmul.f32 %v5617_v14, %v7865_v57  ;;  %v1309_v59 = vmul.f32 %v5620_v52, %v7865_v57  ;;  %v1310_v60 = vmul.f32 %v5623_v10, %v7865_v57  ;;  %v1311_v39 = vmul.f32 %v5626_v23, %v7865_v57 }
 0x13d   : >> { %v1312_v25 = vmul.f32 %v5630_v6, %v7865_v57  ;;  %v1313_v56 = vadd.f32 %v1299_v5, %v1267_v20  ;;  %v1314_v48 = vadd.f32 %v1300_v37, %v1268_v28  ;;  %v1315_v24 = vadd.f32 %v1301_v62, %v1269_v18 }
 0x13e   : >> { %v1316_v19 = vadd.f32 %v1302_v49, %v1270_v50  ;;  %v1317_v0 = vadd.f32 %v1303_v22, %v1271_v32  ;;  %v1318_v45 = vadd.f32 %v1304_v30, %v1272_v26  ;;  %v1319_v63 = vadd.f32 %v1305_v1, %v1273_v36 }
 0x13f   : >> { %v1320_v7 = vadd.f32 %v1306_v46, %v1274_v17  ;;  %v1321_v27 = vadd.f32 %v1307_v16, %v1275_v9  ;;  %v1322_v42 = vadd.f32 %v1308_v8, %v1276_v51  ;;  %v1323_v4 = vadd.f32 %v1309_v59, %v1277_v43 }
 0x140   : >> { %v1324_v41 = vadd.f32 %v1310_v60, %v1278_v35  ;;  %v1325_v58 = vadd.f32 %v1311_v39, %v1279_v38  ;;  %v1326_v40 = vadd.f32 %v1312_v25, %v1280_v13  ;;  %v1327_v53 = vmul.f32 %v3180_v29, %v5333_v34 }
 0x141   : >> { %v1328_v2 = vmul.f32 %v5596_v61, %v5333_v34  ;;  %v1329_v20 = vmul.f32 %v5599_v21, %v5333_v34  ;;  %v1330_v28 = vmul.f32 %v5602_v55, %v5333_v34  ;;  %v1331_v18 = vmul.f32 %v5605_v31, %v5333_v34 }
 0x142   : >> { %v1332_v50 = vmul.f32 %v5608_v44, %v5333_v34  ;;  %v1333_v32 = vmul.f32 %v5611_v33, %v5333_v34  ;;  %v1334_v29 = vmul.f32 %v5614_v3, %v5333_v34  ;;  %v1335_v26 = vmul.f32 %v5617_v14, %v5333_v34 }
 0x143   : >> { %v1336_v36 = vmul.f32 %v5620_v52, %v5333_v34  ;;  %v1337_v17 = vmul.f32 %v5623_v10, %v5333_v34  ;;  %v1338_v9 = vmul.f32 %v5626_v23, %v5333_v34  ;;  %v1339_v51 = vmul.f32 %v5630_v6, %v5333_v34 }
 0x144   : >> { %v1340_v43 = vmul.f32 %v3193_v54, %v5333_v34  ;;  %v1341_v35 = vadd.f32 %v1327_v53, %v1313_v56  ;;  %v1342_v38 = vadd.f32 %v1328_v2, %v1314_v48  ;;  %v1343_v13 = vadd.f32 %v1329_v20, %v1315_v24  ;;  %v3194_v34 = vld [vmem:[%s4010_s10 + $0x3b8] sm:$0xff]  ;;  %v7866_v53 = vld [vmem:[#allocation35_spill] sm:$0xff]  ;;  %v7867_v2 = vld [vmem:[#allocation36_spill] sm:$0xff] }
 0x145   : >> { %v1344_v57 = vadd.f32 %v1330_v28, %v1316_v19  ;;  %v1345_v5 = vadd.f32 %v1331_v18, %v1317_v0  ;;  %v1346_v37 = vadd.f32 %v1332_v50, %v1318_v45  ;;  %v1347_v62 = vadd.f32 %v1333_v32, %v1319_v63  ;;  %v7868_v28 = vld [vmem:[#allocation37_spill] sm:$0xff]  ;;  %v7869_v50 = vld [vmem:[#allocation38_spill] sm:$0xff] }
 0x146   : >> { %v1348_v49 = vadd.f32 %v1334_v29, %v1320_v7  ;;  %v1349_v22 = vadd.f32 %v1335_v26, %v1321_v27  ;;  %v1350_v30 = vadd.f32 %v1336_v36, %v1322_v42  ;;  %v1351_v1 = vadd.f32 %v1337_v17, %v1323_v4  ;;  %v7870_v29 = vld [vmem:[#allocation39_spill] sm:$0xff] }
 0x147   : >> { %v1352_v46 = vadd.f32 %v1338_v9, %v1324_v41  ;;  %v1353_v16 = vadd.f32 %v1339_v51, %v1325_v58  ;;  %v1354_v8 = vadd.f32 %v1340_v43, %v1326_v40  ;;  %v1355_v59 = vmul.f32 %v5596_v61, %v5336_v12  ;;  %v7871_v36 = vld [vmem:[#allocation15_spill] sm:$0xff]  ;;  %v7872_v9 = vld [vmem:[#allocation25_spill] sm:$0xff]  ;;  %v7873_v43 = vld [vmem:[#allocation26_spill] sm:$0xff] }
 0x148   : >> { %v1356_v60 = vmul.f32 %v5599_v21, %v5336_v12  ;;  %v1357_v39 = vmul.f32 %v5602_v55, %v5336_v12  ;;  %v1358_v25 = vmul.f32 %v5605_v31, %v5336_v12  ;;  %v1359_v56 = vmul.f32 %v5608_v44, %v5336_v12 }
 0x149   : >> { %v1360_v48 = vmul.f32 %v5611_v33, %v5336_v12  ;;  %v1361_v24 = vmul.f32 %v5614_v3, %v5336_v12  ;;  %v1362_v61 = vmul.f32 %v5617_v14, %v5336_v12  ;;  %v1363_v21 = vmul.f32 %v5620_v52, %v5336_v12 }
 0x14a   : >> { %v1364_v55 = vmul.f32 %v5623_v10, %v5336_v12  ;;  %v1365_v31 = vmul.f32 %v5626_v23, %v5336_v12  ;;  %v1366_v44 = vmul.f32 %v5630_v6, %v5336_v12  ;;  %v1367_v33 = vmul.f32 %v3193_v54, %v5336_v12 }
 0x14b   : >> { %v1368_v3 = vmul.f32 %v3194_v34, %v5336_v12  ;;  %v1369_v19 = vadd.f32 %v1355_v59, %v1341_v35  ;;  %v1370_v0 = vadd.f32 %v1356_v60, %v1342_v38  ;;  %v1371_v14 = vadd.f32 %v1357_v39, %v1343_v13  ;;  %v7874_v35 = vld [vmem:[#allocation27_spill] sm:$0xff]  ;;  %v7875_v38 = vld [vmem:[#allocation28_spill] sm:$0xff]  ;;  %v7876_v13 = vld [vmem:[#allocation29_spill] sm:$0xff] }
 0x14c   : >> { %v1372_v45 = vadd.f32 %v1358_v25, %v1344_v57  ;;  %v1373_v63 = vadd.f32 %v1359_v56, %v1345_v5  ;;  %v1374_v52 = vadd.f32 %v1360_v48, %v1346_v37  ;;  %v1375_v7 = vadd.f32 %v1361_v24, %v1347_v62 }
 0x14d   : >> { %v1376_v27 = vadd.f32 %v1362_v61, %v1348_v49  ;;  %v1377_v10 = vadd.f32 %v1363_v21, %v1349_v22  ;;  %v1378_v42 = vadd.f32 %v1364_v55, %v1350_v30  ;;  %v1379_v4 = vadd.f32 %v1365_v31, %v1351_v1 }
 0x14e   : >> { %v1380_v23 = vadd.f32 %v1366_v44, %v1352_v46  ;;  %v1381_v41 = vadd.f32 %v1367_v33, %v1353_v16  ;;  %v1382_v58 = vadd.f32 %v1368_v3, %v1354_v8  ;;  %v1383_v6 = vmax.f32 %v5468_v47, %v1369_v19 }
 0x14f   : >> { %v1384_v40 = vmax.f32 %v5470_v15, %v1370_v0  ;;  %v1385_v12 = vmax.f32 %v5472_v11, %v1371_v14  ;;  %v1386_v54 = vmax.f32 %v7866_v53, %v1372_v45  ;;  %v1387_v20 = vmax.f32 %v7867_v2, %v1373_v63 }
 0x150   : >> { %v1388_v18 = vmax.f32 %v7868_v28, %v1374_v52  ;;  %v1389_v32 = vmax.f32 %v7869_v50, %v1375_v7  ;;  %v1390_v26 = vmax.f32 %v7870_v29, %v1376_v27  ;;  %v1391_v17 = vmax.f32 %v7871_v36, %v1377_v10 }
 0x151   : >> { %v1392_v51 = vmax.f32 %v7872_v9, %v1378_v42  ;;  %v1393_v47 = vmax.f32 %v7873_v43, %v1379_v4  ;;  %v1394_v15 = vmax.f32 %v7874_v35, %v1380_v23  ;;  %v1395_v11 = vmax.f32 %v7875_v38, %v1381_v41 }
 0x152   : >> { %v1396_v57 = vmax.f32 %v7876_v13, %v1382_v58  ;;  %v1398_v5 = vstv %s1397_s26 }
 0x153   : >> { %v1399_v37 = vadd.f32 %v1398_v5, %v1383_v6  ;;  %v1400_v62 = vadd.f32 %v1398_v5, %v1384_v40  ;;  %v1401_v49 = vadd.f32 %v1398_v5, %v1385_v12  ;;  %v1402_v22 = vadd.f32 %v1398_v5, %v1386_v54 }
 0x154   : >> { %v1403_v30 = vadd.f32 %v1398_v5, %v1387_v20  ;;  %v1404_v1 = vadd.f32 %v1398_v5, %v1388_v18  ;;  %v1405_v46 = vadd.f32 %v1398_v5, %v1389_v32  ;;  %v1406_v16 = vadd.f32 %v1398_v5, %v1390_v26 }
 0x155   : >> { %v1407_v8 = vadd.f32 %v1398_v5, %v1391_v17  ;;  %v1408_v59 = vadd.f32 %v1398_v5, %v1392_v51  ;;  %v1409_v34 = vadd.f32 %v1398_v5, %v1393_v47  ;;  %v1410_v60 = vadd.f32 %v1398_v5, %v1394_v15 }
 0x156   : >> { %v1411_v39 = vadd.f32 %v1398_v5, %v1395_v11  ;;  %v1412_v25 = vadd.f32 %v1398_v5, %v1396_v57  ;;  %v1413_v56 = vmax.f32 %v1399_v37, 0.0  ;;  %v1414_v48 = vmax.f32 %v1400_v62, 0.0 }
 0x157   : >> { %v1415_v24 = vmax.f32 %v1401_v49, 0.0  ;;  %v1416_v61 = vmax.f32 %v1402_v22, 0.0  ;;  %v1417_v21 = vmax.f32 %v1403_v30, 0.0  ;;  %v1418_v55 = vmax.f32 %v1404_v1, 0.0 }
 0x158   : >> { %v1419_v31 = vmax.f32 %v1405_v46, 0.0  ;;  %v1420_v44 = vmax.f32 %v1406_v16, 0.0  ;;  %v1421_v33 = vmax.f32 %v1407_v8, 0.0  ;;  %v1422_v3 = vmax.f32 %v1408_v59, 0.0 }
 0x159   : >> { %v1423_v19 = vmax.f32 %v1409_v34, 0.0  ;;  %v1424_v0 = vmax.f32 %v1410_v60, 0.0  ;;  %v1425_v14 = vmax.f32 %v1411_v39, 0.0  ;;  %v1426_v45 = vmax.f32 %v1412_v25, 0.0 }
 0x15a   : >> { %v1427_v63 = vmax.f32 %v1413_v56, %v1414_v48  ;;  %v1432_v52 = vmax.f32 %v1415_v24, %v1416_v61  ;;  %v1437_v7 = vmax.f32 %v1417_v21, %v1418_v55  ;;  %v1442_v27 = vmax.f32 %v1419_v31, %v1420_v44 }
 0x15b   : >> { %v1447_v10 = vmax.f32 %v1421_v33, %v1422_v3  ;;  %v1452_v42 = vmax.f32 %v1423_v19, %v1424_v0  ;;  %v1457_v4 = vmax.f32 %v1425_v14, %v1426_v45  ;;  %100 = sbr.rel (!%p98_p11) target bundleno = 66 (0x42), region = 133 }
 0x15c   : >> { %3195 = vst [vmem:[%s4918_s29 + $0x38] sm:$0xff] %v1427_v63  ;;  %3196 = vst [vmem:[%s4918_s29 + $0x40] sm:$0xff] %v1432_v52 }
 0x15d   : >> { %3197 = vst [vmem:[%s4918_s29 + $0x48] sm:$0xff] %v1437_v7  ;;  %3198 = vst [vmem:[%s4918_s29 + $0x50] sm:$0xff] %v1442_v27 }
 0x15e   : >> { %3199 = vst [vmem:[%s4918_s29 + $0x58] sm:$0xff] %v1447_v10  ;;  %3200 = vst [vmem:[%s4918_s29 + $0x60] sm:$0xff] %v1452_v42 }
 0x15f   : >> { %3201 = vst [vmem:[%s4918_s29 + $0x68] sm:$0xff] %v1457_v4 }
 0x160   :  { %94 = sbr.rel (!%p92_p12) target bundleno = 65 (0x41), region = 144  ;;  %v5739_v23 = vmov (%p92_p12), 0.0   ;;  %s5741_s10 = smov (%p92_p12), 0  }
 0x165 LB: > { %s5749_s5 = smov 0   ;;  %s3811_s10 = sphi %s5741_s10, %s1467_s10   ;;  %v3807_v23 = vphi %v5739_v23, %v7957_v23  }
 0x166 LB: >> { %7877 = vst [vmem:[#allocation40_spill] sm:$0xff] %v3815_v23  ;;  %v5757_v41 = vmov 0.0   ;;  %v5759_v58 = vmov 0.0   ;;  %v5761_v6 = vmov 0.0   ;;  %v5763_v40 = vmov 0.0   ;;  %s5805_s0 = smov 0   ;;  %s3819_s5 = sphi %s5749_s5, %s1474_s5   ;;  %v3815_v23 = vphi %v3807_v23, %v7956_v23  }
 0x167   : >> { %v5765_v12 = vmov 0.0   ;;  %v5767_v53 = vmov 0.0   ;;  %v5769_v54 = vmov 0.0   ;;  %v5771_v2 = vmov 0.0  }
 0x168   : >> { %v5773_v20 = vmov 0.0   ;;  %v5775_v28 = vmov 0.0   ;;  %v5777_v18 = vmov 0.0   ;;  %v5779_v50 = vmov 0.0  }
 0x169   : >> { %v5781_v32 = vmov 0.0   ;;  %v5783_v29 = vmov 0.0   ;;  %v5785_v26 = vmov 0.0   ;;  %v5787_v36 = vmov 0.0  }
 0x16a   : >> { %v5789_v17 = vmov 0.0   ;;  %v5791_v9 = vmov 0.0   ;;  %v5793_v51 = vmov 0.0   ;;  %v5795_v43 = vmov 0.0  }
 0x16b   : >> { %v5797_v47 = vmov 0.0   ;;  %v5799_v35 = vmov 0.0   ;;  %v5801_v15 = vmov 0.0   ;;  %v5803_v38 = vmov 0.0  }
 0x16c LB: >>> { %7878 = vst [vmem:[#allocation41_spill] sm:$0xff] %v3823_v41  ;;  %7879 = vst [vmem:[#allocation42_spill] sm:$0xff] %v3827_v58  ;;  %s3204_s25 = smul.u32 224, %s3819_s5  ;;  %s3919_s0 = sphi %s5805_s0, %s1482_s0   ;;  %v3915_v38 = vphi %v5803_v38, %v7954_v38   ;;  %v3911_v15 = vphi %v5801_v15, %v7953_v15   ;;  %v3907_v35 = vphi %v5799_v35, %v7952_v35   ;;  %v3903_v47 = vphi %v5797_v47, %v7951_v47   ;;  %v3899_v43 = vphi %v5795_v43, %v7950_v43   ;;  %v3895_v51 = vphi %v5793_v51, %v7949_v51   ;;  %v3891_v9 = vphi %v5791_v9, %v7948_v9   ;;  %v3887_v17 = vphi %v5789_v17, %v7947_v17   ;;  %v3883_v36 = vphi %v5787_v36, %v7946_v36   ;;  %v3879_v26 = vphi %v5785_v26, %v7945_v26   ;;  %v3875_v29 = vphi %v5783_v29, %v7944_v29   ;;  %v3871_v32 = vphi %v5781_v32, %v7943_v32   ;;  %v3867_v50 = vphi %v5779_v50, %v7942_v50   ;;  %v3863_v18 = vphi %v5777_v18, %v7941_v18   ;;  %v3859_v28 = vphi %v5775_v28, %v7940_v28   ;;  %v3855_v20 = vphi %v5773_v20, %v7939_v20   ;;  %v3851_v2 = vphi %v5771_v2, %v7938_v2   ;;  %v3847_v54 = vphi %v5769_v54, %v7937_v54   ;;  %v3843_v53 = vphi %v5767_v53, %v7936_v53   ;;  %v3839_v12 = vphi %v5765_v12, %v7935_v12   ;;  %v3835_v40 = vphi %v5763_v40, %v7934_v40   ;;  %v3831_v6 = vphi %v5761_v6, %v7933_v6   ;;  %v3827_v58 = vphi %v5759_v58, %v7932_v58   ;;  %v3823_v41 = vphi %v5757_v41, %v7931_v41  }
 0x16d   : >>> { %7880 = vst [vmem:[#allocation43_spill] sm:$0xff] %v3831_v6  ;;  %7881 = vst [vmem:[#allocation44_spill] sm:$0xff] %v3835_v40  ;;  %s3205_s11 = smul.u32 3136, %s3919_s0 }
 0x16e   : >>> { %s5879_s12 = smul.u32 18, %s3919_s0 }
 0x16f   : >>> { %s1510_s13 = sadd.s32 %s3205_s11, %s3204_s25 }
 0x170   : >>> { %s1527_s14 = sshra.s32 %s5879_s12, 7  ;;  %s1532_s16 = sand.u32 127, %s5879_s12 }
 0x171   : >>> { %s1529_s15 = sadd.s32 %s3811_s10, %s1527_s14  ;;  %s1560_s18 = sadd.s32 1, %s5879_s12 }
 0x172   : >>> { %s3206_s17 = sshll.u32 %s1529_s15, 7  ;;  %s1561_s19 = sshra.s32 %s1560_s18, 7 }
 0x173   : >>> { %s1533_s1 = sadd.s32 %s3206_s17, %s1532_s16  ;;  %s1563_s20 = sadd.s32 %s3811_s10, %s1561_s19 }
 0x174   : >>> { %s1534_s3 = sld [smem:[#allocation8 + %s1533_s1]]  ;;  %s3207_s21 = sshll.u32 %s1563_s20, 7 }
 0x175   : >>> { %s1566_s22 = sand.u32 127, %s1560_s18  ;;  %s1594_s24 = sadd.s32 2, %s5879_s12 }
 0x176   : >>> { %s1567_s23 = sadd.s32 %s3207_s21, %s1566_s22  ;;  %s5887_s27 = scalar_lea.vmem [#allocation2], %s1510_s13 }
 0x177   : >>> { %v1512_v11 = vld [vmem:[%s5887_s27] sm:$0xff]  ;;  %v5891_v13 = vld [vmem:[%s5887_s27 + $0x8] sm:$0xff]  ;;  %v5894_v57 = vld [vmem:[%s5887_s27 + $0x10] sm:$0xff]  ;;  %s5896_s28 = sld [smem:[#allocation8 + %s1567_s23]]  ;;  %s1595_s30 = sshra.s32 %s1594_s24, 7 }
 0x178   : >>> { %v5899_v5 = vld [vmem:[%s5887_s27 + $0x18] sm:$0xff]  ;;  %v5902_v37 = vld [vmem:[%s5887_s27 + $0x20] sm:$0xff]  ;;  %v5905_v62 = vld [vmem:[%s5887_s27 + $0x28] sm:$0xff]  ;;  %s1597_s29 = sadd.s32 %s3811_s10, %s1595_s30  ;;  %s1600_s8 = sand.u32 127, %s1594_s24 }
 0x179   : >>> { %v5909_v49 = vld [vmem:[%s5887_s27 + $0x30] sm:$0xff]  ;;  %v5912_v22 = vld [vmem:[%s5887_s27 + $0x38] sm:$0xff]  ;;  %v5915_v30 = vld [vmem:[%s5887_s27 + $0x40] sm:$0xff]  ;;  %s3208_s9 = sshll.u32 %s1597_s29, 7  ;;  %s1646_s6 = sadd.s32 3, %s5879_s12 }
 0x17a   : >>> { %v5919_v1 = vld [vmem:[%s5887_s27 + $0x48] sm:$0xff]  ;;  %v5922_v46 = vld [vmem:[%s5887_s27 + $0x50] sm:$0xff]  ;;  %v5925_v16 = vld [vmem:[%s5887_s27 + $0x58] sm:$0xff]  ;;  %v5927_v8 = vstv %s1534_s3  ;;  %s1601_s2 = sadd.s32 %s3208_s9, %s1600_s8  ;;  %s1647_s4 = sshra.s32 %s1646_s6, 7 }
 0x17b   : >>> { %v1536_v59 = vmul.f32 %v5927_v8, %v1512_v11  ;;  %v1537_v34 = vmul.f32 %v5927_v8, %v5891_v13  ;;  %v1538_v60 = vmul.f32 %v5927_v8, %v5894_v57  ;;  %v1539_v39 = vmul.f32 %v5927_v8, %v5899_v5  ;;  %s5936_s26 = sld [smem:[#allocation8 + %s1601_s2]]  ;;  %s1649_s25 = sadd.s32 %s3811_s10, %s1647_s4  ;;  %v5960_v0 = vld [vmem:[%s5887_s27 + $0x70] sm:$0xff]  ;;  %v5963_v14 = vld [vmem:[%s5887_s27 + $0x78] sm:$0xff] }
 0x17c   : >>> { %v1540_v25 = vmul.f32 %v5927_v8, %v5902_v37  ;;  %v1541_v56 = vmul.f32 %v5927_v8, %v5905_v62  ;;  %v1542_v48 = vmul.f32 %v5927_v8, %v5909_v49  ;;  %v1543_v24 = vmul.f32 %v5927_v8, %v5912_v22  ;;  %s5955_s11 = sshll.u32 %s1649_s25, 7  ;;  %s1680_s13 = sadd.s32 4, %s5879_s12 }
 0x17d   : >>> { %v1544_v61 = vmul.f32 %v5927_v8, %v5915_v30  ;;  %v1545_v21 = vmul.f32 %v5927_v8, %v5919_v1  ;;  %v1546_v55 = vmul.f32 %v5927_v8, %v5922_v46  ;;  %v1547_v31 = vmul.f32 %v5927_v8, %v5925_v16  ;;  %s5965_s14 = sand.u32 127, %s1646_s6  ;;  %s1681_s15 = sshra.s32 %s1680_s13, 7 }
 0x17e   : >>> { %v1548_v44 = vadd.f32 %v3915_v38, %v1536_v59  ;;  %v1549_v33 = vadd.f32 %v3911_v15, %v1537_v34  ;;  %v1550_v3 = vadd.f32 %v3907_v35, %v1538_v60  ;;  %v1551_v19 = vadd.f32 %v3903_v47, %v1539_v39  ;;  %s1683_s16 = sadd.s32 %s3811_s10, %s1681_s15  ;;  %s5972_s17 = sand.u32 127, %s1680_s13 }
 0x17f   : >>> { %v1552_v45 = vadd.f32 %v3899_v43, %v1540_v25  ;;  %v1553_v63 = vadd.f32 %v3895_v51, %v1541_v56  ;;  %v1554_v52 = vadd.f32 %v3891_v9, %v1542_v48  ;;  %v1555_v7 = vadd.f32 %v3887_v17, %v1543_v24  ;;  %s5978_s18 = sshll.u32 %s1683_s16, 7  ;;  %s1714_s1 = sadd.s32 5, %s5879_s12  ;;  %v1524_v9 = vld [vmem:[%s5887_s27 + $0x60] sm:$0xff] }
 0x180   : >>> { %v1556_v27 = vadd.f32 %v3883_v36, %v1544_v61  ;;  %v1557_v10 = vadd.f32 %v3879_v26, %v1545_v21  ;;  %v1558_v42 = vadd.f32 %v3875_v29, %v1546_v55  ;;  %v1559_v4 = vadd.f32 %v3871_v32, %v1547_v31  ;;  %s1653_s19 = sadd.s32 %s5955_s11, %s5965_s14  ;;  %s1715_s3 = sshra.s32 %s1714_s1, 7  ;;  %v1525_v31 = vld [vmem:[%s5887_s27 + $0x68] sm:$0xff] }
 0x181   : >>> { %v5983_v51 = vstv %s5896_s28  ;;  %v5986_v17 = vstv %s5936_s26  ;;  %v5992_v26 = vmul.f32 %v5960_v0, %v5927_v8  ;;  %v5996_v29 = vmul.f32 %v5963_v14, %v5927_v8  ;;  %s1687_s20 = sadd.s32 %s5978_s18, %s5972_s17  ;;  %s1717_s21 = sadd.s32 %s3811_s10, %s1715_s3 }
 0x182   : >>> { %7882 = vst [vmem:[#allocation45_spill] sm:$0xff] %v5983_v51  ;;  %7883 = vst [vmem:[#allocation46_spill] sm:$0xff] %v5986_v17  ;;  %v1570_v32 = vmul.f32 %v5983_v51, %v5891_v13  ;;  %v1571_v36 = vmul.f32 %v5983_v51, %v5894_v57  ;;  %v1572_v43 = vmul.f32 %v5983_v51, %v5899_v5  ;;  %s3227_s22 = sshll.u32 %s1717_s21, 7  ;;  %s1720_s23 = sand.u32 127, %s1714_s1 }
 0x183   : >>> { %v1573_v47 = vmul.f32 %v5983_v51, %v5902_v37  ;;  %v1574_v35 = vmul.f32 %v5983_v51, %v5905_v62  ;;  %v1575_v15 = vmul.f32 %v5983_v51, %v5909_v49  ;;  %v1576_v38 = vmul.f32 %v5983_v51, %v5912_v22  ;;  %s6024_s24 = sld [smem:[#allocation8 + %s1653_s19]]  ;;  %s1721_s28 = sadd.s32 %s3227_s22, %s1720_s23 }
 0x184   : >>> { %v1577_v11 = vmul.f32 %v5983_v51, %v5915_v30  ;;  %v1578_v13 = vmul.f32 %v5983_v51, %v5919_v1  ;;  %v1579_v59 = vmul.f32 %v5983_v51, %v5922_v46  ;;  %v1580_v34 = vmul.f32 %v5983_v51, %v5925_v16  ;;  %s6026_s30 = sld [smem:[#allocation8 + %s1687_s20]]  ;;  %s1838_s8 = sadd.s32 6, %s5879_s12 }
 0x185   : >>> { %v1581_v60 = vmul.f32 %v5983_v51, %v1524_v9  ;;  %v1582_v39 = vadd.f32 %v1570_v32, %v1548_v44  ;;  %v1583_v25 = vadd.f32 %v1571_v36, %v1549_v33  ;;  %v1584_v56 = vadd.f32 %v1572_v43, %v1550_v3  ;;  %s6028_s29 = sld [smem:[#allocation8 + %s1721_s28]]  ;;  %v6057_v32 = vld [vmem:[%s5887_s27 + $0x88] sm:$0xff]  ;;  %v6060_v36 = vld [vmem:[%s5887_s27 + $0x90] sm:$0xff]  ;;  %v6063_v43 = vld [vmem:[%s5887_s27 + $0x98] sm:$0xff]  ;;  %s1872_s9 = sadd.s32 7, %s5879_s12 }
 0x186   : >>> { %v1585_v48 = vadd.f32 %v1573_v47, %v1551_v19  ;;  %v1586_v24 = vadd.f32 %v1574_v35, %v1552_v45  ;;  %v1587_v61 = vadd.f32 %v1575_v15, %v1553_v63  ;;  %v1588_v21 = vadd.f32 %v1576_v38, %v1554_v52  ;;  %s1906_s6 = sadd.s32 8, %s5879_s12  ;;  %s6171_s2 = sshra.s32 %s1838_s8, 7 }
 0x187   : >>> { %v1589_v55 = vadd.f32 %v1577_v11, %v1555_v7  ;;  %v1590_v23 = vadd.f32 %v1578_v13, %v1556_v27  ;;  %v1591_v41 = vadd.f32 %v1579_v59, %v1557_v10  ;;  %v1592_v58 = vadd.f32 %v1580_v34, %v1558_v42  ;;  %v6054_v7 = vld [vmem:[%s5887_s27 + $0x80] sm:$0xff]  ;;  %v6096_v34 = vld [vmem:[%s5887_s27 + $0xb8] sm:$0xff]  ;;  %s6183_s4 = sshra.s32 %s1872_s9, 7  ;;  %s6195_s26 = sshra.s32 %s1906_s6, 7 }
 0x188   : >>> { %v1593_v51 = vadd.f32 %v1581_v60, %v1559_v4  ;;  %v1604_v6 = vmul.f32 %v5986_v17, %v5894_v57  ;;  %v1605_v44 = vmul.f32 %v5986_v17, %v5899_v5  ;;  %v1606_v33 = vmul.f32 %v5986_v17, %v5902_v37  ;;  %v6099_v60 = vld [vmem:[%s5887_s27 + $0xc0] sm:$0xff]  ;;  %s1841_s25 = sadd.s32 %s3811_s10, %s6171_s2  ;;  %s1875_s11 = sadd.s32 %s3811_s10, %s6183_s4 }
 0x189   : >>> { %v1607_v3 = vmul.f32 %v5986_v17, %v5905_v62  ;;  %v1608_v19 = vmul.f32 %v5986_v17, %v5909_v49  ;;  %v1609_v45 = vmul.f32 %v5986_v17, %v5912_v22  ;;  %v1610_v63 = vmul.f32 %v5986_v17, %v5915_v30  ;;  %s1909_s13 = sadd.s32 %s3811_s10, %s6195_s26  ;;  %s6235_s14 = sshll.u32 %s1841_s25, 7 }
 0x18a   : >>> { %v1611_v57 = vmul.f32 %v5986_v17, %v5919_v1  ;;  %v1612_v5 = vmul.f32 %v5986_v17, %v5922_v46  ;;  %v1613_v37 = vmul.f32 %v5986_v17, %v5925_v16  ;;  %v1614_v62 = vmul.f32 %v5986_v17, %v1524_v9  ;;  %s6239_s15 = sand.u32 127, %s1838_s8  ;;  %s6249_s16 = sshll.u32 %s1875_s11, 7 }
 0x18b   : >>> { %v1615_v49 = vmul.f32 %v5986_v17, %v1525_v31  ;;  %v1616_v22 = vadd.f32 %v1604_v6, %v1582_v39  ;;  %v1617_v52 = vadd.f32 %v1605_v44, %v1583_v25  ;;  %v1618_v30 = vadd.f32 %v1606_v33, %v1584_v56  ;;  %v6102_v39 = vld [vmem:[%s5887_s27 + $0xc8] sm:$0xff]  ;;  %s6253_s17 = sand.u32 127, %s1872_s9  ;;  %s6259_s18 = sshll.u32 %s1909_s13, 7 }
 0x18c   : >>> { %v1619_v1 = vadd.f32 %v1607_v3, %v1585_v48  ;;  %v1620_v46 = vadd.f32 %v1608_v19, %v1586_v24  ;;  %v1621_v16 = vadd.f32 %v1609_v45, %v1587_v61  ;;  %v1622_v27 = vadd.f32 %v1610_v63, %v1588_v21  ;;  %s6263_s1 = sand.u32 127, %s1906_s6  ;;  %s1845_s19 = sadd.s32 %s6235_s14, %s6239_s15 }
 0x18d   : >>> { %v1623_v10 = vadd.f32 %v1611_v57, %v1589_v55  ;;  %v1624_v42 = vadd.f32 %v1612_v5, %v1590_v23  ;;  %v1625_v4 = vadd.f32 %v1613_v37, %v1591_v41  ;;  %v1626_v9 = vadd.f32 %v1614_v62, %v1592_v58  ;;  %v6079_v41 = vld [vmem:[%s5887_s27 + $0xa0] sm:$0xff]  ;;  %v6082_v58 = vld [vmem:[%s5887_s27 + $0xa8] sm:$0xff]  ;;  %s1879_s12 = sadd.s32 %s6249_s16, %s6253_s17  ;;  %s1913_s3 = sadd.s32 %s6259_s18, %s6263_s1 }
 0x18e   : >>> { %v1627_v6 = vadd.f32 %v1615_v49, %v1593_v51  ;;  %v6066_v47 = vstv %s6024_s24  ;;  %v6069_v35 = vstv %s6026_s30  ;;  %v6072_v15 = vstv %s6028_s29  ;;  %v6085_v51 = vld [vmem:[%s5887_s27 + $0xb0] sm:$0xff]  ;;  %s6298_s20 = sld [smem:[#allocation8 + %s1845_s19]]  ;;  %s3203_s23 = sshll.u32 %s3919_s0, 1 }
 0x18f   : >>> { %7884 = vst [vmem:[#allocation47_spill] sm:$0xff] %v6069_v35  ;;  %7885 = vst [vmem:[#allocation48_spill] sm:$0xff] %v6072_v15  ;;  %v6076_v23 = vmul.f32 %v6054_v7, %v5927_v8  ;;  %v1656_v38 = vmul.f32 %v5960_v0, %v6066_v47  ;;  %v1657_v11 = vmul.f32 %v5963_v14, %v6066_v47  ;;  %s6302_s21 = sld [smem:[#allocation8 + %s1879_s12]]  ;;  %s2102_s24 = sadd.s32 1, %s3203_s23 }
 0x190   : >>> { %v1658_v13 = vmul.f32 %v6054_v7, %v6066_v47  ;;  %v1659_v59 = vmul.f32 %v6057_v32, %v6066_v47  ;;  %v1660_v25 = vmul.f32 %v6060_v36, %v6066_v47  ;;  %v1661_v0 = vmul.f32 %v6063_v43, %v6066_v47  ;;  %s6304_s22 = sld [smem:[#allocation8 + %s1913_s3]]  ;;  %s6550_s28 = smul.u32 9, %s2102_s24 }
 0x191   : >>> { %v1662_v56 = vmul.f32 %v6079_v41, %v6066_v47  ;;  %v1663_v48 = vmul.f32 %v6082_v58, %v6066_v47  ;;  %v1664_v24 = vmul.f32 %v6085_v51, %v6066_v47  ;;  %v1665_v61 = vmul.f32 %v6096_v34, %v6066_v47  ;;  %s1482_s0 = sadd.s32 1, %s3919_s0  }
 0x192   : >>> { %v1666_v21 = vmul.f32 %v6099_v60, %v6066_v47  ;;  %v1667_v55 = vmul.f32 %v6102_v39, %v6066_v47  ;;  %v1668_v31 = vadd.f32 %v1656_v38, %v1616_v22  ;;  %v1669_v44 = vadd.f32 %v1657_v11, %v1617_v52  ;;  %s2121_s30 = sshra.s32 %s6550_s28, 7  ;;  %s2154_s29 = sadd.s32 1, %s6550_s28 }
 0x193   : >>> { %v1670_v33 = vadd.f32 %v1658_v13, %v1618_v30  ;;  %v1671_v3 = vadd.f32 %v1659_v59, %v1619_v1  ;;  %v1672_v19 = vadd.f32 %v1660_v25, %v1620_v46  ;;  %v1673_v45 = vadd.f32 %v1661_v0, %v1621_v16  ;;  %v6129_v30 = vld [vmem:[%s5887_s27 + $0xd0] sm:$0xff]  ;;  %s6587_s8 = sadd.s32 %s3811_s10, %s2121_s30  ;;  %s2188_s9 = sadd.s32 2, %s6550_s28 }
 0x194   : >>> { %v1674_v63 = vadd.f32 %v1662_v56, %v1622_v27  ;;  %v1675_v57 = vadd.f32 %v1663_v48, %v1623_v10  ;;  %v1676_v5 = vadd.f32 %v1664_v24, %v1624_v42  ;;  %v1677_v37 = vadd.f32 %v1665_v61, %v1625_v4  ;;  %s2238_s6 = sadd.s32 3, %s6550_s28  ;;  %s6616_s2 = sshra.s32 %s2154_s29, 7 }
 0x195   : >>> { %v1678_v62 = vadd.f32 %v1666_v21, %v1626_v9  ;;  %v1679_v49 = vadd.f32 %v1667_v55, %v1627_v6  ;;  %v1690_v17 = vmul.f32 %v5963_v14, %v6069_v35  ;;  %v1691_v40 = vmul.f32 %v6054_v7, %v6069_v35  ;;  %s3279_s4 = sshll.u32 %s6587_s8, 7  ;;  %s6630_s26 = sshra.s32 %s2188_s9, 7 }
 0x196   : >>> { %v1692_v22 = vmul.f32 %v6057_v32, %v6069_v35  ;;  %v1693_v52 = vmul.f32 %v6060_v36, %v6069_v35  ;;  %v1694_v1 = vmul.f32 %v6063_v43, %v6069_v35  ;;  %v1695_v46 = vmul.f32 %v6079_v41, %v6069_v35  ;;  %s2126_s25 = sand.u32 127, %s6550_s28  ;;  %s6644_s11 = sshra.s32 %s2238_s6, 7 }
 0x197   : >>> { %v1696_v16 = vmul.f32 %v6082_v58, %v6069_v35  ;;  %v1697_v27 = vmul.f32 %v6085_v51, %v6069_v35  ;;  %v1698_v10 = vmul.f32 %v6096_v34, %v6069_v35  ;;  %v1699_v42 = vmul.f32 %v6099_v60, %v6069_v35  ;;  %s2157_s13 = sadd.s32 %s3811_s10, %s6616_s2  ;;  %s2191_s14 = sadd.s32 %s3811_s10, %s6630_s26 }
 0x198   : >>> { %v1700_v4 = vmul.f32 %v6102_v39, %v6069_v35  ;;  %v1701_v9 = vmul.f32 %v6129_v30, %v6069_v35  ;;  %v1702_v6 = vadd.f32 %v1690_v17, %v1668_v31  ;;  %v1703_v38 = vadd.f32 %v1691_v40, %v1669_v44  ;;  %v6159_v44 = vld [vmem:[%s5887_s27 + $0xd8] sm:$0xff]  ;;  %s6674_s15 = sadd.s32 %s3279_s4, %s2126_s25  ;;  %s2241_s16 = sadd.s32 %s3811_s10, %s6644_s11 }
 0x199   : >>> { %v1704_v11 = vadd.f32 %v1692_v22, %v1670_v33  ;;  %v1705_v13 = vadd.f32 %v1693_v52, %v1671_v3  ;;  %v1706_v59 = vadd.f32 %v1694_v1, %v1672_v19  ;;  %v1707_v25 = vadd.f32 %v1695_v46, %v1673_v45  ;;  %s6686_s17 = sshll.u32 %s2157_s13, 7  ;;  %s6690_s18 = sand.u32 127, %s2154_s29 }
 0x19a   : >>> { %v1708_v0 = vadd.f32 %v1696_v16, %v1674_v63  ;;  %v1709_v56 = vadd.f32 %v1697_v27, %v1675_v57  ;;  %v1710_v48 = vadd.f32 %v1698_v10, %v1676_v5  ;;  %v1711_v24 = vadd.f32 %v1699_v42, %v1677_v37  ;;  %s6692_s1 = sshll.u32 %s2191_s14, 7  ;;  %s6696_s19 = sand.u32 127, %s2188_s9 }
 0x19b   : >>> { %v1712_v61 = vadd.f32 %v1700_v4, %v1678_v62  ;;  %v1713_v21 = vadd.f32 %v1701_v9, %v1679_v49  ;;  %v1724_v17 = vmul.f32 %v6054_v7, %v6072_v15  ;;  %v1725_v40 = vmul.f32 %v6057_v32, %v6072_v15  ;;  %s6698_s12 = sshll.u32 %s2241_s16, 7  ;;  %s6702_s3 = sand.u32 127, %s2238_s6 }
 0x19c   : >>> { %v1726_v55 = vmul.f32 %v6060_v36, %v6072_v15  ;;  %v1727_v31 = vmul.f32 %v6063_v43, %v6072_v15  ;;  %v1728_v33 = vmul.f32 %v6079_v41, %v6072_v15  ;;  %v1729_v3 = vmul.f32 %v6082_v58, %v6072_v15  ;;  %s2245_s23 = sadd.s32 %s6698_s12, %s6702_s3  ;;  %s2272_s8 = sadd.s32 4, %s6550_s28 }
 0x19d   : >>> { %v1730_v19 = vmul.f32 %v6085_v51, %v6072_v15  ;;  %v1731_v45 = vmul.f32 %v6096_v34, %v6072_v15  ;;  %v1732_v63 = vmul.f32 %v6099_v60, %v6072_v15  ;;  %v1733_v57 = vmul.f32 %v6102_v39, %v6072_v15  ;;  %s6741_s29 = sld [smem:[#allocation8 + %s2245_s23]]  ;;  %s2306_s9 = sadd.s32 5, %s6550_s28 }
 0x19e   : >>> { %v1734_v5 = vmul.f32 %v6129_v30, %v6072_v15  ;;  %v1735_v37 = vmul.f32 %v6159_v44, %v6072_v15  ;;  %v6185_v62 = vadd.f32 %v1724_v17, %v1702_v6  ;;  %v6187_v49 = vadd.f32 %v1725_v40, %v1703_v38  ;;  %v7891_v15 = vld [vmem:[#allocation46_spill] sm:$0xff]  ;;  %s6864_s6 = sshra.s32 %s2272_s8, 7  ;;  %s6872_s2 = sshra.s32 %s2306_s9, 7 }
 0x19f   : >>> { %v6189_v22 = vadd.f32 %v1726_v55, %v1704_v11  ;;  %v6191_v52 = vadd.f32 %v1727_v31, %v1705_v13  ;;  %v6197_v1 = vadd.f32 %v1728_v33, %v1706_v59  ;;  %v6199_v46 = vadd.f32 %v1729_v3, %v1707_v25  ;;  %v7890_v31 = vld [vmem:[#allocation45_spill] sm:$0xff]  ;;  %s2275_s4 = sadd.s32 %s3811_s10, %s6864_s6  ;;  %s2309_s26 = sadd.s32 %s3811_s10, %s6872_s2 }
 0x1a0   : >>> { %v6201_v16 = vadd.f32 %v1730_v19, %v1708_v0  ;;  %v6203_v27 = vadd.f32 %v1731_v45, %v1709_v56  ;;  %v6207_v10 = vadd.f32 %v1732_v63, %v1710_v48  ;;  %v6209_v42 = vadd.f32 %v1733_v57, %v1711_v24  ;;  %s6905_s25 = sshll.u32 %s2275_s4, 7  ;;  %s6909_s11 = sand.u32 127, %s2272_s8 }
 0x1a1   : >>> { %v6211_v4 = vadd.f32 %v1734_v5, %v1712_v61  ;;  %v6213_v9 = vadd.f32 %v1735_v37, %v1713_v21  ;;  %v1751_v6 = vmul.f32 %v6057_v32, %v5927_v8  ;;  %v1752_v38 = vmul.f32 %v6060_v36, %v5927_v8  ;;  %s6911_s13 = sshll.u32 %s2309_s26, 7  ;;  %s6915_s14 = sand.u32 127, %s2306_s9 }
 0x1a2   : >>> { %v1753_v11 = vmul.f32 %v6063_v43, %v5927_v8  ;;  %v1754_v13 = vmul.f32 %v6079_v41, %v5927_v8  ;;  %v1755_v59 = vmul.f32 %v6082_v58, %v5927_v8  ;;  %v1756_v25 = vmul.f32 %v6085_v51, %v5927_v8  ;;  %s2313_s16 = sadd.s32 %s6911_s13, %s6915_s14  ;;  %s2496_s9 = sadd.s32 8, %s6550_s28 }
 0x1a3   : >>> { %v1757_v0 = vmul.f32 %v6096_v34, %v5927_v8  ;;  %v1758_v56 = vmul.f32 %v6099_v60, %v5927_v8  ;;  %v1759_v48 = vmul.f32 %v6102_v39, %v5927_v8  ;;  %v1760_v24 = vadd.f32 %v3867_v50, %v5992_v26  ;;  %s7188_s4 = sshra.s32 %s2496_s9, 7  ;;  %p7583_p13 = scmp.ge.s32.totalorder %s1482_s0, 4  }
 0x1a4   : >>> { %v1761_v61 = vadd.f32 %v3863_v18, %v5996_v29  ;;  %v1762_v21 = vadd.f32 %v3859_v28, %v6076_v23  ;;  %v1763_v8 = vadd.f32 %v3855_v20, %v1751_v6  ;;  %v1764_v17 = vadd.f32 %v3851_v2, %v1752_v38  ;;  %v7886_v18 = vld [vmem:[#allocation44_spill] sm:$0xff]  ;;  %v7887_v29 = vld [vmem:[#allocation43_spill] sm:$0xff]  ;;  %v7888_v20 = vld [vmem:[#allocation42_spill] sm:$0xff]  ;;  %s2499_s26 = sadd.s32 %s3811_s10, %s7188_s4  ;;  %s2693_s14 = sld [smem:[#allocation9 + %s3811_s10]] (%p7583_p13) }
 0x1a5   : >>> { %v1765_v40 = vadd.f32 %v3847_v54, %v1753_v11  ;;  %v1766_v50 = vadd.f32 %v3843_v53, %v1754_v13  ;;  %v1767_v28 = vadd.f32 %v3839_v12, %v1755_v59  ;;  %v1768_v26 = vadd.f32 %v7886_v18, %v1756_v25  ;;  %v7889_v2 = vld [vmem:[#allocation41_spill] sm:$0xff] }
 0x1a6   : >>> { %v1769_v23 = vadd.f32 %v7887_v29, %v1757_v0  ;;  %v1770_v55 = vadd.f32 %v7888_v20, %v1758_v56  ;;  %v1771_v54 = vadd.f32 %v7889_v2, %v1759_v48  ;;  %v1772_v53 = vmul.f32 %v5963_v14, %v7890_v31 }
 0x1a7   : >>> { %v1773_v33 = vmul.f32 %v6054_v7, %v7890_v31  ;;  %v1774_v3 = vmul.f32 %v6057_v32, %v7890_v31  ;;  %v1775_v12 = vmul.f32 %v6060_v36, %v7890_v31  ;;  %v1776_v19 = vmul.f32 %v6063_v43, %v7890_v31 }
 0x1a8   : >>> { %v1777_v45 = vmul.f32 %v6079_v41, %v7890_v31  ;;  %v1778_v63 = vmul.f32 %v6082_v58, %v7890_v31  ;;  %v1779_v14 = vmul.f32 %v6085_v51, %v7890_v31  ;;  %v1780_v57 = vmul.f32 %v6096_v34, %v7890_v31 }
 0x1a9   : >>> { %v1781_v5 = vmul.f32 %v6099_v60, %v7890_v31  ;;  %v1782_v37 = vmul.f32 %v6102_v39, %v7890_v31  ;;  %v1783_v6 = vmul.f32 %v6129_v30, %v7890_v31  ;;  %v1784_v38 = vadd.f32 %v1772_v53, %v1760_v24  ;;  %v6365_v31 = vld [vmem:[%s5887_s27 + $0x100] sm:$0xff] }
 0x1aa   : >>> { %v1785_v11 = vadd.f32 %v1773_v33, %v1761_v61  ;;  %v1786_v13 = vadd.f32 %v1774_v3, %v1762_v21  ;;  %v1787_v59 = vadd.f32 %v1775_v12, %v1763_v8  ;;  %v1788_v25 = vadd.f32 %v1776_v19, %v1764_v17  ;;  %v6370_v33 = vld [vmem:[%s5887_s27 + $0x108] sm:$0xff] }
 0x1ab   : >>> { %v1789_v0 = vadd.f32 %v1777_v45, %v1765_v40  ;;  %v1790_v56 = vadd.f32 %v1778_v63, %v1766_v50  ;;  %v1791_v48 = vadd.f32 %v1779_v14, %v1767_v28  ;;  %v1792_v18 = vadd.f32 %v1780_v57, %v1768_v26  ;;  %v6382_v45 = vld [vmem:[%s5887_s27 + $0x110] sm:$0xff]  ;;  %v6385_v63 = vld [vmem:[%s5887_s27 + $0x118] sm:$0xff]  ;;  %v6388_v14 = vld [vmem:[%s5887_s27 + $0x120] sm:$0xff] }
 0x1ac   : >>> { %v1793_v29 = vadd.f32 %v1781_v5, %v1769_v23  ;;  %v1794_v20 = vadd.f32 %v1782_v37, %v1770_v55  ;;  %v1795_v2 = vadd.f32 %v1783_v6, %v1771_v54  ;;  %v1796_v35 = vmul.f32 %v6054_v7, %v7891_v15  ;;  %v6359_v55 = vld [vmem:[%s5887_s27 + $0xf0] sm:$0xff]  ;;  %v6362_v54 = vld [vmem:[%s5887_s27 + $0xf8] sm:$0xff] }
 0x1ad   : >>> { %v1797_v24 = vmul.f32 %v6057_v32, %v7891_v15  ;;  %v1798_v61 = vmul.f32 %v6060_v36, %v7891_v15  ;;  %v1799_v21 = vmul.f32 %v6063_v43, %v7891_v15  ;;  %v1800_v8 = vmul.f32 %v6079_v41, %v7891_v15 }
 0x1ae   : >>> { %v1801_v17 = vmul.f32 %v6082_v58, %v7891_v15  ;;  %v1802_v7 = vmul.f32 %v6085_v51, %v7891_v15  ;;  %v1803_v32 = vmul.f32 %v6096_v34, %v7891_v15  ;;  %v1804_v36 = vmul.f32 %v6099_v60, %v7891_v15 }
 0x1af   : >>> { %v1805_v43 = vmul.f32 %v6102_v39, %v7891_v15  ;;  %v1806_v41 = vmul.f32 %v6129_v30, %v7891_v15  ;;  %v1807_v58 = vmul.f32 %v6159_v44, %v7891_v15  ;;  %v6330_v40 = vadd.f32 %v1796_v35, %v1784_v38  ;;  %v6345_v35 = vld [vmem:[%s5887_s27 + $0xe0] sm:$0xff]  ;;  %v6348_v15 = vld [vmem:[%s5887_s27 + $0xe8] sm:$0xff] }
 0x1b0   : >>> { %v6332_v51 = vadd.f32 %v1797_v24, %v1785_v11  ;;  %v6334_v34 = vadd.f32 %v1798_v61, %v1786_v13  ;;  %v6336_v60 = vadd.f32 %v1799_v21, %v1787_v59  ;;  %v6338_v39 = vadd.f32 %v1800_v8, %v1788_v25  ;;  %v6399_v38 = vld [vmem:[%s5887_s27 + $0x128] sm:$0xff]  ;;  %v6402_v11 = vld [vmem:[%s5887_s27 + $0x130] sm:$0xff]  ;;  %v6405_v13 = vld [vmem:[%s5887_s27 + $0x138] sm:$0xff] }
 0x1b1   : >>> { %v6340_v30 = vadd.f32 %v1801_v17, %v1789_v0  ;;  %v6342_v50 = vadd.f32 %v1802_v7, %v1790_v56  ;;  %v6350_v44 = vadd.f32 %v1803_v32, %v1791_v48  ;;  %v6352_v28 = vadd.f32 %v1804_v36, %v1792_v18 }
 0x1b2   : >>> { %v6354_v26 = vadd.f32 %v1805_v43, %v1793_v29  ;;  %v6356_v23 = vadd.f32 %v1806_v41, %v1794_v20  ;;  %v6367_v53 = vadd.f32 %v1807_v58, %v1795_v2  ;;  %v6373_v3 = vstv %s6298_s20  ;;  %s2161_s20 = sadd.s32 %s6686_s17, %s6690_s18  ;;  %s6953_s18 = sld [smem:[#allocation8 + %s2313_s16]] }
 0x1b3   : >>> { %7894 = vst [vmem:[#allocation42_spill] sm:$0xff] %v6373_v3  ;;  %v6376_v12 = vstv %s6302_s21  ;;  %v6379_v19 = vstv %s6304_s22  ;;  %v1848_v57 = vmul.f32 %v6345_v35, %v6373_v3  ;;  %v1849_v5 = vmul.f32 %v6348_v15, %v6373_v3  ;;  %s2195_s21 = sadd.s32 %s6692_s1, %s6696_s19  ;;  %s6726_s22 = sld [smem:[#allocation8 + %s6674_s15]] }
 0x1b4   : >>> { %7892 = vst [vmem:[#allocation44_spill] sm:$0xff] %v6356_v23  ;;  %7893 = vst [vmem:[#allocation43_spill] sm:$0xff] %v6367_v53  ;;  %v1850_v37 = vmul.f32 %v6359_v55, %v6373_v3  ;;  %v1851_v6 = vmul.f32 %v6362_v54, %v6373_v3  ;;  %v1852_v59 = vmul.f32 %v6365_v31, %v6373_v3  ;;  %s6737_s24 = sld [smem:[#allocation8 + %s2161_s20]]  ;;  %s2279_s15 = sadd.s32 %s6905_s25, %s6909_s11 }
 0x1b5   : >>> { %v1853_v25 = vmul.f32 %v6370_v33, %v6373_v3  ;;  %v1854_v0 = vmul.f32 %v6382_v45, %v6373_v3  ;;  %v1855_v56 = vmul.f32 %v6385_v63, %v6373_v3  ;;  %v1856_v48 = vmul.f32 %v6388_v14, %v6373_v3  ;;  %s6739_s30 = sld [smem:[#allocation8 + %s2195_s21]]  ;;  %s2428_s1 = sadd.s32 6, %s6550_s28 }
 0x1b6   : >>> { %v1857_v18 = vmul.f32 %v6399_v38, %v6373_v3  ;;  %v1858_v29 = vmul.f32 %v6402_v11, %v6373_v3  ;;  %v1859_v20 = vmul.f32 %v6405_v13, %v6373_v3  ;;  %v1860_v2 = vadd.f32 %v1848_v57, %v6185_v62  ;;  %s6944_s17 = sld [smem:[#allocation8 + %s2279_s15]]  ;;  %s2462_s19 = sadd.s32 7, %s6550_s28 }
 0x1b7   : >>> { %v1861_v24 = vadd.f32 %v1849_v5, %v6187_v49  ;;  %v1862_v61 = vadd.f32 %v1850_v37, %v6189_v22  ;;  %v1863_v21 = vadd.f32 %v1851_v6, %v6191_v52  ;;  %v1864_v8 = vadd.f32 %v1852_v59, %v6197_v1  ;;  %s2429_s12 = sshra.s32 %s2428_s1, 7  ;;  %s7086_s3 = sshra.s32 %s2462_s19, 7 }
 0x1b8   : >>> { %v1865_v17 = vadd.f32 %v1853_v25, %v6199_v46  ;;  %v1866_v7 = vadd.f32 %v1854_v0, %v6201_v16  ;;  %v1867_v32 = vadd.f32 %v1855_v56, %v6203_v27  ;;  %v1868_v36 = vadd.f32 %v1856_v48, %v6207_v10  ;;  %v6444_v16 = vld [vmem:[%s5887_s27 + $0x140] sm:$0xff]  ;;  %s2431_s20 = sadd.s32 %s3811_s10, %s2429_s12  ;;  %s2465_s21 = sadd.s32 %s3811_s10, %s7086_s3 }
 0x1b9   : >>> { %v1869_v43 = vadd.f32 %v1857_v18, %v6209_v42  ;;  %v1870_v62 = vadd.f32 %v1858_v29, %v6211_v4  ;;  %v1871_v49 = vadd.f32 %v1859_v20, %v6213_v9  ;;  %v1882_v22 = vmul.f32 %v6348_v15, %v6376_v12  ;;  %s7135_s23 = sand.u32 127, %s2428_s1  ;;  %s7248_s25 = sshll.u32 %s2499_s26, 7 }
 0x1ba   : >>> { %v1883_v52 = vmul.f32 %v6359_v55, %v6376_v12  ;;  %v1884_v1 = vmul.f32 %v6362_v54, %v6376_v12  ;;  %v1885_v46 = vmul.f32 %v6365_v31, %v6376_v12  ;;  %v1886_v27 = vmul.f32 %v6370_v33, %v6376_v12  ;;  %s7252_s11 = sand.u32 127, %s2496_s9  ;;  %s7661_s15 = smul.u32 (%p7583_p13), 6, %s3819_s5 }
 0x1bb   : >>> { %v1887_v10 = vmul.f32 %v6382_v45, %v6376_v12  ;;  %v1888_v42 = vmul.f32 %v6385_v63, %v6376_v12  ;;  %v1889_v4 = vmul.f32 %v6388_v14, %v6376_v12  ;;  %v1890_v9 = vmul.f32 %v6399_v38, %v6376_v12  ;;  %s2503_s28 = sadd.s32 %s7248_s25, %s7252_s11  ;;  %s1474_s5 = sadd.s32 (%p7583_p13), 1, %s3819_s5  }
 0x1bc   : >>> { %v1891_v41 = vmul.f32 %v6402_v11, %v6376_v12  ;;  %v1892_v58 = vmul.f32 %v6405_v13, %v6376_v12  ;;  %v1893_v57 = vmul.f32 %v6444_v16, %v6376_v12  ;;  %v1894_v5 = vadd.f32 %v1882_v22, %v1860_v2  ;;  %s2504_s13 = sld [smem:[#allocation8 + %s2503_s28]]  ;;  %s2698_s0 = sshra.s32 (%p7583_p13), %s7661_s15, 7 }
 0x1bd   : >>> { %v1895_v37 = vadd.f32 %v1883_v52, %v1861_v24  ;;  %v1896_v6 = vadd.f32 %v1884_v1, %v1862_v61  ;;  %v1897_v59 = vadd.f32 %v1885_v46, %v1863_v21  ;;  %v1898_v25 = vadd.f32 %v1886_v27, %v1864_v8  ;;  %v6471_v61 = vld [vmem:[%s5887_s27 + $0x148] sm:$0xff]  ;;  %s2703_s16 = sand.u32 (%p7583_p13), 127, %s7661_s15  ;;  %s2748_s4 = sadd.s32 (%p7583_p13), 3, %s7661_s15 }
 0x1be   : >>> { %v1899_v0 = vadd.f32 %v1887_v10, %v1865_v17  ;;  %v1900_v56 = vadd.f32 %v1888_v42, %v1866_v7  ;;  %v1901_v48 = vadd.f32 %v1889_v4, %v1867_v32  ;;  %v1902_v18 = vadd.f32 %v1890_v9, %v1868_v36  ;;  %s2749_s25 = sshra.s32 (%p7583_p13), %s2748_s4, 7  ;;  %s2754_s28 = sand.u32 (%p7583_p13), 127, %s2748_s4 }
 0x1bf   : >>> { %v1903_v29 = vadd.f32 %v1891_v41, %v1869_v43  ;;  %v1904_v20 = vadd.f32 %v1892_v58, %v1870_v62  ;;  %v1905_v3 = vadd.f32 %v1893_v57, %v1871_v49  ;;  %v1916_v53 = vmul.f32 %v6359_v55, %v6379_v19  ;;  %s2751_s11 = sadd.s32 (%p7583_p13), %s3811_s10, %s2749_s25  ;;  %p1471_p0 = scmp.ge.s32.totalorder (%p7583_p13), %s1474_s5, 6  }
 0x1c0   : >>> { %v1917_v23 = vmul.f32 %v6362_v54, %v6379_v19  ;;  %v1918_v2 = vmul.f32 %v6365_v31, %v6379_v19  ;;  %v1919_v24 = vmul.f32 %v6370_v33, %v6379_v19  ;;  %v1920_v21 = vmul.f32 %v6382_v45, %v6379_v19 }
 0x1c1   : >>> { %v1921_v8 = vmul.f32 %v6385_v63, %v6379_v19  ;;  %v1922_v17 = vmul.f32 %v6388_v14, %v6379_v19  ;;  %v1923_v7 = vmul.f32 %v6399_v38, %v6379_v19  ;;  %v1924_v32 = vmul.f32 %v6402_v11, %v6379_v19 }
 0x1c2   : >>> { %v1925_v36 = vmul.f32 %v6405_v13, %v6379_v19  ;;  %v1926_v43 = vmul.f32 %v6444_v16, %v6379_v19  ;;  %v1927_v62 = vmul.f32 %v6471_v61, %v6379_v19  ;;  %v6489_v49 = vadd.f32 %v1916_v53, %v1894_v5 }
 0x1c3   : >>> { %v6491_v22 = vadd.f32 %v1917_v23, %v1895_v37  ;;  %v6493_v52 = vadd.f32 %v1918_v2, %v1896_v6  ;;  %v6495_v1 = vadd.f32 %v1919_v24, %v1897_v59  ;;  %v6497_v46 = vadd.f32 %v1920_v21, %v1898_v25 }
 0x1c4   : >>> { %v6499_v27 = vadd.f32 %v1921_v8, %v1899_v0  ;;  %v6501_v10 = vadd.f32 %v1922_v17, %v1900_v56  ;;  %v6503_v42 = vadd.f32 %v1923_v7, %v1901_v48  ;;  %v6506_v4 = vadd.f32 %v1924_v32, %v1902_v18  ;;  %v7895_v7 = vld [vmem:[#allocation44_spill] sm:$0xff]  ;;  %v7896_v32 = vld [vmem:[#allocation43_spill] sm:$0xff] }
 0x1c5   : >>> { %v6508_v9 = vadd.f32 %v1925_v36, %v1903_v29  ;;  %v6510_v53 = vadd.f32 %v1926_v43, %v1904_v20  ;;  %v6512_v23 = vadd.f32 %v1927_v62, %v1905_v3  ;;  %v1940_v41 = vmul.f32 %v6345_v35, %v6066_v47 }
 0x1c6   : >>> { %v1941_v58 = vmul.f32 %v6348_v15, %v6066_v47  ;;  %v1942_v57 = vmul.f32 %v6359_v55, %v6066_v47  ;;  %v1943_v5 = vmul.f32 %v6362_v54, %v6066_v47  ;;  %v1944_v37 = vmul.f32 %v6365_v31, %v6066_v47 }
 0x1c7   : >>> { %v1945_v6 = vmul.f32 %v6370_v33, %v6066_v47  ;;  %v1946_v3 = vmul.f32 %v6382_v45, %v6066_v47  ;;  %v1947_v35 = vmul.f32 %v6385_v63, %v6066_v47  ;;  %v1948_v59 = vmul.f32 %v6388_v14, %v6066_v47 }
 0x1c8   : >>> { %v1949_v25 = vmul.f32 %v6399_v38, %v6066_v47  ;;  %v1950_v0 = vmul.f32 %v6402_v11, %v6066_v47  ;;  %v1951_v56 = vmul.f32 %v6405_v13, %v6066_v47  ;;  %v1952_v48 = vadd.f32 %v1940_v41, %v6330_v40 }
 0x1c9   : >>> { %v1953_v18 = vadd.f32 %v1941_v58, %v6332_v51  ;;  %v1954_v29 = vadd.f32 %v1942_v57, %v6334_v34  ;;  %v1955_v20 = vadd.f32 %v1943_v5, %v6336_v60  ;;  %v1956_v2 = vadd.f32 %v1944_v37, %v6338_v39  ;;  %v7897_v34 = vld [vmem:[#allocation47_spill] sm:$0xff] }
 0x1ca   : >>> { %v1957_v24 = vadd.f32 %v1945_v6, %v6340_v30  ;;  %v1958_v21 = vadd.f32 %v1946_v3, %v6342_v50  ;;  %v1959_v8 = vadd.f32 %v1947_v35, %v6350_v44  ;;  %v1960_v17 = vadd.f32 %v1948_v59, %v6352_v28 }
 0x1cb   : >>> { %v1961_v47 = vadd.f32 %v1949_v25, %v6354_v26  ;;  %v1962_v40 = vadd.f32 %v1950_v0, %v7895_v7  ;;  %v1963_v51 = vadd.f32 %v1951_v56, %v7896_v32  ;;  %v1964_v60 = vmul.f32 %v6348_v15, %v7897_v34  ;;  %v7898_v32 = vld [vmem:[#allocation48_spill] sm:$0xff] }
 0x1cc   : >>> { %v1965_v39 = vmul.f32 %v6359_v55, %v7897_v34  ;;  %v1966_v30 = vmul.f32 %v6362_v54, %v7897_v34  ;;  %v1967_v50 = vmul.f32 %v6365_v31, %v7897_v34  ;;  %v1968_v44 = vmul.f32 %v6370_v33, %v7897_v34 }
 0x1cd   : >>> { %v1969_v28 = vmul.f32 %v6382_v45, %v7897_v34  ;;  %v1970_v26 = vmul.f32 %v6385_v63, %v7897_v34  ;;  %v1971_v15 = vmul.f32 %v6388_v14, %v7897_v34  ;;  %v1972_v36 = vmul.f32 %v6399_v38, %v7897_v34 }
 0x1ce   : >>> { %v1973_v43 = vmul.f32 %v6402_v11, %v7897_v34  ;;  %v1974_v62 = vmul.f32 %v6405_v13, %v7897_v34  ;;  %v1975_v41 = vmul.f32 %v6444_v16, %v7897_v34  ;;  %v1976_v58 = vadd.f32 %v1964_v60, %v1952_v48 }
 0x1cf   : >>> { %v1977_v57 = vadd.f32 %v1965_v39, %v1953_v18  ;;  %v1978_v5 = vadd.f32 %v1966_v30, %v1954_v29  ;;  %v1979_v37 = vadd.f32 %v1967_v50, %v1955_v20  ;;  %v1980_v6 = vadd.f32 %v1968_v44, %v1956_v2  ;;  %v6633_v39 = vld [vmem:[%s5887_s27 + $0x180] sm:$0xff]  ;;  %v6636_v30 = vld [vmem:[%s5887_s27 + $0x188] sm:$0xff]  ;;  %v6639_v50 = vld [vmem:[%s5887_s27 + $0x190] sm:$0xff] }
 0x1d0   : >>> { %v1981_v3 = vadd.f32 %v1969_v28, %v1957_v24  ;;  %v1982_v35 = vadd.f32 %v1970_v26, %v1958_v21  ;;  %v1983_v59 = vadd.f32 %v1971_v15, %v1959_v8  ;;  %v1984_v25 = vadd.f32 %v1972_v36, %v1960_v17  ;;  %v3249_v24 = vld [vmem:[%s5887_s27 + $0x150] sm:$0xff]  ;;  %v6609_v21 = vld [vmem:[%s5887_s27 + $0x158] sm:$0xff]  ;;  %v6619_v17 = vld [vmem:[%s5887_s27 + $0x168] sm:$0xff] }
 0x1d1   : >>> { %v1985_v0 = vadd.f32 %v1973_v43, %v1961_v47  ;;  %v1986_v56 = vadd.f32 %v1974_v62, %v1962_v40  ;;  %v1987_v7 = vadd.f32 %v1975_v41, %v1963_v51  ;;  %v1988_v48 = vmul.f32 %v6359_v55, %v7898_v32  ;;  %v6625_v47 = vld [vmem:[%s5887_s27 + $0x178] sm:$0xff]  ;;  %v6650_v43 = vld [vmem:[%s5887_s27 + $0x1a0] sm:$0xff]  ;;  %v6653_v62 = vld [vmem:[%s5887_s27 + $0x1a8] sm:$0xff] }
 0x1d2   : >>> { %v1989_v18 = vmul.f32 %v6362_v54, %v7898_v32  ;;  %v1990_v29 = vmul.f32 %v6365_v31, %v7898_v32  ;;  %v1991_v20 = vmul.f32 %v6370_v33, %v7898_v32  ;;  %v1992_v2 = vmul.f32 %v6382_v45, %v7898_v32  ;;  %v6647_v36 = vld [vmem:[%s5887_s27 + $0x198] sm:$0xff]  ;;  %v7899_v41 = vld [vmem:[#allocation42_spill] sm:$0xff] }
 0x1d3   : >>> { %v1993_v55 = vmul.f32 %v6385_v63, %v7898_v32  ;;  %v1994_v54 = vmul.f32 %v6388_v14, %v7898_v32  ;;  %v1995_v31 = vmul.f32 %v6399_v38, %v7898_v32  ;;  %v1996_v33 = vmul.f32 %v6402_v11, %v7898_v32  ;;  %v6612_v38 = vld [vmem:[%s5887_s27 + $0x160] sm:$0xff] }
 0x1d4   : >>> { %v1997_v45 = vmul.f32 %v6405_v13, %v7898_v32  ;;  %v1998_v63 = vmul.f32 %v6444_v16, %v7898_v32  ;;  %v1999_v14 = vmul.f32 %v6471_v61, %v7898_v32  ;;  %v2000_v11 = vadd.f32 %v1988_v48, %v1976_v58  ;;  %v6622_v61 = vld [vmem:[%s5887_s27 + $0x170] sm:$0xff] }
 0x1d5   : >>> { %v2001_v13 = vadd.f32 %v1989_v18, %v1977_v57  ;;  %v2002_v8 = vadd.f32 %v1990_v29, %v1978_v5  ;;  %v2003_v16 = vadd.f32 %v1991_v20, %v1979_v37  ;;  %v2004_v40 = vadd.f32 %v1992_v2, %v1980_v6 }
 0x1d6   : >>> { %v2005_v51 = vadd.f32 %v1993_v55, %v1981_v3  ;;  %v2006_v34 = vadd.f32 %v1994_v54, %v1982_v35  ;;  %v2007_v60 = vadd.f32 %v1995_v31, %v1983_v59  ;;  %v2008_v44 = vadd.f32 %v1996_v33, %v1984_v25  ;;  %v3261_v31 = vld [vmem:[%s5887_s27 + $0x1b0] sm:$0xff] }
 0x1d7   : >>> { %v2009_v28 = vadd.f32 %v1997_v45, %v1985_v0  ;;  %v2010_v26 = vadd.f32 %v1998_v63, %v1986_v56  ;;  %v2011_v15 = vadd.f32 %v1999_v14, %v1987_v7  ;;  %v2030_v58 = vmul.f32 %v3249_v24, %v7899_v41 }
 0x1d8   : >>> { %v2031_v57 = vmul.f32 %v6609_v21, %v7899_v41  ;;  %v2032_v5 = vmul.f32 %v6612_v38, %v7899_v41  ;;  %v2033_v37 = vmul.f32 %v6619_v17, %v7899_v41  ;;  %v2034_v6 = vmul.f32 %v6622_v61, %v7899_v41 }
 0x1d9   : >>> { %v2035_v3 = vmul.f32 %v6625_v47, %v7899_v41  ;;  %v2036_v35 = vmul.f32 %v6633_v39, %v7899_v41  ;;  %v2037_v59 = vmul.f32 %v6636_v30, %v7899_v41  ;;  %v2038_v25 = vmul.f32 %v6639_v50, %v7899_v41 }
 0x1da   : >>> { %v2039_v0 = vmul.f32 %v6647_v36, %v7899_v41  ;;  %v2040_v56 = vmul.f32 %v6650_v43, %v7899_v41  ;;  %v2041_v7 = vmul.f32 %v6653_v62, %v7899_v41  ;;  %v2042_v32 = vadd.f32 %v2030_v58, %v2000_v11 }
 0x1db   : >>> { %v2043_v48 = vadd.f32 %v2031_v57, %v2001_v13  ;;  %v2044_v18 = vadd.f32 %v2032_v5, %v2002_v8  ;;  %v2045_v29 = vadd.f32 %v2033_v37, %v2003_v16  ;;  %v2046_v20 = vadd.f32 %v2034_v6, %v2004_v40 }
 0x1dc   : >>> { %v2047_v2 = vadd.f32 %v2035_v3, %v2005_v51  ;;  %v2048_v55 = vadd.f32 %v2036_v35, %v2006_v34  ;;  %v2049_v54 = vadd.f32 %v2037_v59, %v2007_v60  ;;  %v2050_v33 = vadd.f32 %v2038_v25, %v2008_v44  ;;  %v3262_v3 = vld [vmem:[%s5887_s27 + $0x1b8] sm:$0xff] }
 0x1dd   : >>> { %v2051_v45 = vadd.f32 %v2039_v0, %v2009_v28  ;;  %v2052_v63 = vadd.f32 %v2040_v56, %v2010_v26  ;;  %v2053_v14 = vadd.f32 %v2041_v7, %v2011_v15  ;;  %v2054_v24 = vmul.f32 %v6609_v21, %v6376_v12 }
 0x1de   : >>> { %v2055_v11 = vmul.f32 %v6612_v38, %v6376_v12  ;;  %v2056_v13 = vmul.f32 %v6619_v17, %v6376_v12  ;;  %v2057_v8 = vmul.f32 %v6622_v61, %v6376_v12  ;;  %v2058_v16 = vmul.f32 %v6625_v47, %v6376_v12 }
 0x1df   : >>> { %v2059_v40 = vmul.f32 %v6633_v39, %v6376_v12  ;;  %v2060_v51 = vmul.f32 %v6636_v30, %v6376_v12  ;;  %v2061_v21 = vmul.f32 %v6639_v50, %v6376_v12  ;;  %v2062_v34 = vmul.f32 %v6647_v36, %v6376_v12 }
 0x1e0   : >>> { %v2063_v60 = vmul.f32 %v6650_v43, %v6376_v12  ;;  %v2064_v44 = vmul.f32 %v6653_v62, %v6376_v12  ;;  %v2065_v28 = vmul.f32 %v3261_v31, %v6376_v12  ;;  %v2066_v26 = vadd.f32 %v2054_v24, %v2042_v32  ;;  %v6800_v24 = vld [vmem:[%s5887_s27 + $0x658] sm:$0xff] }
 0x1e1   : >>> { %v2067_v15 = vadd.f32 %v2055_v11, %v2043_v48  ;;  %v2068_v41 = vadd.f32 %v2056_v13, %v2044_v18  ;;  %v2069_v58 = vadd.f32 %v2057_v8, %v2045_v29  ;;  %v2070_v57 = vadd.f32 %v2058_v16, %v2046_v20  ;;  %v3266_v20 = vld [vmem:[%s5887_s27 + $0x628] sm:$0xff]  ;;  %v6803_v11 = vld [vmem:[%s5887_s27 + $0x660] sm:$0xff] }
 0x1e2   : >>> { %v2071_v5 = vadd.f32 %v2059_v40, %v2047_v2  ;;  %v2072_v37 = vadd.f32 %v2060_v51, %v2048_v55  ;;  %v2073_v6 = vadd.f32 %v2061_v21, %v2049_v54  ;;  %v2074_v35 = vadd.f32 %v2062_v34, %v2050_v33  ;;  %v6769_v2 = vld [vmem:[%s5887_s27 + $0x630] sm:$0xff]  ;;  %v6786_v54 = vld [vmem:[%s5887_s27 + $0x648] sm:$0xff]  ;;  %v6820_v34 = vld [vmem:[%s5887_s27 + $0x678] sm:$0xff] }
 0x1e3   : >>> { %v2075_v59 = vadd.f32 %v2063_v60, %v2051_v45  ;;  %v2076_v12 = vadd.f32 %v2064_v44, %v2052_v63  ;;  %v2077_v25 = vadd.f32 %v2065_v28, %v2053_v14  ;;  %v2078_v0 = vmul.f32 %v6612_v38, %v6379_v19  ;;  %v6797_v14 = vld [vmem:[%s5887_s27 + $0x650] sm:$0xff]  ;;  %v6814_v51 = vld [vmem:[%s5887_s27 + $0x668] sm:$0xff] }
 0x1e4   : >>> { %v2079_v56 = vmul.f32 %v6619_v17, %v6379_v19  ;;  %v2080_v7 = vmul.f32 %v6622_v61, %v6379_v19  ;;  %v2081_v32 = vmul.f32 %v6625_v47, %v6379_v19  ;;  %v2082_v48 = vmul.f32 %v6633_v39, %v6379_v19  ;;  %v6817_v21 = vld [vmem:[%s5887_s27 + $0x670] sm:$0xff] }
 0x1e5   : >>> { %v2083_v18 = vmul.f32 %v6636_v30, %v6379_v19  ;;  %v2084_v38 = vmul.f32 %v6639_v50, %v6379_v19  ;;  %v2085_v17 = vmul.f32 %v6647_v36, %v6379_v19  ;;  %v2086_v61 = vmul.f32 %v6650_v43, %v6379_v19  ;;  %v3265_v30 = vld [vmem:[%s5887_s27 + $0x620] sm:$0xff] }
 0x1e6   : >>> { %v2087_v47 = vmul.f32 %v6653_v62, %v6379_v19  ;;  %v2088_v29 = vmul.f32 %v3261_v31, %v6379_v19  ;;  %v2089_v39 = vmul.f32 %v3262_v3, %v6379_v19  ;;  %v6771_v50 = vadd.f32 %v2078_v0, %v2066_v26  ;;  %v6780_v62 = vld [vmem:[%s5887_s27 + $0x638] sm:$0xff]  ;;  %v6783_v19 = vld [vmem:[%s5887_s27 + $0x640] sm:$0xff] }
 0x1e7   : >>> { %v6773_v36 = vadd.f32 %v2079_v56, %v2067_v15  ;;  %v6775_v55 = vadd.f32 %v2080_v7, %v2068_v41  ;;  %v6777_v43 = vadd.f32 %v2081_v32, %v2069_v58  ;;  %v6788_v31 = vadd.f32 %v2082_v48, %v2070_v57 }
 0x1e8   : >>> { %v6790_v33 = vadd.f32 %v2083_v18, %v2071_v5  ;;  %v6792_v45 = vadd.f32 %v2084_v38, %v2072_v37  ;;  %v6794_v63 = vadd.f32 %v2085_v17, %v2073_v6  ;;  %v6805_v13 = vadd.f32 %v2086_v61, %v2074_v35 }
 0x1e9   : >>> { %v6807_v8 = vadd.f32 %v2087_v47, %v2075_v59  ;;  %v6809_v16 = vadd.f32 %v2088_v29, %v2076_v12  ;;  %v6811_v40 = vadd.f32 %v2089_v39, %v2077_v25  ;;  %v6823_v60 = vstv %s6726_s22  ;;  %s7131_s22 = sshll.u32 %s2431_s20, 7 }
 0x1ea   : >>> { %v6826_v44 = vstv %s6737_s24  ;;  %v6829_v28 = vstv %s6739_s30  ;;  %v6832_v26 = vstv %s6741_s29  ;;  %v2130_v15 = vmul.f32 %v3265_v30, %v6823_v60  ;;  %s7141_s24 = sshll.u32 %s2465_s21, 7  ;;  %s7145_s30 = sand.u32 127, %s2462_s19 }
 0x1eb   : >>> { %7900 = vst [vmem:[#allocation41_spill] sm:$0xff] %v6811_v40  ;;  %7901 = vst [vmem:[#allocation45_spill] sm:$0xff] %v6826_v44  ;;  %v2131_v41 = vmul.f32 %v3266_v20, %v6823_v60  ;;  %v2132_v58 = vmul.f32 %v6769_v2, %v6823_v60  ;;  %v2133_v57 = vmul.f32 %v6780_v62, %v6823_v60  ;;  %s2435_s29 = sadd.s32 %s7131_s22, %s7135_s23  ;;  %s2469_s8 = sadd.s32 %s7141_s24, %s7145_s30 }
 0x1ec   : >>> { %7902 = vst [vmem:[#allocation46_spill] sm:$0xff] %v6829_v28  ;;  %7903 = vst [vmem:[#allocation44_spill] sm:$0xff] %v6832_v26  ;;  %v2134_v5 = vmul.f32 %v6783_v19, %v6823_v60  ;;  %v2135_v37 = vmul.f32 %v6786_v54, %v6823_v60  ;;  %v2136_v6 = vmul.f32 %v6797_v14, %v6823_v60  ;;  %s7182_s6 = sld [smem:[#allocation8 + %s2435_s29]]  ;;  %s2731_s23 = sadd.s32 (%p7583_p13), 2, %s7661_s15 }
 0x1ed   : >>> { %v2137_v3 = vmul.f32 %v6800_v24, %v6823_v60  ;;  %v2138_v35 = vmul.f32 %v6803_v11, %v6823_v60  ;;  %v2139_v59 = vmul.f32 %v6814_v51, %v6823_v60  ;;  %v2140_v12 = vmul.f32 %v6817_v21, %v6823_v60  ;;  %s7184_s2 = sld [smem:[#allocation8 + %s2469_s8]]  ;;  %s2732_s30 = sshra.s32 (%p7583_p13), %s2731_s23, 7 }
 0x1ee   : >>> { %v2141_v25 = vmul.f32 %v6820_v34, %v6823_v60  ;;  %v2142_v0 = vadd.f32 %v2130_v15, %v6489_v49  ;;  %v2143_v56 = vadd.f32 %v2131_v41, %v6491_v22  ;;  %v2144_v7 = vadd.f32 %v2132_v58, %v6493_v52  ;;  %v3277_v49 = vld [vmem:[%s5887_s27 + $0x680] sm:$0xff]  ;;  %s2734_s8 = sadd.s32 (%p7583_p13), %s3811_s10, %s2732_s30 }
 0x1ef   : >>> { %v2145_v32 = vadd.f32 %v2133_v57, %v6495_v1  ;;  %v2146_v48 = vadd.f32 %v2134_v5, %v6497_v46  ;;  %v2147_v18 = vadd.f32 %v2135_v37, %v6499_v27  ;;  %v2148_v38 = vadd.f32 %v2136_v6, %v6501_v10  ;;  %s3344_s9 = sshll.u32 (%p7583_p13), %s2734_s8, 7 }
 0x1f0   : >>> { %v2149_v17 = vadd.f32 %v2137_v3, %v6503_v42  ;;  %v2150_v22 = vadd.f32 %v2138_v35, %v6506_v4  ;;  %v2151_v52 = vadd.f32 %v2139_v59, %v6508_v9  ;;  %v2152_v1 = vadd.f32 %v2140_v12, %v6510_v53  ;;  %v3278_v3 = vld [vmem:[%s5887_s27 + $0x688] sm:$0xff] }
 0x1f1   : >>> { %v2153_v46 = vadd.f32 %v2141_v25, %v6512_v23  ;;  %v2164_v27 = vmul.f32 %v3266_v20, %v6826_v44  ;;  %v2165_v10 = vmul.f32 %v6769_v2, %v6826_v44  ;;  %v2166_v42 = vmul.f32 %v6780_v62, %v6826_v44 }
 0x1f2   : >>> { %v2167_v61 = vmul.f32 %v6783_v19, %v6826_v44  ;;  %v2168_v4 = vmul.f32 %v6786_v54, %v6826_v44  ;;  %v2169_v9 = vmul.f32 %v6797_v14, %v6826_v44  ;;  %v2170_v53 = vmul.f32 %v6800_v24, %v6826_v44 }
 0x1f3   : >>> { %v2171_v23 = vmul.f32 %v6803_v11, %v6826_v44  ;;  %v2172_v47 = vmul.f32 %v6814_v51, %v6826_v44  ;;  %v2173_v29 = vmul.f32 %v6817_v21, %v6826_v44  ;;  %v2174_v39 = vmul.f32 %v6820_v34, %v6826_v44 }
 0x1f4   : >>> { %v2175_v30 = vmul.f32 %v3277_v49, %v6826_v44  ;;  %v2176_v20 = vadd.f32 %v2164_v27, %v2142_v0  ;;  %v2177_v15 = vadd.f32 %v2165_v10, %v2143_v56  ;;  %v2178_v41 = vadd.f32 %v2166_v42, %v2144_v7 }
 0x1f5   : >>> { %v2179_v58 = vadd.f32 %v2167_v61, %v2145_v32  ;;  %v2180_v57 = vadd.f32 %v2168_v4, %v2146_v48  ;;  %v2181_v5 = vadd.f32 %v2169_v9, %v2147_v18  ;;  %v2182_v37 = vadd.f32 %v2170_v53, %v2148_v38  ;;  %v6956_v4 = vld [vmem:[%s5887_s27 + $0x6a8] sm:$0xff]  ;;  %v6959_v9 = vld [vmem:[%s5887_s27 + $0x6b0] sm:$0xff]  ;;  %v6962_v53 = vld [vmem:[%s5887_s27 + $0x6b8] sm:$0xff] }
 0x1f6   : >>> { %v2183_v6 = vadd.f32 %v2171_v23, %v2149_v17  ;;  %v2184_v35 = vadd.f32 %v2172_v47, %v2150_v22  ;;  %v2185_v59 = vadd.f32 %v2173_v29, %v2151_v52  ;;  %v2186_v12 = vadd.f32 %v2174_v39, %v2152_v1  ;;  %v3286_v1 = vld [vmem:[%s5887_s27 + $0x690] sm:$0xff]  ;;  %v6965_v23 = vld [vmem:[%s5887_s27 + $0x6c0] sm:$0xff]  ;;  %v6968_v47 = vld [vmem:[%s5887_s27 + $0x6c8] sm:$0xff] }
 0x1f7   : >>> { %v2187_v25 = vadd.f32 %v2175_v30, %v2153_v46  ;;  %v2198_v0 = vmul.f32 %v6769_v2, %v6829_v28  ;;  %v2199_v56 = vmul.f32 %v6780_v62, %v6829_v28  ;;  %v2200_v7 = vmul.f32 %v6783_v19, %v6829_v28  ;;  %v6951_v46 = vld [vmem:[%s5887_s27 + $0x6a0] sm:$0xff]  ;;  %v6971_v29 = vld [vmem:[%s5887_s27 + $0x6d0] sm:$0xff] }
 0x1f8   : >>> { %v2201_v32 = vmul.f32 %v6786_v54, %v6829_v28  ;;  %v2202_v48 = vmul.f32 %v6797_v14, %v6829_v28  ;;  %v2203_v18 = vmul.f32 %v6800_v24, %v6829_v28  ;;  %v2204_v38 = vmul.f32 %v6803_v11, %v6829_v28 }
 0x1f9   : >>> { %v2205_v2 = vmul.f32 %v6814_v51, %v6829_v28  ;;  %v2206_v62 = vmul.f32 %v6817_v21, %v6829_v28  ;;  %v2207_v19 = vmul.f32 %v6820_v34, %v6829_v28  ;;  %v2208_v54 = vmul.f32 %v3277_v49, %v6829_v28  ;;  %v6948_v49 = vld [vmem:[%s5887_s27 + $0x698] sm:$0xff] }
 0x1fa   : >>> { %v2209_v14 = vmul.f32 %v3278_v3, %v6829_v28  ;;  %v2210_v24 = vadd.f32 %v2198_v0, %v2176_v20  ;;  %v2211_v17 = vadd.f32 %v2199_v56, %v2177_v15  ;;  %v2212_v11 = vadd.f32 %v2200_v7, %v2178_v41  ;;  %7904 = vst [vmem:[#allocation43_spill] sm:$0xff] %v6948_v49  ;;  %v6981_v41 = vld [vmem:[%s5887_s27 + $0x6d8] sm:$0xff] }
 0x1fb   : >>> { %v2213_v22 = vadd.f32 %v2201_v32, %v2179_v58  ;;  %v2214_v51 = vadd.f32 %v2202_v48, %v2180_v57  ;;  %v2215_v21 = vadd.f32 %v2203_v18, %v2181_v5  ;;  %v2216_v52 = vadd.f32 %v2204_v38, %v2182_v37  ;;  %v6984_v58 = vld [vmem:[%s5887_s27 + $0x6e0] sm:$0xff]  ;;  %v6987_v57 = vld [vmem:[%s5887_s27 + $0x6e8] sm:$0xff] }
 0x1fc   : >>> { %v2217_v34 = vadd.f32 %v2205_v2, %v2183_v6  ;;  %v2218_v27 = vadd.f32 %v2206_v62, %v2184_v35  ;;  %v2219_v10 = vadd.f32 %v2207_v19, %v2185_v59  ;;  %v2220_v42 = vadd.f32 %v2208_v54, %v2186_v12 }
 0x1fd   : >>> { %v2221_v61 = vadd.f32 %v2209_v14, %v2187_v25  ;;  %v2248_v39 = vmul.f32 %v3286_v1, %v6832_v26  ;;  %v2249_v30 = vmul.f32 %v6948_v49, %v6832_v26  ;;  %v2250_v20 = vmul.f32 %v6951_v46, %v6832_v26 }
 0x1fe   : >>> { %v2251_v15 = vmul.f32 %v6956_v4, %v6832_v26  ;;  %v2252_v5 = vmul.f32 %v6959_v9, %v6832_v26  ;;  %v2253_v37 = vmul.f32 %v6962_v53, %v6832_v26  ;;  %v2254_v6 = vmul.f32 %v6965_v23, %v6832_v26 }
 0x1ff   : >>> { %v2255_v3 = vmul.f32 %v6968_v47, %v6832_v26  ;;  %v2256_v35 = vmul.f32 %v6971_v29, %v6832_v26  ;;  %v2257_v59 = vmul.f32 %v6981_v41, %v6832_v26  ;;  %v2258_v12 = vmul.f32 %v6984_v58, %v6832_v26 }
 0x200   : >>> { %v2259_v25 = vmul.f32 %v6987_v57, %v6832_v26  ;;  %v2260_v0 = vadd.f32 %v2248_v39, %v2210_v24  ;;  %v2261_v56 = vadd.f32 %v2249_v30, %v2211_v17  ;;  %v2262_v7 = vadd.f32 %v2250_v20, %v2212_v11 }
 0x201   : >>> { %v2263_v32 = vadd.f32 %v2251_v15, %v2213_v22  ;;  %v2264_v48 = vadd.f32 %v2252_v5, %v2214_v51  ;;  %v2265_v18 = vadd.f32 %v2253_v37, %v2215_v21  ;;  %v2266_v38 = vadd.f32 %v2254_v6, %v2216_v52  ;;  %v7027_v21 = vld [vmem:[%s5887_s27 + $0x6f0] sm:$0xff] }
 0x202   : >>> { %v2267_v2 = vadd.f32 %v2255_v3, %v2217_v34  ;;  %v2268_v62 = vadd.f32 %v2256_v35, %v2218_v27  ;;  %v2269_v19 = vadd.f32 %v2257_v59, %v2219_v10  ;;  %v2270_v54 = vadd.f32 %v2258_v12, %v2220_v42 }
 0x203   : >>> { %v2271_v14 = vadd.f32 %v2259_v25, %v2221_v61  ;;  %v7006_v28 = vstv %s6944_s17  ;;  %v7009_v44 = vstv %s6953_s18  ;;  %v7012_v40 = vmul.f32 %v3286_v1, %v6823_v60  ;;  %s2700_s17 = sadd.s32 (%p7583_p13), %s3811_s10, %s2698_s0  ;;  %s2714_s18 = sadd.s32 (%p7583_p13), 1, %s7661_s15 }
 0x204   : >>> { %7905 = vst [vmem:[#allocation47_spill] sm:$0xff] %v7006_v28  ;;  %7906 = vst [vmem:[#allocation48_spill] sm:$0xff] %v7009_v44  ;;  %v7016_v24 = vmul.f32 %v6948_v49, %v6823_v60  ;;  %v2282_v17 = vmul.f32 %v6948_v49, %v7006_v28  ;;  %v2283_v11 = vmul.f32 %v6951_v46, %v7006_v28  ;;  %s3342_s1 = sshll.u32 (%p7583_p13), %s2700_s17, 7  ;;  %s2715_s19 = sshra.s32 (%p7583_p13), %s2714_s18, 7 }
 0x205   : >>> { %v2284_v22 = vmul.f32 %v6956_v4, %v7006_v28  ;;  %v2285_v51 = vmul.f32 %v6959_v9, %v7006_v28  ;;  %v2286_v52 = vmul.f32 %v6962_v53, %v7006_v28  ;;  %v2287_v34 = vmul.f32 %v6965_v23, %v7006_v28  ;;  %s2704_s12 = sadd.s32 (%p7583_p13), %s3342_s1, %s2703_s16  ;;  %s2717_s3 = sadd.s32 (%p7583_p13), %s3811_s10, %s2715_s19 }
 0x206   : >>> { %v2288_v1 = vmul.f32 %v6968_v47, %v7006_v28  ;;  %v2289_v27 = vmul.f32 %v6971_v29, %v7006_v28  ;;  %v2290_v10 = vmul.f32 %v6981_v41, %v7006_v28  ;;  %v2291_v42 = vmul.f32 %v6984_v58, %v7006_v28  ;;  %s2705_s20 = sld [smem:[#allocation11 + %s2704_s12]] (%p7583_p13)  ;;  %s3343_s21 = sshll.u32 (%p7583_p13), %s2717_s3, 7 }
 0x207   : >>> { %v2292_v61 = vmul.f32 %v6987_v57, %v7006_v28  ;;  %v2293_v39 = vmul.f32 %v7027_v21, %v7006_v28  ;;  %v2294_v30 = vadd.f32 %v2282_v17, %v2260_v0  ;;  %v2295_v20 = vadd.f32 %v2283_v11, %v2261_v56  ;;  %v7914_v28 = vld [vmem:[#allocation44_spill] sm:$0xff]  ;;  %s2720_s22 = sand.u32 (%p7583_p13), 127, %s2714_s18  ;;  %s2782_s12 = sadd.s32 (%p7583_p13), 5, %s7661_s15 }
 0x208   : >>> { %v2296_v15 = vadd.f32 %v2284_v22, %v2262_v7  ;;  %v2297_v5 = vadd.f32 %v2285_v51, %v2263_v32  ;;  %v2298_v37 = vadd.f32 %v2286_v52, %v2264_v48  ;;  %v2299_v6 = vadd.f32 %v2287_v34, %v2265_v18  ;;  %v7056_v32 = vld [vmem:[%s5887_s27 + $0x6f8] sm:$0xff]  ;;  %s2721_s24 = sadd.s32 (%p7583_p13), %s3343_s21, %s2720_s22  ;;  %s2788_s22 = sand.u32 (%p7583_p13), 127, %s2782_s12 }
 0x209   : >>> { %v2300_v3 = vadd.f32 %v2288_v1, %v2266_v38  ;;  %v2301_v35 = vadd.f32 %v2289_v27, %v2267_v2  ;;  %v2302_v59 = vadd.f32 %v2290_v10, %v2268_v62  ;;  %v2303_v12 = vadd.f32 %v2291_v42, %v2269_v19  ;;  %s2722_s29 = sld [smem:[#allocation11 + %s2721_s24]] (%p7583_p13) }
 0x20a   : >>> { %v2304_v25 = vadd.f32 %v2292_v61, %v2270_v54  ;;  %v2305_v26 = vadd.f32 %v2293_v39, %v2271_v14  ;;  %v2316_v49 = vmul.f32 %v6951_v46, %v7009_v44  ;;  %v2317_v0 = vmul.f32 %v6956_v4, %v7009_v44 }
 0x20b   : >>> { %v2318_v56 = vmul.f32 %v6959_v9, %v7009_v44  ;;  %v2319_v7 = vmul.f32 %v6962_v53, %v7009_v44  ;;  %v2320_v48 = vmul.f32 %v6965_v23, %v7009_v44  ;;  %v2321_v18 = vmul.f32 %v6968_v47, %v7009_v44 }
 0x20c   : >>> { %v2322_v38 = vmul.f32 %v6971_v29, %v7009_v44  ;;  %v2323_v2 = vmul.f32 %v6981_v41, %v7009_v44  ;;  %v2324_v62 = vmul.f32 %v6984_v58, %v7009_v44  ;;  %v2325_v19 = vmul.f32 %v6987_v57, %v7009_v44 }
 0x20d   : >>> { %v2326_v54 = vmul.f32 %v7027_v21, %v7009_v44  ;;  %v2327_v14 = vmul.f32 %v7056_v32, %v7009_v44  ;;  %v7076_v17 = vadd.f32 %v2316_v49, %v2294_v30  ;;  %v7078_v11 = vadd.f32 %v2317_v0, %v2295_v20 }
 0x20e   : >>> { %v7080_v22 = vadd.f32 %v2318_v56, %v2296_v15  ;;  %v7082_v51 = vadd.f32 %v2319_v7, %v2297_v5  ;;  %v7088_v52 = vadd.f32 %v2320_v48, %v2298_v37  ;;  %v7090_v34 = vadd.f32 %v2321_v18, %v2299_v6  ;;  %v7909_v7 = vld [vmem:[#allocation43_spill] sm:$0xff] }
 0x20f   : >>> { %v7092_v1 = vadd.f32 %v2322_v38, %v2300_v3  ;;  %v7094_v27 = vadd.f32 %v2323_v2, %v2301_v35  ;;  %v7096_v49 = vadd.f32 %v2324_v62, %v2302_v59  ;;  %v7098_v10 = vadd.f32 %v2325_v19, %v2303_v12 }
 0x210   : >>> { %v7100_v42 = vadd.f32 %v2326_v54, %v2304_v25  ;;  %v7102_v61 = vadd.f32 %v2327_v14, %v2305_v26  ;;  %v2342_v39 = vmul.f32 %v6951_v46, %v6823_v60  ;;  %v2343_v30 = vmul.f32 %v6956_v4, %v6823_v60 }
 0x211   : >>> { %v2344_v20 = vmul.f32 %v6959_v9, %v6823_v60  ;;  %v2345_v15 = vmul.f32 %v6962_v53, %v6823_v60  ;;  %v2346_v26 = vmul.f32 %v6965_v23, %v6823_v60  ;;  %v2347_v5 = vmul.f32 %v6968_v47, %v6823_v60 }
 0x212   : >>> { %v2348_v37 = vmul.f32 %v6971_v29, %v6823_v60  ;;  %v2349_v6 = vmul.f32 %v6981_v41, %v6823_v60  ;;  %v2350_v3 = vmul.f32 %v6984_v58, %v6823_v60  ;;  %v2351_v35 = vmul.f32 %v6987_v57, %v6823_v60 }
 0x213   : >>> { %v2352_v59 = vadd.f32 %v7012_v40, %v6771_v50  ;;  %v2353_v12 = vadd.f32 %v7016_v24, %v6773_v36  ;;  %v2354_v25 = vadd.f32 %v2342_v39, %v6775_v55  ;;  %v2355_v0 = vadd.f32 %v2343_v30, %v6777_v43  ;;  %v7908_v24 = vld [vmem:[#allocation45_spill] sm:$0xff] }
 0x214   : >>> { %v2356_v56 = vadd.f32 %v2344_v20, %v6788_v31  ;;  %v2357_v60 = vadd.f32 %v2345_v15, %v6790_v33  ;;  %v2358_v50 = vadd.f32 %v2346_v26, %v6792_v45  ;;  %v2359_v36 = vadd.f32 %v2347_v5, %v6794_v63  ;;  %v7907_v31 = vld [vmem:[#allocation41_spill] sm:$0xff] }
 0x215   : >>> { %v2360_v40 = vadd.f32 %v2348_v37, %v6805_v13  ;;  %v2361_v55 = vadd.f32 %v2349_v6, %v6807_v8  ;;  %v2362_v43 = vadd.f32 %v2350_v3, %v6809_v16  ;;  %v2363_v33 = vadd.f32 %v2351_v35, %v7907_v31 }
 0x216   : >>> { %v2364_v48 = vmul.f32 %v7909_v7, %v7908_v24  ;;  %v2365_v18 = vmul.f32 %v6951_v46, %v7908_v24  ;;  %v2366_v45 = vmul.f32 %v6956_v4, %v7908_v24  ;;  %v2367_v63 = vmul.f32 %v6959_v9, %v7908_v24  ;;  %v7243_v7 = vld [vmem:[%s5887_s27 + $0x710] sm:$0xff] }
 0x217   : >>> { %v2368_v13 = vmul.f32 %v6962_v53, %v7908_v24  ;;  %v2369_v8 = vmul.f32 %v6965_v23, %v7908_v24  ;;  %v2370_v16 = vmul.f32 %v6968_v47, %v7908_v24  ;;  %v2371_v38 = vmul.f32 %v6971_v29, %v7908_v24 }
 0x218   : >>> { %v2372_v2 = vmul.f32 %v6981_v41, %v7908_v24  ;;  %v2373_v62 = vmul.f32 %v6984_v58, %v7908_v24  ;;  %v2374_v19 = vmul.f32 %v6987_v57, %v7908_v24  ;;  %v2375_v54 = vmul.f32 %v7027_v21, %v7908_v24  ;;  %v7240_v24 = vld [vmem:[%s5887_s27 + $0x708] sm:$0xff] }
 0x219   : >>> { %v2376_v14 = vadd.f32 %v2364_v48, %v2352_v59  ;;  %v2377_v39 = vadd.f32 %v2365_v18, %v2353_v12  ;;  %v2378_v30 = vadd.f32 %v2366_v45, %v2354_v25  ;;  %v2379_v20 = vadd.f32 %v2367_v63, %v2355_v0  ;;  %v7910_v12 = vld [vmem:[#allocation46_spill] sm:$0xff]  ;;  %v7246_v48 = vld [vmem:[%s5887_s27 + $0x718] sm:$0xff]  ;;  %v7259_v63 = vld [vmem:[%s5887_s27 + $0x720] sm:$0xff] }
 0x21a   : >>> { %v2380_v15 = vadd.f32 %v2368_v13, %v2356_v56  ;;  %v2381_v26 = vadd.f32 %v2369_v8, %v2357_v60  ;;  %v2382_v5 = vadd.f32 %v2370_v16, %v2358_v50  ;;  %v2383_v37 = vadd.f32 %v2371_v38, %v2359_v36  ;;  %v7262_v13 = vld [vmem:[%s5887_s27 + $0x728] sm:$0xff]  ;;  %v7271_v38 = vld [vmem:[%s5887_s27 + $0x730] sm:$0xff] }
 0x21b   : >>> { %v2384_v6 = vadd.f32 %v2372_v2, %v2360_v40  ;;  %v2385_v3 = vadd.f32 %v2373_v62, %v2361_v55  ;;  %v2386_v35 = vadd.f32 %v2374_v19, %v2362_v43  ;;  %v2387_v59 = vadd.f32 %v2375_v54, %v2363_v33  ;;  %v7274_v2 = vld [vmem:[%s5887_s27 + $0x738] sm:$0xff]  ;;  %v7277_v62 = vld [vmem:[%s5887_s27 + $0x740] sm:$0xff] }
 0x21c   : >>> { %v2388_v31 = vmul.f32 %v6951_v46, %v7910_v12  ;;  %v2389_v25 = vmul.f32 %v6956_v4, %v7910_v12  ;;  %v2390_v0 = vmul.f32 %v6959_v9, %v7910_v12  ;;  %v2391_v56 = vmul.f32 %v6962_v53, %v7910_v12 }
 0x21d   : >>> { %v2392_v60 = vmul.f32 %v6965_v23, %v7910_v12  ;;  %v2393_v50 = vmul.f32 %v6968_v47, %v7910_v12  ;;  %v2394_v36 = vmul.f32 %v6971_v29, %v7910_v12  ;;  %v2395_v46 = vmul.f32 %v6981_v41, %v7910_v12 }
 0x21e   : >>> { %v2396_v4 = vmul.f32 %v6984_v58, %v7910_v12  ;;  %v2397_v9 = vmul.f32 %v6987_v57, %v7910_v12  ;;  %v2398_v53 = vmul.f32 %v7027_v21, %v7910_v12  ;;  %v2399_v23 = vmul.f32 %v7056_v32, %v7910_v12  ;;  %v7229_v21 = vld [vmem:[%s5887_s27 + $0x700] sm:$0xff] }
 0x21f   : >>> { %v7216_v47 = vadd.f32 %v2388_v31, %v2376_v14  ;;  %v7218_v29 = vadd.f32 %v2389_v25, %v2377_v39  ;;  %v7220_v41 = vadd.f32 %v2390_v0, %v2378_v30  ;;  %v7222_v58 = vadd.f32 %v2391_v56, %v2379_v20  ;;  %v7288_v30 = vld [vmem:[%s5887_s27 + $0x748] sm:$0xff]  ;;  %v7291_v20 = vld [vmem:[%s5887_s27 + $0x750] sm:$0xff] }
 0x220   : >>> { %v7224_v57 = vadd.f32 %v2392_v60, %v2380_v15  ;;  %v7226_v40 = vadd.f32 %v2393_v50, %v2381_v26  ;;  %v7231_v32 = vadd.f32 %v2394_v36, %v2382_v5  ;;  %v7233_v55 = vadd.f32 %v2395_v46, %v2383_v37  ;;  %v7294_v15 = vld [vmem:[%s5887_s27 + $0x758] sm:$0xff] }
 0x221   : >>> { %v7235_v43 = vadd.f32 %v2396_v4, %v2384_v6  ;;  %v7237_v33 = vadd.f32 %v2397_v9, %v2385_v3  ;;  %v7254_v18 = vadd.f32 %v2398_v53, %v2386_v35  ;;  %v7256_v45 = vadd.f32 %v2399_v23, %v2387_v59 }
 0x222   : >>> { %v7265_v8 = vstv %s7182_s6  ;;  %v7268_v16 = vstv %s7184_s2  ;;  %v7353_v44 = vstv %s2504_s13  ;;  %s2737_s6 = sand.u32 (%p7583_p13), 127, %s2731_s23  ;;  %s3345_s13 = sshll.u32 (%p7583_p13), %s2751_s11, 7 }
 0x223   : >>> { %7911 = vst [vmem:[#allocation42_spill] sm:$0xff] %v7256_v45  ;;  %7912 = vst [vmem:[#allocation41_spill] sm:$0xff] %v7265_v8  ;;  %v2438_v19 = vmul.f32 %v7229_v21, %v7265_v8  ;;  %v2439_v54 = vmul.f32 %v7240_v24, %v7265_v8  ;;  %v2440_v14 = vmul.f32 %v7243_v7, %v7265_v8  ;;  %s2738_s2 = sadd.s32 (%p7583_p13), %s3344_s9, %s2737_s6 }
 0x224   : >>> { %v2441_v39 = vmul.f32 %v7246_v48, %v7265_v8  ;;  %v2442_v26 = vmul.f32 %v7259_v63, %v7265_v8  ;;  %v2443_v5 = vmul.f32 %v7262_v13, %v7265_v8  ;;  %v2444_v37 = vmul.f32 %v7271_v38, %v7265_v8  ;;  %7913 = vst [vmem:[#allocation45_spill] sm:$0xff] %v7353_v44  ;;  %s2739_s26 = sld [smem:[#allocation11 + %s2738_s2]] (%p7583_p13) }
 0x225   : >>> { %v2445_v6 = vmul.f32 %v7274_v2, %v7265_v8  ;;  %v2446_v3 = vmul.f32 %v7277_v62, %v7265_v8  ;;  %v2447_v35 = vmul.f32 %v7288_v30, %v7265_v8  ;;  %v2448_v59 = vmul.f32 %v7291_v20, %v7265_v8 }
 0x226   : >>> { %v2449_v12 = vmul.f32 %v7294_v15, %v7265_v8  ;;  %v2450_v31 = vadd.f32 %v2438_v19, %v7076_v17  ;;  %v2451_v25 = vadd.f32 %v2439_v54, %v7078_v11  ;;  %v2452_v0 = vadd.f32 %v2440_v14, %v7080_v22 }
 0x227   : >>> { %v2453_v56 = vadd.f32 %v2441_v39, %v7082_v51  ;;  %v2454_v60 = vadd.f32 %v2442_v26, %v7088_v52  ;;  %v2455_v50 = vadd.f32 %v2443_v5, %v7090_v34  ;;  %v2456_v36 = vadd.f32 %v2444_v37, %v7092_v1  ;;  %v7335_v1 = vld [vmem:[%s5887_s27 + $0x760] sm:$0xff] }
 0x228   : >>> { %v2457_v46 = vadd.f32 %v2445_v6, %v7094_v27  ;;  %v2458_v4 = vadd.f32 %v2446_v3, %v7096_v49  ;;  %v2459_v17 = vadd.f32 %v2447_v35, %v7098_v10  ;;  %v2460_v11 = vadd.f32 %v2448_v59, %v7100_v42 }
 0x229   : >>> { %v2461_v9 = vadd.f32 %v2449_v12, %v7102_v61  ;;  %v2472_v22 = vmul.f32 %v7240_v24, %v7268_v16  ;;  %v2473_v51 = vmul.f32 %v7243_v7, %v7268_v16  ;;  %v2474_v52 = vmul.f32 %v7246_v48, %v7268_v16 }
 0x22a   : >>> { %v2475_v34 = vmul.f32 %v7259_v63, %v7268_v16  ;;  %v2476_v27 = vmul.f32 %v7262_v13, %v7268_v16  ;;  %v2477_v49 = vmul.f32 %v7271_v38, %v7268_v16  ;;  %v2478_v10 = vmul.f32 %v7274_v2, %v7268_v16 }
 0x22b   : >>> { %v2479_v42 = vmul.f32 %v7277_v62, %v7268_v16  ;;  %v2480_v61 = vmul.f32 %v7288_v30, %v7268_v16  ;;  %v2481_v53 = vmul.f32 %v7291_v20, %v7268_v16  ;;  %v2482_v23 = vmul.f32 %v7294_v15, %v7268_v16 }
 0x22c   : >>> { %v2483_v19 = vmul.f32 %v7335_v1, %v7268_v16  ;;  %v2484_v54 = vadd.f32 %v2472_v22, %v2450_v31  ;;  %v2485_v14 = vadd.f32 %v2473_v51, %v2451_v25  ;;  %v2486_v39 = vadd.f32 %v2474_v52, %v2452_v0 }
 0x22d   : >>> { %v2487_v26 = vadd.f32 %v2475_v34, %v2453_v56  ;;  %v2488_v5 = vadd.f32 %v2476_v27, %v2454_v60  ;;  %v2489_v37 = vadd.f32 %v2477_v49, %v2455_v50  ;;  %v2490_v6 = vadd.f32 %v2478_v10, %v2456_v36  ;;  %v7370_v36 = vld [vmem:[%s5887_s27 + $0x768] sm:$0xff] }
 0x22e   : >>> { %v2491_v3 = vadd.f32 %v2479_v42, %v2457_v46  ;;  %v2492_v35 = vadd.f32 %v2480_v61, %v2458_v4  ;;  %v2493_v59 = vadd.f32 %v2481_v53, %v2459_v17  ;;  %v2494_v12 = vadd.f32 %v2482_v23, %v2460_v11 }
 0x22f   : >>> { %v2495_v8 = vadd.f32 %v2483_v19, %v2461_v9  ;;  %v2530_v45 = vmul.f32 %v7229_v21, %v7914_v28  ;;  %v2531_v31 = vmul.f32 %v7240_v24, %v7914_v28  ;;  %v2532_v25 = vmul.f32 %v7243_v7, %v7914_v28 }
 0x230   : >>> { %v2506_v0 = vmul.f32 %v7243_v7, %v7353_v44  ;;  %v2507_v56 = vmul.f32 %v7246_v48, %v7353_v44  ;;  %v2508_v60 = vmul.f32 %v7259_v63, %v7353_v44  ;;  %v2509_v50 = vmul.f32 %v7262_v13, %v7353_v44 }
 0x231   : >>> { %v2510_v21 = vmul.f32 %v7271_v38, %v7353_v44  ;;  %v2511_v46 = vmul.f32 %v7274_v2, %v7353_v44  ;;  %v2512_v4 = vmul.f32 %v7277_v62, %v7353_v44  ;;  %v2513_v17 = vmul.f32 %v7288_v30, %v7353_v44 }
 0x232   : >>> { %v2514_v11 = vmul.f32 %v7291_v20, %v7353_v44  ;;  %v2515_v9 = vmul.f32 %v7294_v15, %v7353_v44  ;;  %v2516_v22 = vmul.f32 %v7335_v1, %v7353_v44  ;;  %v2517_v51 = vmul.f32 %v7370_v36, %v7353_v44 }
 0x233   : >>> { %v7388_v52 = vadd.f32 %v2506_v0, %v2484_v54   ;;  %v7390_v34 = vadd.f32 %v2507_v56, %v2485_v14   ;;  %v7392_v27 = vadd.f32 %v2508_v60, %v2486_v39   ;;  %v7394_v49 = vadd.f32 %v2509_v50, %v2487_v26  }
 0x234   : >>> { %v7396_v10 = vadd.f32 %v2510_v21, %v2488_v5   ;;  %v7398_v42 = vadd.f32 %v2511_v46, %v2489_v37   ;;  %v7400_v61 = vadd.f32 %v2512_v4, %v2490_v6   ;;  %v7402_v17 = vadd.f32 %v2513_v17, %v2491_v3  }
 0x235   : >>> { %v7404_v53 = vadd.f32 %v2514_v11, %v2492_v35   ;;  %v7406_v26 = vadd.f32 %v2515_v9, %v2493_v59   ;;  %v7408_v54 = vadd.f32 %v2516_v22, %v2494_v12   ;;  %v7410_v14 = vadd.f32 %v2517_v51, %v2495_v8  }
 0x236   : >>> { %v7915_v23 = vmov %v7402_v17  ;;  %v2533_v39 = vmul.f32 %v7246_v48, %v7914_v28  ;;  %v2534_v5 = vmul.f32 %v7259_v63, %v7914_v28  ;;  %v2535_v37 = vmul.f32 %v7262_v13, %v7914_v28 }
 0x237   : >>> { %v7916_v19 = vmov %v7404_v53  ;;  %v7917_v44 = vmov %v7406_v26  ;;  %v7918_v0 = vmov %v7408_v54  ;;  %v2536_v6 = vmul.f32 %v7271_v38, %v7914_v28 }
 0x238   : >>> { %v2537_v3 = vmul.f32 %v7274_v2, %v7914_v28  ;;  %v2538_v26 = vmul.f32 %v7277_v62, %v7914_v28  ;;  %v2539_v8 = vmul.f32 %v7288_v30, %v7914_v28  ;;  %v2540_v35 = vmul.f32 %v7291_v20, %v7914_v28 }
 0x239   : >>> { %v2541_v59 = vmul.f32 %v7294_v15, %v7914_v28  ;;  %v2542_v12 = vadd.f32 %v2530_v45, %v7216_v47  ;;  %v2543_v56 = vadd.f32 %v2531_v31, %v7218_v29  ;;  %v2544_v60 = vadd.f32 %v2532_v25, %v7220_v41  ;;  %v7919_v45 = vld [vmem:[#allocation42_spill] sm:$0xff]  ;;  %v7920_v31 = vld [vmem:[#allocation47_spill] sm:$0xff] }
 0x23a   : >>> { %v2545_v50 = vadd.f32 %v2533_v39, %v7222_v58  ;;  %v2546_v21 = vadd.f32 %v2534_v5, %v7224_v57  ;;  %v2547_v46 = vadd.f32 %v2535_v37, %v7226_v40  ;;  %v2548_v4 = vadd.f32 %v2536_v6, %v7231_v32 }
 0x23b   : >>> { %v2549_v17 = vadd.f32 %v2537_v3, %v7233_v55  ;;  %v2550_v11 = vadd.f32 %v2538_v26, %v7235_v43  ;;  %v2551_v28 = vadd.f32 %v2539_v8, %v7237_v33  ;;  %v2552_v47 = vadd.f32 %v2540_v35, %v7254_v18 }
 0x23c   : >>> { %v2553_v29 = vadd.f32 %v2541_v59, %v7919_v45  ;;  %v2554_v41 = vmul.f32 %v7240_v24, %v7920_v31  ;;  %v2555_v58 = vmul.f32 %v7243_v7, %v7920_v31  ;;  %v2556_v57 = vmul.f32 %v7246_v48, %v7920_v31  ;;  %v7921_v59 = vld [vmem:[#allocation48_spill] sm:$0xff] }
 0x23d   : >>> { %v2557_v40 = vmul.f32 %v7259_v63, %v7920_v31  ;;  %v2558_v32 = vmul.f32 %v7262_v13, %v7920_v31  ;;  %v2559_v55 = vmul.f32 %v7271_v38, %v7920_v31  ;;  %v2560_v43 = vmul.f32 %v7274_v2, %v7920_v31 }
 0x23e   : >>> { %v2561_v33 = vmul.f32 %v7277_v62, %v7920_v31  ;;  %v2562_v24 = vmul.f32 %v7288_v30, %v7920_v31  ;;  %v2563_v18 = vmul.f32 %v7291_v20, %v7920_v31  ;;  %v2564_v25 = vmul.f32 %v7294_v15, %v7920_v31 }
 0x23f   : >>> { %v2565_v9 = vmul.f32 %v7335_v1, %v7920_v31  ;;  %v2566_v22 = vadd.f32 %v2554_v41, %v2542_v12  ;;  %v2567_v51 = vadd.f32 %v2555_v58, %v2543_v56  ;;  %v2568_v53 = vadd.f32 %v2556_v57, %v2544_v60  ;;  %v7508_v41 = vld [vmem:[%s5887_s27 + $0x7a8] sm:$0xff] }
 0x240   : >>> { %v2569_v54 = vadd.f32 %v2557_v40, %v2545_v50  ;;  %v2570_v39 = vadd.f32 %v2558_v32, %v2546_v21  ;;  %v2571_v5 = vadd.f32 %v2559_v55, %v2547_v46  ;;  %v2572_v37 = vadd.f32 %v2560_v43, %v2548_v4  ;;  %v3328_v21 = vld [vmem:[%s5887_s27 + $0x770] sm:$0xff]  ;;  %v3337_v43 = vld [vmem:[%s5887_s27 + $0x7b8] sm:$0xff] }
 0x241   : >>> { %v2573_v6 = vadd.f32 %v2561_v33, %v2549_v17  ;;  %v2574_v3 = vadd.f32 %v2562_v24, %v2550_v11  ;;  %v2575_v26 = vadd.f32 %v2563_v18, %v2551_v28  ;;  %v2576_v8 = vadd.f32 %v2564_v25, %v2552_v47  ;;  %v7496_v17 = vld [vmem:[%s5887_s27 + $0x788] sm:$0xff]  ;;  %v3336_v55 = vld [vmem:[%s5887_s27 + $0x7b0] sm:$0xff]  ;;  %v3338_v33 = vld [vmem:[%s5887_s27 + $0x7c0] sm:$0xff] }
 0x242   : >>> { %v2577_v35 = vadd.f32 %v2565_v9, %v2553_v29  ;;  %v2578_v45 = vmul.f32 %v7243_v7, %v7921_v59  ;;  %v2579_v31 = vmul.f32 %v7246_v48, %v7921_v59  ;;  %v2580_v12 = vmul.f32 %v7259_v63, %v7921_v59  ;;  %v7502_v29 = vld [vmem:[%s5887_s27 + $0x798] sm:$0xff]  ;;  %v3339_v18 = vld [vmem:[%s5887_s27 + $0x7c8] sm:$0xff] }
 0x243   : >>> { %v2581_v56 = vmul.f32 %v7262_v13, %v7921_v59  ;;  %v2582_v60 = vmul.f32 %v7271_v38, %v7921_v59  ;;  %v2583_v50 = vmul.f32 %v7274_v2, %v7921_v59  ;;  %v2584_v7 = vmul.f32 %v7277_v62, %v7921_v59  ;;  %v3329_v2 = vld [vmem:[%s5887_s27 + $0x778] sm:$0xff]  ;;  %v7922_v25 = vld [vmem:[#allocation41_spill] sm:$0xff] }
 0x244   : >>> { %v2585_v48 = vmul.f32 %v7288_v30, %v7921_v59  ;;  %v2586_v63 = vmul.f32 %v7291_v20, %v7921_v59  ;;  %v2587_v13 = vmul.f32 %v7294_v15, %v7921_v59  ;;  %v2588_v38 = vmul.f32 %v7335_v1, %v7921_v59  ;;  %v7493_v20 = vld [vmem:[%s5887_s27 + $0x780] sm:$0xff]  ;;  %v7499_v15 = vld [vmem:[%s5887_s27 + $0x790] sm:$0xff] }
 0x245   : >>> { %v2589_v62 = vmul.f32 %v7370_v36, %v7921_v59  ;;  %v2590_v46 = vadd.f32 %v2578_v45, %v2566_v22  ;;  %v2591_v4 = vadd.f32 %v2579_v31, %v2567_v51  ;;  %v2592_v30 = vadd.f32 %v2580_v12, %v2568_v53  ;;  %v7505_v36 = vld [vmem:[%s5887_s27 + $0x7a0] sm:$0xff] }
 0x246   : >>> { %v2593_v1 = vadd.f32 %v2581_v56, %v2569_v54  ;;  %v2594_v11 = vadd.f32 %v2582_v60, %v2570_v39  ;;  %v2595_v28 = vadd.f32 %v2583_v50, %v2571_v5  ;;  %v2596_v47 = vadd.f32 %v2584_v7, %v2572_v37 }
 0x247   : >>> { %v2597_v58 = vadd.f32 %v2585_v48, %v2573_v6  ;;  %v2598_v57 = vadd.f32 %v2586_v63, %v2574_v3  ;;  %v2599_v40 = vadd.f32 %v2587_v13, %v2575_v26  ;;  %v2600_v32 = vadd.f32 %v2588_v38, %v2576_v8  ;;  %v3340_v13 = vld [vmem:[%s5887_s27 + $0x7d0] sm:$0xff] }
 0x248   : >>> { %v2601_v24 = vadd.f32 %v2589_v62, %v2577_v35  ;;  %v2618_v9 = vmul.f32 %v3328_v21, %v7922_v25  ;;  %v2619_v22 = vmul.f32 %v3329_v2, %v7922_v25  ;;  %v2620_v51 = vmul.f32 %v7493_v20, %v7922_v25 }
 0x249   : >>> { %v2621_v53 = vmul.f32 %v7496_v17, %v7922_v25  ;;  %v2622_v54 = vmul.f32 %v7499_v15, %v7922_v25  ;;  %v2623_v39 = vmul.f32 %v7502_v29, %v7922_v25  ;;  %v2624_v5 = vmul.f32 %v7505_v36, %v7922_v25 }
 0x24a   : >>> { %v2625_v37 = vmul.f32 %v7508_v41, %v7922_v25  ;;  %v2626_v6 = vmul.f32 %v3336_v55, %v7922_v25  ;;  %v2627_v3 = vmul.f32 %v3337_v43, %v7922_v25  ;;  %v2628_v26 = vmul.f32 %v3338_v33, %v7922_v25 }
 0x24b   : >>> { %v2629_v8 = vmul.f32 %v3339_v18, %v7922_v25  ;;  %v2630_v35 = vadd.f32 %v2618_v9, %v2590_v46  ;;  %v2631_v59 = vadd.f32 %v2619_v22, %v2591_v4  ;;  %v2632_v45 = vadd.f32 %v2620_v51, %v2592_v30 }
 0x24c   : >>> { %v2633_v31 = vadd.f32 %v2621_v53, %v2593_v1  ;;  %v2634_v12 = vadd.f32 %v2622_v54, %v2594_v11  ;;  %v2635_v56 = vadd.f32 %v2623_v39, %v2595_v28  ;;  %v2636_v60 = vadd.f32 %v2624_v5, %v2596_v47 }
 0x24d   : >>> { %v2637_v50 = vadd.f32 %v2625_v37, %v2597_v58  ;;  %v2638_v7 = vadd.f32 %v2626_v6, %v2598_v57  ;;  %v2639_v48 = vadd.f32 %v2627_v3, %v2599_v40  ;;  %v2640_v63 = vadd.f32 %v2628_v26, %v2600_v32  ;;  %v3341_v37 = vld [vmem:[%s5887_s27 + $0x7d8] sm:$0xff]  ;;  %v7923_v3 = vld [vmem:[#allocation45_spill] sm:$0xff]  ;;  %s2765_s27 = sadd.s32 (%p7583_p13), 4, %s7661_s15 }
 0x24e   : >>> { %v2641_v38 = vadd.f32 %v2629_v8, %v2601_v24  ;;  %v2642_v21 = vmul.f32 %v3329_v2, %v7268_v16  ;;  %v2643_v62 = vmul.f32 %v7493_v20, %v7268_v16  ;;  %v2644_v46 = vmul.f32 %v7496_v17, %v7268_v16  ;;  %s2766_s0 = sshra.s32 (%p7583_p13), %s2765_s27, 7  ;;  %s2771_s1 = sand.u32 (%p7583_p13), 127, %s2765_s27 }
 0x24f   : >>> { %v2645_v4 = vmul.f32 %v7499_v15, %v7268_v16  ;;  %v2646_v30 = vmul.f32 %v7502_v29, %v7268_v16  ;;  %v2647_v1 = vmul.f32 %v7505_v36, %v7268_v16  ;;  %v2648_v11 = vmul.f32 %v7508_v41, %v7268_v16  ;;  %s2768_s17 = sadd.s32 (%p7583_p13), %s3811_s10, %s2766_s0 }
 0x250   : >>> { %v2649_v2 = vmul.f32 %v3336_v55, %v7268_v16  ;;  %v2650_v28 = vmul.f32 %v3337_v43, %v7268_v16  ;;  %v2651_v47 = vmul.f32 %v3338_v33, %v7268_v16  ;;  %v2652_v58 = vmul.f32 %v3339_v18, %v7268_v16  ;;  %s3346_s18 = sshll.u32 (%p7583_p13), %s2768_s17, 7 }
 0x251   : >>> { %v2653_v57 = vmul.f32 %v3340_v13, %v7268_v16  ;;  %v2654_v40 = vadd.f32 %v2642_v21, %v2630_v35  ;;  %v2655_v32 = vadd.f32 %v2643_v62, %v2631_v59  ;;  %v2656_v24 = vadd.f32 %v2644_v46, %v2632_v45  ;;  %s2772_s19 = sadd.s32 (%p7583_p13), %s3346_s18, %s2771_s1 }
 0x252   : >>> { %v2657_v25 = vadd.f32 %v2645_v4, %v2633_v31  ;;  %v2658_v9 = vadd.f32 %v2646_v30, %v2634_v12  ;;  %v2659_v22 = vadd.f32 %v2647_v1, %v2635_v56  ;;  %v2660_v51 = vadd.f32 %v2648_v11, %v2636_v60  ;;  %s2773_s3 = sld [smem:[#allocation11 + %s2772_s19]] (%p7583_p13) }
 0x253   : >>> { %v2661_v53 = vadd.f32 %v2649_v2, %v2637_v50  ;;  %v2662_v54 = vadd.f32 %v2650_v28, %v2638_v7  ;;  %v2663_v39 = vadd.f32 %v2651_v47, %v2639_v48  ;;  %v2664_v5 = vadd.f32 %v2652_v58, %v2640_v63 }
 0x254   : >>> { %v2665_v6 = vadd.f32 %v2653_v57, %v2641_v38  ;;  %v2666_v26 = vmul.f32 %v7493_v20, %v7923_v3  ;;  %v2667_v8 = vmul.f32 %v7496_v17, %v7923_v3  ;;  %v2668_v16 = vmul.f32 %v7499_v15, %v7923_v3 }
 0x255   : >>> { %v2669_v35 = vmul.f32 %v7502_v29, %v7923_v3  ;;  %v2670_v59 = vmul.f32 %v7505_v36, %v7923_v3  ;;  %v2671_v45 = vmul.f32 %v7508_v41, %v7923_v3  ;;  %v2672_v31 = vmul.f32 %v3336_v55, %v7923_v3 }
 0x256   : >>> { %v2673_v12 = vmul.f32 %v3337_v43, %v7923_v3  ;;  %v2674_v20 = vmul.f32 %v3338_v33, %v7923_v3  ;;  %v2675_v17 = vmul.f32 %v3339_v18, %v7923_v3  ;;  %v2676_v56 = vmul.f32 %v3340_v13, %v7923_v3 }
 0x257   : >>> { %v2677_v15 = vmul.f32 %v3341_v37, %v7923_v3  ;;  %v2678_v60 = vadd.f32 %v2666_v26, %v2654_v40   ;;  %v2679_v7 = vadd.f32 %v2667_v8, %v2655_v32   ;;  %v2680_v48 = vadd.f32 %v2668_v16, %v2656_v24  }
 0x258   : >>> { %v2681_v63 = vadd.f32 %v2669_v35, %v2657_v25   ;;  %v2682_v21 = vadd.f32 %v2670_v59, %v2658_v9   ;;  %v2683_v62 = vadd.f32 %v2671_v45, %v2659_v22   ;;  %v7570_v29 = vadd.f32 %v2672_v31, %v2660_v51  }
 0x259   : >>> { %v7572_v12 = vadd.f32 %v2673_v12, %v2661_v53   ;;  %v7574_v40 = vadd.f32 %v2674_v20, %v2662_v54   ;;  %v7576_v36 = vadd.f32 %v2675_v17, %v2663_v39   ;;  %v7578_v58 = vadd.f32 %v2676_v56, %v2664_v5   ;;  %v7955_v56 = vld [vmem:[#allocation40_spill] sm:$0xff] (%p7583_p13) }
 0x25a   : >>> { %v7924_v46 = vmov %v7570_v29  ;;  %v7580_v41 = vadd.f32 %v2677_v15, %v2665_v6   ;;  %v7937_v54 = vmov %v2683_v62  ;;  %v7938_v2 = vmov %v2682_v21 }
 0x25b   : >>> { %v7925_v55 = vmov %v7572_v12  ;;  %v7926_v4 = vmov %v7574_v40  ;;  %v7927_v33 = vmov %v7576_v36  ;;  %v7928_v30 = vmov %v7578_v58 }
 0x25c   : >>> { %v7929_v13 = vmov %v7580_v41  ;;  %v7932_v58 = vmov %v7928_v30  ;;  %v7933_v6 = vmov %v7927_v33  ;;  %v7934_v40 = vmov %v7926_v4 }
 0x25d   : >>> { %v7931_v41 = vmov %v7929_v13  ;;  %v7935_v12 = vmov %v7925_v55  ;;  %v7936_v53 = vmov %v7924_v46  ;;  %v7939_v20 = vmov %v2681_v63  ;;  %1481 = sbr.rel (!%p7583_p13) target bundleno = 364 (0x16c), region = 155 }
 0x25e   : >>> { %v7940_v28 = vmov %v2680_v48  ;;  %v7941_v18 = vmov %v2679_v7  ;;  %v7942_v50 = vmov %v2678_v60  ;;  %v7943_v32 = vmov %v7410_v14 }
 0x25f   : >>> { %v7944_v29 = vmov %v7918_v0  ;;  %v7945_v26 = vmov %v7917_v44  ;;  %v7946_v36 = vmov %v7916_v19  ;;  %v7947_v17 = vmov %v7915_v23 }
 0x260   : >>> { %v7948_v9 = vmov %v7400_v61  ;;  %v7949_v51 = vmov %v7398_v42  ;;  %v7950_v43 = vmov %v7396_v10  ;;  %v7951_v47 = vmov %v7394_v49 }
 0x261   : >>> { %v7952_v35 = vmov %v7392_v27  ;;  %v7953_v15 = vmov %v7390_v34  ;;  %v7954_v38 = vmov %v7388_v52  ;;  %v2691_v1 = vmax.f32 (%p7583_p13), %v2678_v60, %v2679_v7 }
 0x262   : >> { %v2690_v38 = vmax.f32 %v7388_v52, %v7390_v34  ;;  %v2709_v11 = vmax.f32 %v7392_v27, %v7394_v49  ;;  %v2710_v57 = vmax.f32 %v2680_v48, %v2681_v63  ;;  %v2726_v52 = vmax.f32 %v7396_v10, %v7398_v42 }
 0x263   : >> { %v2727_v34 = vmax.f32 %v2682_v21, %v2683_v62  ;;  %v2694_v18 = vstv %s2693_s14  ;;  %v2743_v50 = vmax.f32 %v7400_v61, %v7915_v23  ;;  %v2744_v10 = vmax.f32 %v7924_v46, %v7925_v55  ;;  %s2755_s14 = sadd.s32 %s3345_s13, %s2754_s28 }
 0x264   : >> { %v2692_v41 = vmax.f32 %v2690_v38, %v2691_v1  ;;  %v2711_v43 = vmax.f32 %v2709_v11, %v2710_v57  ;;  %v2760_v28 = vmax.f32 %v7916_v19, %v7917_v44  ;;  %v2761_v47 = vmax.f32 %v7926_v4, %v7927_v33  ;;  %s2756_s16 = sld [smem:[#allocation11 + %s2755_s14]] }
 0x265   : >> { %v2728_v49 = vmax.f32 %v2726_v52, %v2727_v34  ;;  %v2745_v23 = vmax.f32 %v2743_v50, %v2744_v10  ;;  %v2706_v58 = vstv %s2705_s20  ;;  %v2777_v44 = vmax.f32 %v7918_v0, %v7410_v14  ;;  %s2783_s20 = sshra.s32 %s2782_s12, 7 }
 0x266   : >> { %v2695_v27 = vadd.f32 %v2694_v18, %v2692_v41  ;;  %v2712_v42 = vadd.f32 %v2711_v43, %v2694_v18  ;;  %v2762_v24 = vmax.f32 %v2760_v28, %v2761_v47  ;;  %v2778_v19 = vmax.f32 %v7928_v30, %v7929_v13  ;;  %s2785_s21 = sadd.s32 %s3811_s10, %s2783_s20  ;;  %s1467_s10 = sadd.s32 (%p1471_p0), 1, %s3811_s10  }
 0x267   : >> { %v2729_v61 = vadd.f32 %v2728_v49, %v2694_v18  ;;  %v2723_v25 = vstv %s2722_s29  ;;  %v2746_v22 = vadd.f32 %v2745_v23, %v2694_v18  ;;  %v2740_v54 = vstv %s2739_s26  ;;  %s3347_s23 = sshll.u32 %s2785_s21, 7  ;;  %p1464_p1 = scmp.ge.s32.totalorder (%p1471_p0), %s1467_s10, 16  }
 0x268   : >> { %v2696_v2 = vmax.f32 %v2695_v27, 0.0  ;;  %v2713_v40 = vmax.f32 %v2712_v42, 0.0  ;;  %v2763_v39 = vadd.f32 %v2762_v24, %v2694_v18  ;;  %v2779_v0 = vmax.f32 %v2777_v44, %v2778_v19  ;;  %s2789_s24 = sadd.s32 %s3347_s23, %s2788_s22 }
 0x269   : >> { %v2730_v9 = vmax.f32 %v2729_v61, 0.0  ;;  %v2747_v5 = vmax.f32 %v2746_v22, 0.0  ;;  %s2790_s30 = sld [smem:[#allocation11 + %s2789_s24]]  ;;  %v2774_v35 = vstv %s2773_s3 }
 0x26a   : >> { %v2707_v32 = vmul.f32 %v2706_v58, %v2696_v2  ;;  %v2724_v51 = vmul.f32 %v2723_v25, %v2713_v40  ;;  %v2757_v6 = vstv %s2756_s16  ;;  %v2764_v3 = vmax.f32 %v2763_v39, 0.0 }
 0x26b   : >> { %v2741_v14 = vmul.f32 %v2740_v54, %v2730_v9  ;;  %v2780_v26 = vadd.f32 %v2779_v0, %v2694_v18  ;;  %v2758_v8 = vmul.f32 %v2757_v6, %v2747_v5 }
 0x26c   : >> { %v2725_v53 = vadd.f32 %v2724_v51, %v2707_v32  ;;  %v2775_v59 = vmul.f32 %v2774_v35, %v2764_v3 }
 0x26d   : >> { %v2781_v45 = vmax.f32 %v2780_v26, 0.0 }
 0x26e   : >> { %v2742_v37 = vadd.f32 %v2741_v14, %v2725_v53 }
 0x26f   : >> { %v2791_v12 = vstv %s2790_s30 }
 0x270   : >> { %v2759_v16 = vadd.f32 %v2758_v8, %v2742_v37  ;;  %v2792_v20 = vmul.f32 %v2791_v12, %v2781_v45 }
 0x272   : >> { %v2776_v31 = vadd.f32 %v2775_v59, %v2759_v16 }
 0x274   : >> { %v2793_v17 = vadd.f32 %v2792_v20, %v2776_v31  ;;  %1473 = sbr.rel (!%p1471_p0) target bundleno = 358 (0x166), region = 166 }
 0x276   : >> { %v2794_v15 = vadd.f32 %v7955_v56, %v2793_v17  }
 0x278   : >> { %v7956_v23 = vmov %v2794_v15 }
 0x279   : > { %v7957_v23 = vmov %v2794_v15  ;;  %1466 = sbr.rel (!%p1464_p1) target bundleno = 357 (0x165), region = 177  ;;  %s2795_s15 = sld [smem:[#allocation3]] (%p1464_p1) }
 0x27f   :  { %v2796_v60 = vstv %s2795_s15 }
 0x280   :  { %v2797_v7 = vadd.f32 %v2796_v60, %v2794_v15 }
 0x282   :  { %v2798_v48 = vsub.f32 0.0, %v2797_v7 }
 0x284   :  { %v2799_v63 = vmul.f32 1.442695, %v2798_v48 }
 0x286   :  { %3603 = vpow2.f32 %v2799_v63 }
 0x293   :  { %v3604_v21 = vpop.eup %3603 }
 0x294   :  { %v2801_v62 = vadd.f32 1.0, %v3604_v21 }
 0x296   :  { %3605 = vrcp.f32 %v2801_v62 }
 0x2a3   :  { %v3606_v29 = vpop.eup %3605 }
 0x2a4   :  { %2804 = vst [vmem:[%s7713_s7] sm:$0xff] %v3606_v29 }
 0x2a5   :  { %2809 = vsyncpa [#allocation5], 1 }
 0x2a6   :  { %2810 = vsyncpa [#allocation7], 1 }
 0x2a7   :  { %2811 = vsyncpa [#allocation10], 1 }

</bundles_post_ra>
